<compile_context>
chip_gen: v6e
topology: v6e:2x2x1
jax: 0.10.0
libtpu: 0.0.40
codegen_flags: <defaults>
</compile_context>

<pallas_src>
import functools

import jax
import jax.numpy as jnp
from jax.experimental import pallas as pl
from jax.experimental.pallas import tpu as pltpu

# Problem sizes (small, consistent with the module's forward).
BS = 2
SEQ = 8
D_MODEL = 32
N_HEADS = 4
D_K = D_MODEL // N_HEADS
D_FF = 64
EPS = 1e-5  # nn.LayerNorm default


def _layernorm(x, gamma, beta):
    mu = jnp.mean(x, axis=-1, keepdims=True)
    var = jnp.mean((x - mu) ** 2, axis=-1, keepdims=True)
    return (x - mu) * jax.lax.rsqrt(var + EPS) * gamma + beta


def transformer_layer_kernel(
    x_ref, xflat_ref, qadd_ref, kvadd_ref, ik_ref, iv_ref, mask_ref,
    wq_ref, wkv_ref, gsum_ref, expand_ref, jsum_ref, w1_ref, w2_ref, vp_ref,
    out_ref, *, bs, seq_len, d_model, n_heads,
):
    d_k = d_model // n_heads
    sd = seq_len * d_model
    n = bs * seq_len
    d_ff = w1_ref.shape[1]

    # Default (single-pass) MXU precision for the "real" matmuls.
    dot = functools.partial(jnp.dot, preferred_element_type=jnp.float32)
    # Structural one-hot dots: exact f32 (operands not rounded to bf16); tiny and
    # the kernel is latency-bound, so HIGHEST is effectively free here.
    xdot = functools.partial(jnp.dot, preferred_element_type=jnp.float32,
                             precision=jax.lax.Precision.HIGHEST)

    x = x_ref[...]                                            # (N, D)

    # ---- projections -----------------------------------------------------------
    # Q arrives already tiled across the S key blocks: col = j*D + d -> q[row, d].
    q_tile = dot(x, wq_ref[...]) + qadd_ref[...]              # (N, S*D)

    # K/V produced directly in the lane-dense (B, S*D) layout via a block-diagonal
    # weight (built in the wrapper) -> no in-kernel sublane->lane relayout.
    # kvadd already carries [bk + pos_k | bv + pos_v] flattened per batch row.
    kvflat = dot(xflat_ref[...], wkv_ref[...]) + kvadd_ref[...]   # (B, 2*S*D) f32
    kbc = jnp.broadcast_to(kvflat[:, None, :sd],
                           (bs, seq_len, sd)).reshape(n, sd)      # (N, S*D)
    vbc = jnp.broadcast_to(kvflat[:, None, sd:],
                           (bs, seq_len, sd)).reshape(n, sd)      # (N, S*D)

    kk = ik_ref[...] + kbc                                    # (N, S*D)  k + inter_k
    vv = iv_ref[...] + vbc                                    # (N, S*D)  v + inter_v

    # ---- attention scores, all heads at once, dense (N, S*H) tile ---------------
    # scores[(b,i), j*H + h] = sum_{d in head h} q[b,i,d] * kk[(b,i), j*D + d]
    scores = xdot(q_tile * kk, gsum_ref[...])                 # (N, S*H)
    scores = scores * (1.0 / d_k ** 0.5) + mask_ref[...]      # additive -1e30 mask

    # global max subtraction, matching torch's (scores - scores.max()).softmax(-1)
    m = jnp.max(jnp.max(scores, axis=1, keepdims=True), axis=0, keepdims=True)
    ew = jnp.exp(scores - m)                                  # (N, S*H) unnormalised

    # ---- attention output (softmax division deferred) ---------------------------
    # Expand unnormalised weights back to the (j, d) lane layout, then numerator
    # and softmax denominator share the same block-sum-over-j one-hot matmul.
    epe = xdot(ew, expand_ref[...])                           # (N, S*D)
    num = xdot(epe * vv, jsum_ref[...])                       # (N, D)
    den = xdot(epe, jsum_ref[...])                            # (N, D)
    context = num * pl.reciprocal(den, approx=True)           # (N, D)

    # ---- packed small parameters ------------------------------------------------
    vp = vp_ref[...]
    b1 = vp[0:1, :d_ff]
    b2 = vp[1:2, :d_model]
    ln1_g = vp[2:3, :d_model]
    ln1_b = vp[3:4, :d_model]
    ln2_g = vp[4:5, :d_model]
    ln2_b = vp[5:6, :d_model]

    # ---- residual + LayerNorm 1 (dropout = identity) ----------------------------
    context = _layernorm(context + x, ln1_g, ln1_b)

    # ---- feed-forward ------------------------------------------------------------
    h1 = jnp.maximum(dot(context, w1_ref[...]) + b1, 0.0)
    ff = dot(h1, w2_ref[...]) + b2

    # ---- residual + LayerNorm 2 ---------------------------------------------------
    out_ref[...] = _layernorm(ff + context, ln2_g, ln2_b).astype(out_ref.dtype)


@jax.jit
def time_interval_transformer_layer(seq, pos_k, pos_v, inter_k, inter_v, mask, params):
    (wq, bq, wk, bk, wv, bv, ln1_g, ln1_b, w1, b1, w2, b2, ln2_g, ln2_b) = params
    bs, L, D = seq.shape
    H = N_HEADS
    DK = D // H
    F = w1.shape[1]
    N = bs * L
    SD = L * D
    W = max(F, D)
    f32 = jnp.float32

    x2d = seq.reshape(N, D)
    # bf16: identical to what default MXU precision would round to anyway.
    xflat = seq.reshape(bs, SD).astype(jnp.bfloat16)

    # Q weight / bias pre-tiled across the S key blocks (lane-dense layout).
    wq_t = jnp.tile(wq, (1, L))                                        # (D, S*D)
    q_add = jnp.tile(bq, (1, L)).astype(f32)                           # (1, S*D)

    # Block-diagonal K/V weight: kernel emits k/v directly as one lane-dense
    # (B, S*D) row per batch (no in-kernel relayout).
    eye = jnp.eye(L, dtype=seq.dtype)
    wkv_big = jnp.concatenate([jnp.kron(eye, wk), jnp.kron(eye, wv)],
                              axis=1).astype(jnp.bfloat16)             # (S*D, 2*S*D)
    kv_add = jnp.concatenate(
        [jnp.tile(bk, (1, L)) + pos_k.reshape(bs, SD),
         jnp.tile(bv, (1, L)) + pos_v.reshape(bs, SD)], axis=1).astype(f32)  # (B, 2*S*D)

    # Interaction tensors reshaped (in HBM, free) to lane-dense slabs.
    inter_k2d = inter_k.reshape(N, SD)                                 # (N, S*D)
    inter_v2d = inter_v.reshape(N, SD)

    # Additive mask, pre-broadcast over heads to the score layout col = j*H + h.
    mask_add = jnp.where(mask == 0, f32(-1e30), f32(0.0)).reshape(N, L)
    mask_sh = jnp.repeat(mask_add, H, axis=1)                          # (N, S*H)

    # Constant one-hot selection matrices, hoisted out of the kernel body
    # (built from arange only -> XLA constant-folds them at compile time).
    r = jnp.arange(SD)                                                 # (j, d) rows
    c = jnp.arange(L * H)                                              # (j, h) cols
    g_sum = ((r[:, None] // D == c[None, :] // H) &
             ((r[:, None] % D) // DK == c[None, :] % H)).astype(f32)   # (S*D, S*H)
    expand = g_sum.T                                                   # (S*H, S*D)
    j_sum = ((r[:, None] % D) == jnp.arange(D)[None, :]).astype(f32)   # (S*D, D)

    # Pack the 6 small per-feature vectors into a single (8, W) slab (one DMA).
    def _pad(row):
        return jnp.pad(row, ((0, 0), (0, W - row.shape[1])))
    vec_params = jnp.concatenate(
        [_pad(b1), _pad(b2), _pad(ln1_g), _pad(ln1_b), _pad(ln2_g), _pad(ln2_b),
         jnp.zeros((2, W), f32)], axis=0)                              # (8, W)

    kernel = functools.partial(
        transformer_layer_kernel, bs=bs, seq_len=L, d_model=D, n_heads=H)

    vmem = pl.BlockSpec(memory_space=pltpu.MemorySpace.VMEM)

    # Single gridless invocation: the whole problem (<1 MiB incl. constants) sits in
    # VMEM on v5e/v6e/v7x.  For production batch sizes, reintroduce a leading batch
    # grid axis marked "parallel" so v7x's two TensorCores shard it, and tile
    # inter_k/inter_v over query blocks to respect v7x's 64 MiB VMEM.
    out = pl.pallas_call(
        kernel,
        out_shape=jax.ShapeDtypeStruct((N, D), seq.dtype),
        in_specs=[vmem] * 15,
        out_specs=vmem,
    )(x2d, xflat, q_add, kv_add, inter_k2d, inter_v2d, mask_sh,
      wq_t, wkv_big, g_sum, expand, j_sum, w1, w2, vec_params)
    return out.reshape(bs, L, D)


def reference(seq, pos_k, pos_v, inter_k, inter_v, mask, params):
    (wq, bq, wk, bk, wv, bv, ln1_g, ln1_b, w1, b1, w2, b2, ln2_g, ln2_b) = params
    bs, L, D = seq.shape
    q = (seq @ wq + bq).reshape(bs, L, N_HEADS, D_K).transpose(0, 2, 1, 3)
    k = (seq @ wk + bk + pos_k).reshape(bs, L, N_HEADS, D_K).transpose(0, 2, 1, 3)
    v = (seq @ wv + bv + pos_v).reshape(bs, L, N_HEADS, D_K).transpose(0, 2, 1, 3)
    ik = inter_k.reshape(bs, L, L, N_HEADS, D_K).transpose(0, 3, 1, 2, 4)
    iv = inter_v.reshape(bs, L, L, N_HEADS, D_K).transpose(0, 3, 1, 2, 4)
    scores = jnp.einsum('bhid,bhjd->bhij', q, k)
    scores = scores + jnp.einsum('bhid,bhijd->bhij', q, ik)
    scores = scores / (D_K ** 0.5)
    scores = jnp.where(mask[:, None, :, :] == 0, -jnp.inf, scores)
    scores = jax.nn.softmax(scores, axis=-1)
    out = jnp.einsum('bhij,bhjd->bhid', scores, v)
    out = out + jnp.einsum('bhij,bhijd->bhid', scores, iv)
    context = out.transpose(0, 2, 1, 3).reshape(bs, L, D)

    def ln(x, g, b):
        mu = x.mean(-1, keepdims=True)
        var = ((x - mu) ** 2).mean(-1, keepdims=True)
        return (x - mu) / jnp.sqrt(var + EPS) * g + b

    context = ln(context + seq, ln1_g, ln1_b)
    ff = jnp.maximum(context @ w1 + b1, 0.0) @ w2 + b2
    return ln(ff + context, ln2_g, ln2_b)


if __name__ == "__main__":
    key = jax.random.PRNGKey(0)
    keys = jax.random.split(key, 16)

    seq = jax.random.normal(keys[0], (BS, SEQ, D_MODEL), jnp.float32)
    pos_k = jax.random.normal(keys[1], (BS, SEQ, D_MODEL), jnp.float32) * 0.1
    pos_v = jax.random.normal(keys[2], (BS, SEQ, D_MODEL), jnp.float32) * 0.1
    inter_k = jax.random.normal(keys[3], (BS, SEQ, SEQ, D_MODEL), jnp.float32) * 0.1
    inter_v = jax.random.normal(keys[4], (BS, SEQ, SEQ, D_MODEL), jnp.float32) * 0.1
    # causal mask (1 = keep, 0 = mask out); every row has at least one valid key
    mask = jnp.broadcast_to(
        jnp.tril(jnp.ones((SEQ, SEQ), jnp.float32)), (BS, SEQ, SEQ)
    )

    s = 0.1
    params = (
        jax.random.normal(keys[5], (D_MODEL, D_MODEL), jnp.float32) * s,   # wq
        jax.random.normal(keys[6], (1, D_MODEL), jnp.float32) * s,         # bq
        jax.random.normal(keys[7], (D_MODEL, D_MODEL), jnp.float32) * s,   # wk
        jax.random.normal(keys[8], (1, D_MODEL), jnp.float32) * s,         # bk
        jax.random.normal(keys[9], (D_MODEL, D_MODEL), jnp.float32) * s,   # wv
        jax.random.normal(keys[10], (1, D_MODEL), jnp.float32) * s,        # bv
        jnp.ones((1, D_MODEL), jnp.float32),                               # ln1 gamma
        jnp.zeros((1, D_MODEL), jnp.float32),                              # ln1 beta
        jax.random.normal(keys[11], (D_MODEL, D_FF), jnp.float32) * s,     # w1
        jax.random.normal(keys[12], (1, D_FF), jnp.float32) * s,           # b1
        jax.random.normal(keys[13], (D_FF, D_MODEL), jnp.float32) * s,     # w2
        jax.random.normal(keys[14], (1, D_MODEL), jnp.float32) * s,        # b2
        jnp.ones((1, D_MODEL), jnp.float32),                               # ln2 gamma
        jnp.zeros((1, D_MODEL), jnp.float32),                              # ln2 beta
    )

    out = time_interval_transformer_layer(seq, pos_k, pos_v, inter_k, inter_v, mask, params)
    out = jax.block_until_ready(out)

    ref = reference(seq, pos_k, pos_v, inter_k, inter_v, mask, params)
    assert out.shape == (BS, SEQ, D_MODEL)
    # Projection / FFN matmuls run at default (bf16 single-pass) MXU precision in
    # both kernel and reference; structural one-hot dots in the kernel are exact.
    assert jnp.allclose(out, ref, atol=2e-2, rtol=2e-2), float(jnp.max(jnp.abs(out - ref)))

    print("KERNEL_OK")
</pallas_src>

<mosaic_0001>
module attributes {stable_mosaic.version = 11 : i64} {
  func.func @transformer_layer_kernel(%arg0: memref<16x32xf32, #tpu.memory_space<vmem>>, %arg1: memref<2x256xbf16, #tpu.memory_space<vmem>>, %arg2: memref<1x256xf32, #tpu.memory_space<vmem>>, %arg3: memref<2x512xf32, #tpu.memory_space<vmem>>, %arg4: memref<16x256xf32, #tpu.memory_space<vmem>>, %arg5: memref<16x256xf32, #tpu.memory_space<vmem>>, %arg6: memref<16x32xf32, #tpu.memory_space<vmem>>, %arg7: memref<32x256xf32, #tpu.memory_space<vmem>>, %arg8: memref<256x512xbf16, #tpu.memory_space<vmem>>, %arg9: memref<256x32xf32, #tpu.memory_space<vmem>>, %arg10: memref<32x256xf32, #tpu.memory_space<vmem>>, %arg11: memref<256x32xf32, #tpu.memory_space<vmem>>, %arg12: memref<32x64xf32, #tpu.memory_space<vmem>>, %arg13: memref<64x32xf32, #tpu.memory_space<vmem>>, %arg14: memref<8x64xf32, #tpu.memory_space<vmem>>, %arg15: memref<16x32xf32, #tpu.memory_space<vmem>>) attributes {dimension_semantics = [], scalar_prefetch = 0 : i64, scratch_operands = 0 : i64, tpu.core_type = #tpu.core_type<tc>} {
    %c0 = arith.constant 0 : index
    %c0_0 = arith.constant 0 : index
    %0 = vector.load %arg0[%c0, %c0_0] : memref<16x32xf32, #tpu.memory_space<vmem>>, vector<16x32xf32>
    %c0_1 = arith.constant 0 : index
    %c0_2 = arith.constant 0 : index
    %1 = vector.load %arg7[%c0_1, %c0_2] : memref<32x256xf32, #tpu.memory_space<vmem>>, vector<32x256xf32>
    %cst = arith.constant dense<0.000000e+00> : vector<16x256xf32>
    %2 = tpu.matmul %0, %1, %cst {dimension_numbers = #tpu.dot_dimension_numbers<[1], [0], [0], [1], [0, 0, 1, 1], [], []>} : vector<16x32xf32>, vector<32x256xf32>, vector<16x256xf32> -> vector<16x256xf32>
    %c0_3 = arith.constant 0 : index
    %c0_4 = arith.constant 0 : index
    %3 = vector.load %arg2[%c0_3, %c0_4] : memref<1x256xf32, #tpu.memory_space<vmem>>, vector<1x256xf32>
    %4 = vector.broadcast %3 : vector<1x256xf32> to vector<16x256xf32>
    %5 = arith.addf %2, %4 : vector<16x256xf32>
    %c0_5 = arith.constant 0 : index
    %c0_6 = arith.constant 0 : index
    %6 = vector.load %arg1[%c0_5, %c0_6] : memref<2x256xbf16, #tpu.memory_space<vmem>>, vector<2x256xbf16>
    %c0_7 = arith.constant 0 : index
    %c0_8 = arith.constant 0 : index
    %7 = vector.load %arg8[%c0_7, %c0_8] : memref<256x512xbf16, #tpu.memory_space<vmem>>, vector<256x512xbf16>
    %cst_9 = arith.constant dense<0.000000e+00> : vector<2x512xf32>
    %8 = tpu.matmul %6, %7, %cst_9 {dimension_numbers = #tpu.dot_dimension_numbers<[1], [0], [0], [1], [0, 0, 1, 1], [], []>} : vector<2x256xbf16>, vector<256x512xbf16>, vector<2x512xf32> -> vector<2x512xf32>
    %c0_10 = arith.constant 0 : index
    %c0_11 = arith.constant 0 : index
    %9 = vector.load %arg3[%c0_10, %c0_11] : memref<2x512xf32, #tpu.memory_space<vmem>>, vector<2x512xf32>
    %10 = arith.addf %8, %9 : vector<2x512xf32>
    %11 = vector.extract_strided_slice %10 {offsets = [0, 0], sizes = [2, 256], strides = [1, 1]} : vector<2x512xf32> to vector<2x256xf32>
    %12 = vector.shape_cast %11 : vector<2x256xf32> to vector<2x1x256xf32>
    %13 = vector.shape_cast %12 : vector<2x1x256xf32> to vector<2x1x256xf32>
    %14 = vector.broadcast %13 : vector<2x1x256xf32> to vector<2x8x256xf32>
    %15 = vector.shape_cast %14 : vector<2x8x256xf32> to vector<16x256xf32>
    %16 = vector.extract_strided_slice %10 {offsets = [0, 256], sizes = [2, 256], strides = [1, 1]} : vector<2x512xf32> to vector<2x256xf32>
    %17 = vector.shape_cast %16 : vector<2x256xf32> to vector<2x1x256xf32>
    %18 = vector.shape_cast %17 : vector<2x1x256xf32> to vector<2x1x256xf32>
    %19 = vector.broadcast %18 : vector<2x1x256xf32> to vector<2x8x256xf32>
    %20 = vector.shape_cast %19 : vector<2x8x256xf32> to vector<16x256xf32>
    %c0_12 = arith.constant 0 : index
    %c0_13 = arith.constant 0 : index
    %21 = vector.load %arg4[%c0_12, %c0_13] : memref<16x256xf32, #tpu.memory_space<vmem>>, vector<16x256xf32>
    %22 = arith.addf %21, %15 : vector<16x256xf32>
    %c0_14 = arith.constant 0 : index
    %c0_15 = arith.constant 0 : index
    %23 = vector.load %arg5[%c0_14, %c0_15] : memref<16x256xf32, #tpu.memory_space<vmem>>, vector<16x256xf32>
    %24 = arith.addf %23, %20 : vector<16x256xf32>
    %25 = arith.mulf %5, %22 : vector<16x256xf32>
    %c0_16 = arith.constant 0 : index
    %c0_17 = arith.constant 0 : index
    %26 = vector.load %arg9[%c0_16, %c0_17] : memref<256x32xf32, #tpu.memory_space<vmem>>, vector<256x32xf32>
    %cst_18 = arith.constant dense<0.000000e+00> : vector<16x32xf32>
    %27 = tpu.matmul %25, %26, %cst_18 {dimension_numbers = #tpu.dot_dimension_numbers<[1], [0], [0], [1], [0, 0, 1, 1], [], []>, precision = #tpu.contract_precision<fp32>} : vector<16x256xf32>, vector<256x32xf32>, vector<16x32xf32> -> vector<16x32xf32>
    %cst_19 = arith.constant 0.353553385 : f32
    %28 = vector.broadcast %cst_19 : f32 to vector<16x32xf32>
    %29 = arith.mulf %27, %28 : vector<16x32xf32>
    %c0_20 = arith.constant 0 : index
    %c0_21 = arith.constant 0 : index
    %30 = vector.load %arg6[%c0_20, %c0_21] : memref<16x32xf32, #tpu.memory_space<vmem>>, vector<16x32xf32>
    %31 = arith.addf %29, %30 : vector<16x32xf32>
    %cst_22 = arith.constant dense<0xFF800000> : vector<16xf32>
    %32 = vector.multi_reduction <maximumf>, %31, %cst_22 [1] : vector<16x32xf32> to vector<16xf32>
    %33 = vector.shape_cast %32 : vector<16xf32> to vector<16x1xf32>
    %cst_23 = arith.constant dense<0xFF800000> : vector<1xf32>
    %34 = vector.multi_reduction <maximumf>, %33, %cst_23 [0] : vector<16x1xf32> to vector<1xf32>
    %35 = vector.shape_cast %34 : vector<1xf32> to vector<1x1xf32>
    %36 = vector.broadcast %35 : vector<1x1xf32> to vector<16x32xf32>
    %37 = arith.subf %31, %36 : vector<16x32xf32>
    %38 = math.exp %37 : vector<16x32xf32>
    %c0_24 = arith.constant 0 : index
    %c0_25 = arith.constant 0 : index
    %39 = vector.load %arg10[%c0_24, %c0_25] : memref<32x256xf32, #tpu.memory_space<vmem>>, vector<32x256xf32>
    %cst_26 = arith.constant dense<0.000000e+00> : vector<16x256xf32>
    %40 = tpu.matmul %38, %39, %cst_26 {dimension_numbers = #tpu.dot_dimension_numbers<[1], [0], [0], [1], [0, 0, 1, 1], [], []>, precision = #tpu.contract_precision<fp32>} : vector<16x32xf32>, vector<32x256xf32>, vector<16x256xf32> -> vector<16x256xf32>
    %41 = arith.mulf %40, %24 : vector<16x256xf32>
    %c0_27 = arith.constant 0 : index
    %c0_28 = arith.constant 0 : index
    %42 = vector.load %arg11[%c0_27, %c0_28] : memref<256x32xf32, #tpu.memory_space<vmem>>, vector<256x32xf32>
    %cst_29 = arith.constant dense<0.000000e+00> : vector<16x32xf32>
    %43 = tpu.matmul %41, %42, %cst_29 {dimension_numbers = #tpu.dot_dimension_numbers<[1], [0], [0], [1], [0, 0, 1, 1], [], []>, precision = #tpu.contract_precision<fp32>} : vector<16x256xf32>, vector<256x32xf32>, vector<16x32xf32> -> vector<16x32xf32>
    %c0_30 = arith.constant 0 : index
    %c0_31 = arith.constant 0 : index
    %44 = vector.load %arg11[%c0_30, %c0_31] : memref<256x32xf32, #tpu.memory_space<vmem>>, vector<256x32xf32>
    %cst_32 = arith.constant dense<0.000000e+00> : vector<16x32xf32>
    %45 = tpu.matmul %40, %44, %cst_32 {dimension_numbers = #tpu.dot_dimension_numbers<[1], [0], [0], [1], [0, 0, 1, 1], [], []>, precision = #tpu.contract_precision<fp32>} : vector<16x256xf32>, vector<256x32xf32>, vector<16x32xf32> -> vector<16x32xf32>
    %46 = tpu.reciprocal %45 {approx = true} : vector<16x32xf32> -> vector<16x32xf32>
    %47 = arith.mulf %43, %46 : vector<16x32xf32>
    %c0_33 = arith.constant 0 : index
    %c0_34 = arith.constant 0 : index
    %48 = vector.load %arg14[%c0_33, %c0_34] : memref<8x64xf32, #tpu.memory_space<vmem>>, vector<8x64xf32>
    %49 = vector.extract_strided_slice %48 {offsets = [0, 0], sizes = [1, 64], strides = [1, 1]} : vector<8x64xf32> to vector<1x64xf32>
    %50 = vector.extract_strided_slice %48 {offsets = [1, 0], sizes = [1, 32], strides = [1, 1]} : vector<8x64xf32> to vector<1x32xf32>
    %51 = vector.extract_strided_slice %48 {offsets = [2, 0], sizes = [1, 32], strides = [1, 1]} : vector<8x64xf32> to vector<1x32xf32>
    %52 = vector.extract_strided_slice %48 {offsets = [3, 0], sizes = [1, 32], strides = [1, 1]} : vector<8x64xf32> to vector<1x32xf32>
    %53 = vector.extract_strided_slice %48 {offsets = [4, 0], sizes = [1, 32], strides = [1, 1]} : vector<8x64xf32> to vector<1x32xf32>
    %54 = vector.extract_strided_slice %48 {offsets = [5, 0], sizes = [1, 32], strides = [1, 1]} : vector<8x64xf32> to vector<1x32xf32>
    %55 = arith.addf %47, %0 : vector<16x32xf32>
    %cst_35 = arith.constant dense<0.000000e+00> : vector<16xf32>
    %56 = vector.multi_reduction <add>, %55, %cst_35 [1] : vector<16x32xf32> to vector<16xf32>
    %57 = vector.shape_cast %56 : vector<16xf32> to vector<16x1xf32>
    %cst_36 = arith.constant 3.200000e+01 : f32
    %58 = vector.broadcast %cst_36 : f32 to vector<16x1xf32>
    %59 = arith.divf %57, %58 : vector<16x1xf32>
    %60 = vector.broadcast %59 : vector<16x1xf32> to vector<16x32xf32>
    %61 = arith.subf %55, %60 : vector<16x32xf32>
    %62 = arith.mulf %61, %61 : vector<16x32xf32>
    %cst_37 = arith.constant dense<0.000000e+00> : vector<16xf32>
    %63 = vector.multi_reduction <add>, %62, %cst_37 [1] : vector<16x32xf32> to vector<16xf32>
    %64 = vector.shape_cast %63 : vector<16xf32> to vector<16x1xf32>
    %cst_38 = arith.constant 3.200000e+01 : f32
    %65 = vector.broadcast %cst_38 : f32 to vector<16x1xf32>
    %66 = arith.divf %64, %65 : vector<16x1xf32>
    %67 = vector.broadcast %59 : vector<16x1xf32> to vector<16x32xf32>
    %68 = arith.subf %55, %67 : vector<16x32xf32>
    %cst_39 = arith.constant 9.99999974E-6 : f32
    %69 = vector.broadcast %cst_39 : f32 to vector<16x1xf32>
    %70 = arith.addf %66, %69 : vector<16x1xf32>
    %71 = math.rsqrt %70 : vector<16x1xf32>
    %72 = vector.broadcast %71 : vector<16x1xf32> to vector<16x32xf32>
    %73 = arith.mulf %68, %72 : vector<16x32xf32>
    %74 = vector.broadcast %51 : vector<1x32xf32> to vector<16x32xf32>
    %75 = arith.mulf %73, %74 : vector<16x32xf32>
    %76 = vector.broadcast %52 : vector<1x32xf32> to vector<16x32xf32>
    %77 = arith.addf %75, %76 : vector<16x32xf32>
    %c0_40 = arith.constant 0 : index
    %c0_41 = arith.constant 0 : index
    %78 = vector.load %arg12[%c0_40, %c0_41] : memref<32x64xf32, #tpu.memory_space<vmem>>, vector<32x64xf32>
    %cst_42 = arith.constant dense<0.000000e+00> : vector<16x64xf32>
    %79 = tpu.matmul %77, %78, %cst_42 {dimension_numbers = #tpu.dot_dimension_numbers<[1], [0], [0], [1], [0, 0, 1, 1], [], []>} : vector<16x32xf32>, vector<32x64xf32>, vector<16x64xf32> -> vector<16x64xf32>
    %80 = vector.broadcast %49 : vector<1x64xf32> to vector<16x64xf32>
    %81 = arith.addf %79, %80 : vector<16x64xf32>
    %cst_43 = arith.constant 0.000000e+00 : f32
    %82 = vector.broadcast %cst_43 : f32 to vector<16x64xf32>
    %83 = arith.maximumf %81, %82 : vector<16x64xf32>
    %c0_44 = arith.constant 0 : index
    %c0_45 = arith.constant 0 : index
    %84 = vector.load %arg13[%c0_44, %c0_45] : memref<64x32xf32, #tpu.memory_space<vmem>>, vector<64x32xf32>
    %cst_46 = arith.constant dense<0.000000e+00> : vector<16x32xf32>
    %85 = tpu.matmul %83, %84, %cst_46 {dimension_numbers = #tpu.dot_dimension_numbers<[1], [0], [0], [1], [0, 0, 1, 1], [], []>} : vector<16x64xf32>, vector<64x32xf32>, vector<16x32xf32> -> vector<16x32xf32>
    %86 = vector.broadcast %50 : vector<1x32xf32> to vector<16x32xf32>
    %87 = arith.addf %85, %86 : vector<16x32xf32>
    %88 = arith.addf %87, %77 : vector<16x32xf32>
    %cst_47 = arith.constant dense<0.000000e+00> : vector<16xf32>
    %89 = vector.multi_reduction <add>, %88, %cst_47 [1] : vector<16x32xf32> to vector<16xf32>
    %90 = vector.shape_cast %89 : vector<16xf32> to vector<16x1xf32>
    %cst_48 = arith.constant 3.200000e+01 : f32
    %91 = vector.broadcast %cst_48 : f32 to vector<16x1xf32>
    %92 = arith.divf %90, %91 : vector<16x1xf32>
    %93 = vector.broadcast %92 : vector<16x1xf32> to vector<16x32xf32>
    %94 = arith.subf %88, %93 : vector<16x32xf32>
    %95 = arith.mulf %94, %94 : vector<16x32xf32>
    %cst_49 = arith.constant dense<0.000000e+00> : vector<16xf32>
    %96 = vector.multi_reduction <add>, %95, %cst_49 [1] : vector<16x32xf32> to vector<16xf32>
    %97 = vector.shape_cast %96 : vector<16xf32> to vector<16x1xf32>
    %cst_50 = arith.constant 3.200000e+01 : f32
    %98 = vector.broadcast %cst_50 : f32 to vector<16x1xf32>
    %99 = arith.divf %97, %98 : vector<16x1xf32>
    %100 = vector.broadcast %92 : vector<16x1xf32> to vector<16x32xf32>
    %101 = arith.subf %88, %100 : vector<16x32xf32>
    %cst_51 = arith.constant 9.99999974E-6 : f32
    %102 = vector.broadcast %cst_51 : f32 to vector<16x1xf32>
    %103 = arith.addf %99, %102 : vector<16x1xf32>
    %104 = math.rsqrt %103 : vector<16x1xf32>
    %105 = vector.broadcast %104 : vector<16x1xf32> to vector<16x32xf32>
    %106 = arith.mulf %101, %105 : vector<16x32xf32>
    %107 = vector.broadcast %53 : vector<1x32xf32> to vector<16x32xf32>
    %108 = arith.mulf %106, %107 : vector<16x32xf32>
    %109 = vector.broadcast %54 : vector<1x32xf32> to vector<16x32xf32>
    %110 = arith.addf %108, %109 : vector<16x32xf32>
    %c0_52 = arith.constant 0 : index
    %c0_53 = arith.constant 0 : index
    %111 = vector.load %arg15[%c0_52, %c0_53] : memref<16x32xf32, #tpu.memory_space<vmem>>, vector<16x32xf32>
    tpu.vector_store %arg15[%c0_52, %c0_53], %110 {strides = array<i32>} : memref<16x32xf32, #tpu.memory_space<vmem>>, vector<16x32xf32>,
    return
  }
}

</mosaic_0001>

<bundles_post_ra>
// kernel: tile.24
= control target key start
LH: loop header
LB: loop body
LE: loop exit
PB: predicated region body
PF: predicated region fallthrough
CT: control target
= control target key end

     0   :  { %vm92_vm0 = vcmask 1047556   ;;  %s459_s14 = smov 96   ;;  %s460_s26 = smov 64   ;;  %vm3_vm1 = vcmask 261120   ;;  %vm96_vm2 = vcmask 1048320   ;;  %vm183_vm3 = vcmask 785920   ;;  %s904_s0 = inlined_call_operand.vmem [shape: f32[32,8,32], index: 0, kind: input, shape index: {}]   ;;  %s905_s1 = inlined_call_operand.vmem [shape: f32[32,256], index: 1, kind: output, shape index: {}]  }
   0x1   :  { %v392_v0 = vld [vmem:[%s904_s0 + $0x7] ss:$8 sm:$0xf]   ;;  %v387_v3 = vld [vmem:[%s904_s0 + $0x3] ss:$8 sm:$0xf]  }
   0x2   :  { %v393_v1 = vld [vmem:[%s904_s0 + $0x7] ss:$8 sm:$0xf0]   ;;  %v388_v4 = vld [vmem:[%s904_s0 + $0x3] ss:$8 sm:$0xf0]  }
   0x3   :  { %v114_v2 = vsel %vm92_vm0, %v393_v1, %v392_v0  ;;  %v93_v5 = vsel %vm92_vm0, %v388_v4, %v387_v3  ;;  %v395_v6 = vld [vmem:[%s904_s0 + $0x87] ss:$8 sm:$0xf]   ;;  %v389_v9 = vld [vmem:[%s904_s0 + $0x83] ss:$8 sm:$0xf]  }
   0x4   :  { %115 = vrot.lane.b32.xlu1 %v114_v2, %s459_s14  ;;  %v396_v7 = vld [vmem:[%s904_s0 + $0x87] ss:$8 sm:$0xf0]   ;;  %94 = vrot.lane.b32.xlu0 %v93_v5, %s459_s14  ;;  %v390_v10 = vld [vmem:[%s904_s0 + $0x83] ss:$8 sm:$0xf0]  }
   0x5   :  { %v125_v8 = vsel %vm92_vm0, %v396_v7, %v395_v6  ;;  %v103_v11 = vsel %vm92_vm0, %v390_v10, %v389_v9  ;;  %v401_v12 = vld [vmem:[%s904_s0 + $0xc3] ss:$8 sm:$0xf]   ;;  %v407_v18 = vld [vmem:[%s904_s0 + $0xc7] ss:$8 sm:$0xf]  }
   0x6   :  { %v402_v13 = vld [vmem:[%s904_s0 + $0xc3] ss:$8 sm:$0xf0]   ;;  %v408_v19 = vld [vmem:[%s904_s0 + $0xc7] ss:$8 sm:$0xf0]  }
   0x7   :  { %v398_v14 = vld [vmem:[%s904_s0 + $0x43] ss:$8 sm:$0xf]   ;;  %v147_v16 = vsel %vm92_vm0, %v402_v13, %v401_v12  ;;  %v404_v20 = vld [vmem:[%s904_s0 + $0x47] ss:$8 sm:$0xf]   ;;  %v169_v22 = vsel %vm92_vm0, %v408_v19, %v407_v18 }
   0x8   :  { %v399_v15 = vld [vmem:[%s904_s0 + $0x43] ss:$8 sm:$0xf0]   ;;  %126 = vrot.lane.b32.xlu1 %v125_v8, %s459_s14  ;;  %104 = vrot.lane.b32.xlu0 %v103_v11, %s459_s14  ;;  %v405_v21 = vld [vmem:[%s904_s0 + $0x47] ss:$8 sm:$0xf0]  }
   0x9   :  { %v136_v17 = vsel %vm92_vm0, %v399_v15, %v398_v14  ;;  %v158_v23 = vsel %vm92_vm0, %v405_v21, %v404_v20  ;;  %v412_v24 = vld [vmem:[%s904_s0 + $0x82] ss:$8 sm:$0xf]   ;;  %v418_v30 = vld [vmem:[%s904_s0 + $0x86] ss:$8 sm:$0xf]  }
   0xa   :  { %v413_v25 = vld [vmem:[%s904_s0 + $0x82] ss:$8 sm:$0xf0]   ;;  %v419_v31 = vld [vmem:[%s904_s0 + $0x86] ss:$8 sm:$0xf0]  }
   0xb   :  { %v410_v26 = vld [vmem:[%s904_s0 + $0x2] ss:$8 sm:$0xf]   ;;  %v190_v28 = vsel %vm92_vm0, %v413_v25, %v412_v24  ;;  %v415_v32 = vld [vmem:[%s904_s0 + $0x6] ss:$8 sm:$0xf]   ;;  %v212_v34 = vsel %vm92_vm0, %v419_v31, %v418_v30 }
   0xc   :  { %148 = vrot.lane.b32.xlu1 %v147_v16, %s459_s14  ;;  %137 = vrot.lane.b32.xlu0 %v136_v17, %s459_s14  ;;  %v411_v27 = vld [vmem:[%s904_s0 + $0x2] ss:$8 sm:$0xf0]   ;;  %v416_v33 = vld [vmem:[%s904_s0 + $0x6] ss:$8 sm:$0xf0]  }
   0xd   :  { %v180_v29 = vsel %vm92_vm0, %v411_v27, %v410_v26  ;;  %v201_v35 = vsel %vm92_vm0, %v416_v33, %v415_v32  ;;  %v424_v36 = vld [vmem:[%s904_s0 + $0xc2] ss:$8 sm:$0xf]   ;;  %v430_v40 = vld [vmem:[%s904_s0 + $0xc6] ss:$8 sm:$0xf]  }
   0xe   :  { %v425_v37 = vld [vmem:[%s904_s0 + $0xc2] ss:$8 sm:$0xf0]   ;;  %v431_v42 = vld [vmem:[%s904_s0 + $0xc6] ss:$8 sm:$0xf0]  }
   0xf   :  { %v421_v38 = vld [vmem:[%s904_s0 + $0x42] ss:$8 sm:$0xf]   ;;  %v234_v41 = vsel %vm92_vm0, %v425_v37, %v424_v36  ;;  %v427_v43 = vld [vmem:[%s904_s0 + $0x46] ss:$8 sm:$0xf]   ;;  %v256_v53 = vsel %vm92_vm0, %v431_v42, %v430_v40 }
  0x10   :  { %170 = vrot.lane.b32.xlu1 %v169_v22, %s459_s14  ;;  %159 = vrot.lane.b32.xlu0 %v158_v23, %s459_s14  ;;  %v422_v39 = vld [vmem:[%s904_s0 + $0x42] ss:$8 sm:$0xf0]   ;;  %v428_v45 = vld [vmem:[%s904_s0 + $0x46] ss:$8 sm:$0xf0]  }
  0x11   :  { %v223_v44 = vsel %vm92_vm0, %v422_v39, %v421_v38  ;;  %v367_v46 = vld [vmem:[%s904_s0 + $0x80] ss:$4 sm:$0xff]   ;;  %v245_v55 = vsel %vm92_vm0, %v428_v45, %v427_v43  ;;  %v435_v56 = vld [vmem:[%s904_s0 + $0x81] ss:$8 sm:$0xf]   ;;  %s461_s25 = smov 32  }
  0x12   :  { %368 = vst.msk [vmem:[%s905_s1 + $0x20] ss:$8 sm:$0x3] %vm3_vm1, %v367_v46   ;;  %369 = vst.msk [vmem:[%s905_s1 + $0x11] ss:$8 sm:$0xc] %vm3_vm1, %v367_v46  }
  0x13   :  { %370 = vst.msk [vmem:[%s905_s1 + $0x2] ss:$8 sm:$0x30] %vm3_vm1, %v367_v46   ;;  %371 = vst.msk [vmem:[%s905_s1 - $0xd] ss:$8 sm:$0xc0] %vm3_vm1, %v367_v46  }
  0x14   :  { %191 = vrot.lane.b32.xlu1 %v190_v28, %s460_s26  ;;  %181 = vrot.lane.b32.xlu0 %v180_v29, %s460_s26  ;;  %v372_v47 = vld [vmem:[%s904_s0 + $0xa0] ss:$4 sm:$0xff]   ;;  %v436_v57 = vld [vmem:[%s904_s0 + $0x81] ss:$8 sm:$0xf0]   ;;  %vm270_vm4 = vcmask 523520  }
  0x15   :  { %v2_v48 = vld [vmem:[%s904_s0] ss:$4 sm:$0xff]   ;;  %373 = vst.msk [vmem:[%s905_s1 + $0x24] ss:$8 sm:$0x3] %vm3_vm1, %v372_v47   ;;  %v277_v60 = vsel %vm92_vm0, %v436_v57, %v435_v56 }
  0x16   :  { %v352_v49 = vld [vmem:[%s904_s0 + $0x20] ss:$4 sm:$0xff]   ;;  %374 = vst.msk [vmem:[%s905_s1 + $0x15] ss:$8 sm:$0xc] %vm3_vm1, %v372_v47  }
  0x17   :  { %375 = vst.msk [vmem:[%s905_s1 + $0x6] ss:$8 sm:$0x30] %vm3_vm1, %v372_v47   ;;  %376 = vst.msk [vmem:[%s905_s1 - $0x9] ss:$8 sm:$0xc0] %vm3_vm1, %v372_v47  }
  0x18   :  { %213 = vrot.lane.b32.xlu1 %v212_v34, %s460_s26  ;;  %202 = vrot.lane.b32.xlu0 %v201_v35, %s460_s26  ;;  %4 = vst.msk [vmem:[%s905_s1] ss:$8 sm:$0x3] %vm3_vm1, %v2_v48   ;;  %349 = vst.msk [vmem:[%s905_s1 - $0xf] ss:$8 sm:$0xc] %vm3_vm1, %v2_v48  }
  0x19   :  { %350 = vst.msk [vmem:[%s905_s1 - $0x1e] ss:$8 sm:$0x30] %vm3_vm1, %v2_v48   ;;  %351 = vst.msk [vmem:[%s905_s1 - $0x2d] ss:$8 sm:$0xc0] %vm3_vm1, %v2_v48  }
  0x1a   :  { %353 = vst.msk [vmem:[%s905_s1 + $0x4] ss:$8 sm:$0x3] %vm3_vm1, %v352_v49   ;;  %354 = vst.msk [vmem:[%s905_s1 - $0xb] ss:$8 sm:$0xc] %vm3_vm1, %v352_v49  }
  0x1b   :  { %355 = vst.msk [vmem:[%s905_s1 - $0x1a] ss:$8 sm:$0x30] %vm3_vm1, %v352_v49   ;;  %356 = vst.msk [vmem:[%s905_s1 - $0x29] ss:$8 sm:$0xc0] %vm3_vm1, %v352_v49  }
  0x1c   :  { %235 = vrot.lane.b32.xlu1 %v234_v41, %s460_s26  ;;  %v377_v50 = vld [vmem:[%s904_s0 + $0xc0] ss:$4 sm:$0xff]   ;;  %224 = vrot.lane.b32.xlu0 %v223_v44, %s460_s26  ;;  %v433_v58 = vld [vmem:[%s904_s0 + $0x1] ss:$8 sm:$0xf]  }
  0x1d   :  { %v382_v51 = vld [vmem:[%s904_s0 + $0xe0] ss:$4 sm:$0xff]   ;;  %378 = vst.msk [vmem:[%s905_s1 + $0x30] ss:$8 sm:$0x3] %vm3_vm1, %v377_v50  }
  0x1e   :  { %v357_v52 = vld [vmem:[%s904_s0 + $0x40] ss:$4 sm:$0xff]   ;;  %379 = vst.msk [vmem:[%s905_s1 + $0x21] ss:$8 sm:$0xc] %vm3_vm1, %v377_v50  }
  0x1f   :  { %380 = vst.msk [vmem:[%s905_s1 + $0x12] ss:$8 sm:$0x30] %vm3_vm1, %v377_v50   ;;  %381 = vst.msk [vmem:[%s905_s1 + $0x3] ss:$8 sm:$0xc0] %vm3_vm1, %v377_v50  }
  0x20   :  { %383 = vst.msk [vmem:[%s905_s1 + $0x34] ss:$8 sm:$0x3] %vm3_vm1, %v382_v51   ;;  %384 = vst.msk [vmem:[%s905_s1 + $0x25] ss:$8 sm:$0xc] %vm3_vm1, %v382_v51   ;;  %257 = vrot.lane.b32.xlu1 %v256_v53, %s460_s26  ;;  %246 = vrot.lane.b32.xlu0 %v245_v55, %s460_s26 }
  0x21   :  { %385 = vst.msk [vmem:[%s905_s1 + $0x16] ss:$8 sm:$0x30] %vm3_vm1, %v382_v51   ;;  %386 = vst.msk [vmem:[%s905_s1 + $0x7] ss:$8 sm:$0xc0] %vm3_vm1, %v382_v51  }
  0x22   :  { %358 = vst.msk [vmem:[%s905_s1 + $0x10] ss:$8 sm:$0x3] %vm3_vm1, %v357_v52   ;;  %359 = vst.msk [vmem:[%s905_s1 + $0x1] ss:$8 sm:$0xc] %vm3_vm1, %v357_v52  }
  0x23   :  { %360 = vst.msk [vmem:[%s905_s1 - $0xe] ss:$8 sm:$0x30] %vm3_vm1, %v357_v52   ;;  %361 = vst.msk [vmem:[%s905_s1 - $0x1d] ss:$8 sm:$0xc0] %vm3_vm1, %v357_v52  }
  0x24   :  { %v362_v54 = vld [vmem:[%s904_s0 + $0x60] ss:$4 sm:$0xff]   ;;  %v434_v59 = vld [vmem:[%s904_s0 + $0x1] ss:$8 sm:$0xf0]   ;;  %278 = vrot.lane.b32.xlu1 %v277_v60, %s461_s25 }
  0x25   :  { %363 = vst.msk [vmem:[%s905_s1 + $0x14] ss:$8 sm:$0x3] %vm3_vm1, %v362_v54   ;;  %364 = vst.msk [vmem:[%s905_s1 + $0x5] ss:$8 sm:$0xc] %vm3_vm1, %v362_v54   ;;  %v267_v61 = vsel %vm92_vm0, %v434_v59, %v433_v58 }
  0x26   :  { %365 = vst.msk [vmem:[%s905_s1 - $0xa] ss:$8 sm:$0x30] %vm3_vm1, %v362_v54   ;;  %366 = vst.msk [vmem:[%s905_s1 - $0x19] ss:$8 sm:$0xc0] %vm3_vm1, %v362_v54   ;;  %268 = vrot.lane.b32.xlu0 %v267_v61, %s461_s25 }
  0x27   :  { %v441_v62 = vld [vmem:[%s904_s0 + $0x85] ss:$8 sm:$0xf]   ;;  %v447_v4 = vld [vmem:[%s904_s0 + $0xc1] ss:$8 sm:$0xf]  }
  0x28   :  { %v442_v63 = vld [vmem:[%s904_s0 + $0x85] ss:$8 sm:$0xf0]   ;;  %v448_v5 = vld [vmem:[%s904_s0 + $0xc1] ss:$8 sm:$0xf0]  }
  0x29   :  { %v438_v0 = vld [vmem:[%s904_s0 + $0x5] ss:$8 sm:$0xf]   ;;  %v299_v2 = vsel %vm92_vm0, %v442_v63, %v441_v62  ;;  %v444_v6 = vld [vmem:[%s904_s0 + $0x41] ss:$8 sm:$0xf]   ;;  %v321_v8 = vsel %vm92_vm0, %v448_v5, %v447_v4 }
  0x2a   :  { %v439_v1 = vld [vmem:[%s904_s0 + $0x5] ss:$8 sm:$0xf0]   ;;  %v445_v7 = vld [vmem:[%s904_s0 + $0x41] ss:$8 sm:$0xf0]   ;;  %300 = vrot.lane.b32.xlu1 %v299_v2, %s461_s25 }
  0x2b   :  { %v288_v3 = vsel %vm92_vm0, %v439_v1, %v438_v0  ;;  %v310_v9 = vsel %vm92_vm0, %v445_v7, %v444_v6  ;;  %v453_v10 = vld [vmem:[%s904_s0 + $0xc5] ss:$8 sm:$0xf]  }
  0x2c   :  { %289 = vrot.lane.b32.xlu0 %v288_v3, %s461_s25  ;;  %v454_v11 = vld [vmem:[%s904_s0 + $0xc5] ss:$8 sm:$0xf0]  }
  0x2d   :  { %v450_v12 = vld [vmem:[%s904_s0 + $0x45] ss:$8 sm:$0xf]   ;;  %v343_v14 = vsel %vm92_vm0, %v454_v11, %v453_v10 }
  0x2e   :  { %v451_v13 = vld [vmem:[%s904_s0 + $0x45] ss:$8 sm:$0xf0]   ;;  %322 = vrot.lane.b32.xlu1 %v321_v8, %s461_s25 }
  0x2f   :  { %v332_v15 = vsel %vm92_vm0, %v451_v13, %v450_v12 }
  0x30   :  { %311 = vrot.lane.b32.xlu0 %v310_v9, %s461_s25 }
  0x32   :  { %344 = vrot.lane.b32.xlu1 %v343_v14, %s461_s25 }
  0x34   :  { %333 = vrot.lane.b32.xlu0 %v332_v15, %s461_s25 }
  0x76   :  { %v116_v16 = vpop.permute.xlu1 %115   ;;  %v95_v17 = vpop.permute.xlu0 %94  }
  0x77   :  { %394 = vst.msk [vmem:[%s905_s1 + $0x8] sm:$0xff] %vm96_vm2, %v116_v16   ;;  %97 = vst.msk [vmem:[%s905_s1] sm:$0xff] %vm96_vm2, %v95_v17  }
  0x7a   :  { %v127_v18 = vpop.permute.xlu1 %126   ;;  %v105_v19 = vpop.permute.xlu0 %104  }
  0x7b   :  { %397 = vst.msk [vmem:[%s905_s1 + $0x28] sm:$0xff] %vm96_vm2, %v127_v18   ;;  %391 = vst.msk [vmem:[%s905_s1 + $0x20] sm:$0xff] %vm96_vm2, %v105_v19  }
  0x7e   :  { %v149_v20 = vpop.permute.xlu1 %148   ;;  %v138_v21 = vpop.permute.xlu0 %137  }
  0x7f   :  { %403 = vst.msk [vmem:[%s905_s1 + $0x30] sm:$0xff] %vm96_vm2, %v149_v20   ;;  %400 = vst.msk [vmem:[%s905_s1 + $0x10] sm:$0xff] %vm96_vm2, %v138_v21  }
  0x82   :  { %v171_v22 = vpop.permute.xlu1 %170   ;;  %v160_v23 = vpop.permute.xlu0 %159  }
  0x83   :  { %409 = vst.msk [vmem:[%s905_s1 + $0x38] sm:$0xff] %vm96_vm2, %v171_v22   ;;  %406 = vst.msk [vmem:[%s905_s1 + $0x18] sm:$0xff] %vm96_vm2, %v160_v23  }
  0x86   :  { %v192_v24 = vpop.permute.xlu1 %191   ;;  %v182_v25 = vpop.permute.xlu0 %181  }
  0x87   :  { %414 = vst.msk [vmem:[%s905_s1 + $0x20] sm:$0xff] %vm183_vm3, %v192_v24   ;;  %184 = vst.msk [vmem:[%s905_s1] sm:$0xff] %vm183_vm3, %v182_v25  }
  0x8a   :  { %v214_v26 = vpop.permute.xlu1 %213   ;;  %v203_v27 = vpop.permute.xlu0 %202  }
  0x8b   :  { %420 = vst.msk [vmem:[%s905_s1 + $0x28] sm:$0xff] %vm183_vm3, %v214_v26   ;;  %417 = vst.msk [vmem:[%s905_s1 + $0x8] sm:$0xff] %vm183_vm3, %v203_v27  }
  0x8e   :  { %v236_v28 = vpop.permute.xlu1 %235   ;;  %v225_v29 = vpop.permute.xlu0 %224  }
  0x8f   :  { %426 = vst.msk [vmem:[%s905_s1 + $0x30] sm:$0xff] %vm183_vm3, %v236_v28   ;;  %423 = vst.msk [vmem:[%s905_s1 + $0x10] sm:$0xff] %vm183_vm3, %v225_v29  }
  0x92   :  { %v258_v30 = vpop.permute.xlu1 %257   ;;  %v247_v31 = vpop.permute.xlu0 %246  }
  0x93   :  { %432 = vst.msk [vmem:[%s905_s1 + $0x38] sm:$0xff] %vm183_vm3, %v258_v30   ;;  %429 = vst.msk [vmem:[%s905_s1 + $0x18] sm:$0xff] %vm183_vm3, %v247_v31  }
  0x96   :  { %v279_v32 = vpop.permute.xlu1 %278  }
  0x97   :  { %437 = vst.msk [vmem:[%s905_s1 + $0x20] sm:$0xff] %vm270_vm4, %v279_v32  }
  0x98   :  { %v269_v33 = vpop.permute.xlu0 %268  }
  0x99   :  { %271 = vst.msk [vmem:[%s905_s1] sm:$0xff] %vm270_vm4, %v269_v33  }
  0x9c   :  { %v301_v34 = vpop.permute.xlu1 %300  }
  0x9d   :  { %443 = vst.msk [vmem:[%s905_s1 + $0x28] sm:$0xff] %vm270_vm4, %v301_v34  }
  0x9e   :  { %v290_v35 = vpop.permute.xlu0 %289  }
  0x9f   :  { %440 = vst.msk [vmem:[%s905_s1 + $0x8] sm:$0xff] %vm270_vm4, %v290_v35  }
  0xa0   :  { %v323_v36 = vpop.permute.xlu1 %322  }
  0xa1   :  { %449 = vst.msk [vmem:[%s905_s1 + $0x30] sm:$0xff] %vm270_vm4, %v323_v36  }
  0xa2   :  { %v312_v37 = vpop.permute.xlu0 %311  }
  0xa3   :  { %446 = vst.msk [vmem:[%s905_s1 + $0x10] sm:$0xff] %vm270_vm4, %v312_v37  }
  0xa4   :  { %v345_v38 = vpop.permute.xlu1 %344  }
  0xa5   :  { %455 = vst.msk [vmem:[%s905_s1 + $0x38] sm:$0xff] %vm270_vm4, %v345_v38  }
  0xa6   :  { %v334_v39 = vpop.permute.xlu0 %333  }
  0xa7   :  { %452 = vst.msk [vmem:[%s905_s1 + $0x18] sm:$0xff] %vm270_vm4, %v334_v39  }

// kernel: time_interval_transformer_layer.1
= control target key start
LH: loop header
LB: loop body
LE: loop exit
PB: predicated region body
PF: predicated region fallthrough
CT: control target
= control target key end

     0   :  { %v7826_v4 = vmov 0.0   ;;  %vm73_vm0 = vcmask 261120   ;;  %v63_v17 = vlaneseq  ;;  %v5469_v18 = vmov 1966171168   ;;  %s7810_s0 = inlined_call_operand.vmem [shape: f32[16,32], index: 0, kind: input, shape index: {}]   ;;  %s7811_s1 = inlined_call_operand.vmem [shape: bf16[2,256], index: 1, kind: input, shape index: {}]   ;;  %s7812_s2 = inlined_call_operand.vmem [shape: f32[1,256], index: 2, kind: input, shape index: {}]   ;;  %s7813_s3 = inlined_call_operand.vmem [shape: f32[2,512], index: 3, kind: input, shape index: {}]   ;;  %s7814_s4 = inlined_call_operand.vmem [shape: f32[16,256], index: 4, kind: input, shape index: {}]   ;;  %s7815_s5 = inlined_call_operand.vmem [shape: f32[16,256], index: 5, kind: input, shape index: {}]   ;;  %s7816_s6 = inlined_call_operand.vmem [shape: f32[16,32], index: 6, kind: input, shape index: {}]   ;;  %s7817_s7 = inlined_call_operand.vmem [shape: f32[32,256], index: 7, kind: input, shape index: {}]   ;;  %s7818_s8 = inlined_call_operand.vmem [shape: bf16[256,512], index: 8, kind: input, shape index: {}]   ;;  %s7819_s9 = inlined_call_operand.vmem [shape: f32[256,32], index: 9, kind: input, shape index: {}]   ;;  %s7820_s10 = inlined_call_operand.vmem [shape: f32[32,256], index: 10, kind: input, shape index: {}]   ;;  %s7821_s11 = inlined_call_operand.vmem [shape: f32[256,32], index: 11, kind: input, shape index: {}]   ;;  %s7822_s12 = inlined_call_operand.vmem [shape: f32[32,64], index: 12, kind: input, shape index: {}]   ;;  %s7823_s13 = inlined_call_operand.vmem [shape: f32[64,32], index: 13, kind: input, shape index: {}]   ;;  %s7824_s14 = inlined_call_operand.vmem [shape: f32[8,64], index: 14, kind: input, shape index: {}]   ;;  %s7825_s15 = inlined_call_operand.hbm [shape: f32[16,32], index: 15, kind: output, shape index: {}]  }
   0x1   :  { %v60_v0 = vld [vmem:[%s7817_s7 + $0x38] sm:$0xff]  ;;  %v59_v1 = vld [vmem:[%s7817_s7 + $0x30] sm:$0xff]  ;;  %v58_v2 = vld [vmem:[%s7817_s7 + $0x28] sm:$0xff]  ;;  %144 = vmatprep.mubr.f32.mxu1 %v7826_v4  ;;  %v233_v19 = vunpack.c.l.s4 %v5469_v18 }
   0x2   :  { %104 = vmatprep.subr.mxu1 %v60_v0  ;;  %v57_v3 = vld [vmem:[%s7817_s7 + $0x20] sm:$0xff]  ;;  %v56_v5 = vld [vmem:[%s7817_s7 + $0x18] sm:$0xff]  ;;  %v55_v6 = vld [vmem:[%s7817_s7 + $0x10] sm:$0xff]  ;;  %v5611_v22 = vshrl.u32 %v63_v17, 7 }
   0x3   :  { %105 = vmatpush1.msra.mxu1 %v59_v1  ;;  %v54_v7 = vld [vmem:[%s7817_s7 + $0x8] sm:$0xff]  ;;  %v53_v8 = vld [vmem:[%s7817_s7] sm:$0xff]  ;;  %v234_v23 = vunpack.c.0.s8 %v233_v19 }
   0x4   :  { %106 = vmatprep.subr.mxu1 %v58_v2  ;;  %v5333_v9 = vld [vmem:[%s7818_s8 + $0xe4] ss:$16 sps:$4 sm:$0xff]   ;;  %v5331_v11 = vld [vmem:[%s7818_s8 + $0xe0] ss:$16 sps:$4 sm:$0xff]   ;;  %8100 = vst [vmem:[#allocation5_spill] sm:$0xff] %v5611_v22  ;;  %v52_v26 = vld [vmem:[%s7810_s0 + $0x8] sm:$0xff] }
   0x5   :  { %107 = vmatpush1.msra.mxu1 %v57_v3  ;;  %v51_v10 = vld [vmem:[%s7810_s0] sm:$0xff]  ;;  %v5627_v28 = vsub.s32 %v234_v23, %v5611_v22  ;;  %v5379_v31 = vld [vmem:[%s7818_s8 + $0xec] ss:$16 sps:$4 sm:$0xff]   ;;  %v5381_v32 = vld [vmem:[%s7818_s8 + $0xe8] ss:$16 sps:$4 sm:$0xff]  }
   0x6   :  { %108 = vmatprep.subr.mxu1 %v56_v5  ;;  %v5336_v12 = vld [vmem:[%s7818_s8 + $0xc4] ss:$16 sps:$4 sm:$0xff]   ;;  %v5334_v13 = vld [vmem:[%s7818_s8 + $0xc0] ss:$16 sps:$4 sm:$0xff]   ;;  %v5382_v34 = vld [vmem:[%s7818_s8 + $0xcc] ss:$16 sps:$4 sm:$0xff]   ;;  %631 = vmatprep.subr.bf16.mxu0 %v5379_v31 }
   0x7   :  { %109 = vmatpush1.msra.mxu1 %v55_v6  ;;  %v5339_v14 = vld [vmem:[%s7818_s8 + $0xa4] ss:$16 sps:$4 sm:$0xff]   ;;  %v5337_v15 = vld [vmem:[%s7818_s8 + $0xa0] ss:$16 sps:$4 sm:$0xff]   ;;  %8101 = vst [vmem:[#allocation6_spill] sm:$0xff] %v5627_v28  ;;  %632 = vmatpush1.bf16.msra.mxu0 %v5381_v32 }
   0x8   :  { %110 = vmatprep.subr.mxu1 %v54_v7  ;;  %v5342_v16 = vld [vmem:[%s7818_s8 + $0x84] ss:$16 sps:$4 sm:$0xff]   ;;  %v5340_v20 = vld [vmem:[%s7818_s8 + $0x80] ss:$16 sps:$4 sm:$0xff]   ;;  %v5384_v38 = vld [vmem:[%s7818_s8 + $0xc8] ss:$16 sps:$4 sm:$0xff]   ;;  %633 = vmatprep.subr.bf16.mxu0 %v5382_v34 }
   0x9   :  { %111 = vmatpush1.msra.mxu1 %v53_v8  ;;  %v5345_v21 = vld [vmem:[%s7818_s8 + $0x64] ss:$16 sps:$4 sm:$0xff]   ;;  %v5343_v24 = vld [vmem:[%s7818_s8 + $0x60] ss:$16 sps:$4 sm:$0xff]   ;;  %v5385_v39 = vld [vmem:[%s7818_s8 + $0xac] ss:$16 sps:$4 sm:$0xff]  }
   0xa   :  { %4524 = vmatmul.mubr.msk.f32.vlgmr.msra.gmra.mxu1 %vm73_vm0, %v51_v10  ;;  %590 = vmatprep.subr.bf16.mxu1 %v5333_v9  ;;  %v5348_v25 = vld [vmem:[%s7818_s8 + $0x44] ss:$16 sps:$4 sm:$0xff]   ;;  %v5346_v27 = vld [vmem:[%s7818_s8 + $0x40] ss:$16 sps:$4 sm:$0xff]   ;;  %v5387_v40 = vld [vmem:[%s7818_s8 + $0xa8] ss:$16 sps:$4 sm:$0xff]  }
   0xb   :  { %591 = vmatpush1.bf16.msra.mxu1 %v5331_v11  ;;  %150 = vmatprep.mubr.f32.mxu1 %v7826_v4  ;;  %v4526_v29 = vld.sshfl [vmem:[%s7811_s1] sm:$0x11 pattern:$0x75316420]  ;;  %v5351_v33 = vld [vmem:[%s7818_s8 + $0x24] ss:$16 sps:$4 sm:$0xff]  }
   0xc   :  { %592 = vmatprep.subr.bf16.mxu1 %v5336_v12  ;;  %v231_v30 = vcombine.high %v4526_v29, %v4526_v29  ;;  %v5349_v35 = vld [vmem:[%s7818_s8 + $0x20] ss:$16 sps:$4 sm:$0xff]   ;;  %v5354_v37 = vld [vmem:[%s7818_s8 + $0x4] ss:$16 sps:$4 sm:$0xff]   ;;  %v5388_v42 = vld [vmem:[%s7818_s8 + $0x8c] ss:$16 sps:$4 sm:$0xff]   ;;  %634 = vmatpush1.bf16.msra.mxu0 %v5384_v38 }
   0xd   :  { %v5352_v41 = vld [vmem:[%s7818_s8] ss:$16 sps:$4 sm:$0xff]   ;;  %v5357_v43 = vld [vmem:[%s7818_s8 + $0x1e4] ss:$16 sps:$4 sm:$0xff]   ;;  %635 = vmatprep.subr.bf16.mxu0 %v5385_v39 }
   0xe   :  { %4525 = vmatmul.mubr.msk.f32.gmra.mxu1 %vm73_vm0, %v52_v26  ;;  %v245_v36 = vrot.slane %v231_v30, %v5627_v28  ;;  %v5355_v44 = vld [vmem:[%s7818_s8 + $0x1e0] ss:$16 sps:$4 sm:$0xff]  }
   0xf   :  { %593 = vmatpush1.bf16.msra.mxu1 %v5334_v13 }
  0x10   :  { %594 = vmatprep.subr.bf16.mxu1 %v5339_v14  ;;  %622 = vmatprep.mubr.bf16.mxu1 %v245_v36 }
  0x11   :  { %663 = vmatprep.mubr.bf16.mxu0 %v245_v36  ;;  %636 = vmatpush1.bf16.msra.mxu0 %v5387_v40 }
  0x12   :  { %637 = vmatprep.subr.bf16.mxu0 %v5388_v42 }
  0x13   :  { %595 = vmatpush1.bf16.msra.mxu1 %v5337_v15 }
  0x14   :  { %596 = vmatprep.subr.bf16.mxu1 %v5342_v16 }
  0x17   :  { %597 = vmatpush1.bf16.msra.mxu1 %v5340_v20 }
  0x18   :  { %598 = vmatprep.subr.bf16.mxu1 %v5345_v21 }
  0x1b   :  { %599 = vmatpush1.bf16.msra.mxu1 %v5343_v24 }
  0x1c   :  { %600 = vmatprep.subr.bf16.mxu1 %v5348_v25 }
  0x1f   :  { %601 = vmatpush1.bf16.msra.mxu1 %v5346_v27 }
  0x20   :  { %602 = vmatprep.subr.bf16.mxu1 %v5351_v33 }
  0x23   :  { %603 = vmatpush1.bf16.msra.mxu1 %v5349_v35 }
  0x24   :  { %604 = vmatprep.subr.bf16.mxu1 %v5354_v37 }
  0x27   :  { %605 = vmatpush1.bf16.msra.mxu1 %v5352_v41 }
  0x28   :  { %20 = vsyncpa [#allocation3], 0  ;;  %606 = vmatprep.subr.bf16.mxu1 %v5357_v43  ;;  %v5360_v45 = vld [vmem:[%s7818_s8 + $0x1c4] ss:$16 sps:$4 sm:$0xff]   ;;  %v5358_v46 = vld [vmem:[%s7818_s8 + $0x1c0] ss:$16 sps:$4 sm:$0xff]   ;;  %v5715_v59 = vrot.slane %v4526_v29, %v5627_v28 }
  0x29   :  { %v5363_v47 = vld [vmem:[%s7818_s8 + $0x1a4] ss:$16 sps:$4 sm:$0xff]   ;;  %v5361_v48 = vld [vmem:[%s7818_s8 + $0x1a0] ss:$16 sps:$4 sm:$0xff]   ;;  %v5390_v60 = vld [vmem:[%s7818_s8 + $0x88] ss:$16 sps:$4 sm:$0xff]  }
  0x2a   :  { %v5366_v49 = vld [vmem:[%s7818_s8 + $0x184] ss:$16 sps:$4 sm:$0xff]   ;;  %v5364_v50 = vld [vmem:[%s7818_s8 + $0x180] ss:$16 sps:$4 sm:$0xff]   ;;  %638 = vmatpush1.bf16.msra.mxu0 %v5390_v60  ;;  %v5391_v61 = vld [vmem:[%s7818_s8 + $0x6c] ss:$16 sps:$4 sm:$0xff]  }
  0x2b   :  { %607 = vmatpush2.bf16.msra.mxu1 %v5355_v44  ;;  %v5369_v51 = vld [vmem:[%s7818_s8 + $0x164] ss:$16 sps:$4 sm:$0xff]   ;;  %v5367_v52 = vld [vmem:[%s7818_s8 + $0x160] ss:$16 sps:$4 sm:$0xff]   ;;  %v5393_v62 = vld [vmem:[%s7818_s8 + $0x68] ss:$16 sps:$4 sm:$0xff]   ;;  %639 = vmatprep.subr.bf16.mxu0 %v5391_v61 }
  0x2c   :  { %608 = vmatprep.subr.bf16.mxu1 %v5360_v45  ;;  %v5372_v53 = vld [vmem:[%s7818_s8 + $0x144] ss:$16 sps:$4 sm:$0xff]   ;;  %v5370_v54 = vld [vmem:[%s7818_s8 + $0x140] ss:$16 sps:$4 sm:$0xff]   ;;  %v5394_v63 = vld [vmem:[%s7818_s8 + $0x4c] ss:$16 sps:$4 sm:$0xff]  }
  0x2d   :  { %v5375_v55 = vld [vmem:[%s7818_s8 + $0x124] ss:$16 sps:$4 sm:$0xff]   ;;  %v5373_v56 = vld [vmem:[%s7818_s8 + $0x120] ss:$16 sps:$4 sm:$0xff]   ;;  %v5396_v0 = vld [vmem:[%s7818_s8 + $0x48] ss:$16 sps:$4 sm:$0xff]  }
  0x2e   :  { %v5378_v57 = vld [vmem:[%s7818_s8 + $0x104] ss:$16 sps:$4 sm:$0xff]   ;;  %v5376_v58 = vld [vmem:[%s7818_s8 + $0x100] ss:$16 sps:$4 sm:$0xff]   ;;  %640 = vmatpush1.bf16.msra.mxu0 %v5393_v62  ;;  %v5397_v1 = vld [vmem:[%s7818_s8 + $0x2c] ss:$16 sps:$4 sm:$0xff]  }
  0x2f   :  { %609 = vmatpush2.bf16.msra.mxu1 %v5358_v46  ;;  %641 = vmatprep.subr.bf16.mxu0 %v5394_v63  ;;  %v5399_v2 = vld [vmem:[%s7818_s8 + $0x28] ss:$16 sps:$4 sm:$0xff]   ;;  %v5400_v3 = vld [vmem:[%s7818_s8 + $0xc] ss:$16 sps:$4 sm:$0xff]   ;;  %v5758_v8 = vld [vmem:[%s7819_s9 + $0xf0] sm:$0xff]  ;;  %vm4384_vm1 = vcmask 523264  }
  0x30   :  { %610 = vmatprep.subr.bf16.mxu1 %v5363_v47  ;;  %v5745_v5 = vld [vmem:[%s7819_s9 + $0xf8] sm:$0xff]  ;;  %v5763_v9 = vld [vmem:[%s7819_s9 + $0x70] sm:$0xff]  ;;  %v5774_v12 = vld [vmem:[%s7819_s9 + $0xe8] sm:$0xff]  ;;  %v5780_v14 = vand.u32 4294901760, %v5758_v8 }
  0x31   :  { %v5750_v6 = vld [vmem:[%s7819_s9 + $0x78] sm:$0xff]  ;;  %v5753_v7 = vand.u32 4294901760, %v5745_v5  ;;  %v5785_v15 = vld [vmem:[%s7819_s9 + $0x68] sm:$0xff]  ;;  %v5789_v16 = vand.u32 4294901760, %v5763_v9  ;;  %v5794_v17 = vld [vmem:[%s7819_s9 + $0xe0] sm:$0xff]  ;;  %v5798_v18 = vand.u32 4294901760, %v5774_v12 }
  0x32   :  { %642 = vmatpush1.bf16.msra.mxu0 %v5396_v0  ;;  %v5402_v10 = vld [vmem:[%s7818_s8 + $0x8] ss:$16 sps:$4 sm:$0xff]   ;;  %v5769_v11 = vand.u32 4294901760, %v5750_v6  ;;  %v5403_v13 = vld [vmem:[%s7818_s8 + $0x1ec] ss:$16 sps:$4 sm:$0xff]   ;;  %v5805_v20 = vand.u32 4294901760, %v5785_v15 }
  0x33   :  { %611 = vmatpush2.bf16.msra.mxu1 %v5361_v48  ;;  %643 = vmatprep.subr.bf16.mxu0 %v5397_v1  ;;  %8102 = vst [vmem:[#allocation7_spill] sm:$0xff] %v5753_v7  ;;  %v5405_v19 = vld [vmem:[%s7818_s8 + $0x1e8] ss:$16 sps:$4 sm:$0xff]   ;;  %v794_v21 = vld [vmem:[%s7819_s9 + $0x60] sm:$0xff]  ;;  %v5406_v23 = vld [vmem:[%s7818_s8 + $0x1cc] ss:$16 sps:$4 sm:$0xff]   ;;  %v5879_v45 = vsub.f32 %v5745_v5, %v5753_v7 }
  0x34   :  { %612 = vmatprep.subr.bf16.mxu1 %v5366_v49  ;;  %v5815_v24 = vand.u32 4294901760, %v5794_v17  ;;  %v5818_v25 = vand.u32 4294901760, %v794_v21  ;;  %v809_v26 = vld [vmem:[%s7819_s9 + $0xd8] sm:$0xff]  ;;  %v808_v32 = vld [vmem:[%s7819_s9 + $0xd0] sm:$0xff]  ;;  %v807_v35 = vld [vmem:[%s7819_s9 + $0xc8] sm:$0xff]  ;;  %v5886_v47 = vsub.f32 %v5750_v6, %v5769_v11 }
  0x35   :  { %v5408_v27 = vld [vmem:[%s7818_s8 + $0x1c8] ss:$16 sps:$4 sm:$0xff]   ;;  %v5409_v30 = vld [vmem:[%s7818_s8 + $0x1ac] ss:$16 sps:$4 sm:$0xff]   ;;  %v5835_v31 = vand.u32 4294901760, %v809_v26  ;;  %v792_v33 = vld [vmem:[%s7819_s9 + $0x50] sm:$0xff] }
  0x36   :  { %644 = vmatpush1.bf16.msra.mxu0 %v5399_v2  ;;  %v793_v29 = vld [vmem:[%s7819_s9 + $0x58] sm:$0xff]  ;;  %v5852_v37 = vand.u32 4294901760, %v808_v32  ;;  %v5857_v39 = vand.u32 4294901760, %v792_v33  ;;  %v5860_v40 = vand.u32 4294901760, %v807_v35  ;;  %8103 = vst [vmem:[#allocation8_spill] sm:$0xff] %v5879_v45  ;;  %v7847_v49 = vand.u32 4294901760, %v5879_v45 }
  0x37   :  { %613 = vmatpush2.bf16.msra.mxu1 %v5364_v50  ;;  %645 = vmatprep.subr.bf16.mxu0 %v5400_v3  ;;  %v5843_v34 = vand.u32 4294901760, %v793_v29  ;;  %v5411_v36 = vld [vmem:[%s7818_s8 + $0x1a8] ss:$16 sps:$4 sm:$0xff]   ;;  %v5412_v38 = vld [vmem:[%s7818_s8 + $0x18c] ss:$16 sps:$4 sm:$0xff]   ;;  %v5894_v50 = vsub.f32 %v5758_v8, %v5780_v14  ;;  %v5921_v60 = vsub.f32 %v5794_v17, %v5815_v24  ;;  %v5925_v62 = vsub.f32 %v794_v21, %v5818_v25 }
  0x38   :  { %614 = vmatprep.subr.bf16.mxu1 %v5369_v51  ;;  %v5414_v41 = vld [vmem:[%s7818_s8 + $0x188] ss:$16 sps:$4 sm:$0xff]   ;;  %v5415_v42 = vld [vmem:[%s7818_s8 + $0x16c] ss:$16 sps:$4 sm:$0xff]   ;;  %v5898_v51 = vsub.f32 %v5763_v9, %v5789_v16  ;;  %v5929_v0 = vsub.f32 %v809_v26, %v5835_v31  ;;  %v5960_v21 = vsub.f32 %v807_v35, %v5860_v40 }
  0x39   :  { %v5417_v43 = vld [vmem:[%s7818_s8 + $0x168] ss:$16 sps:$4 sm:$0xff]   ;;  %v5418_v44 = vld [vmem:[%s7818_s8 + $0x14c] ss:$16 sps:$4 sm:$0xff]   ;;  %v5939_v5 = vsub.f32 %v793_v29, %v5843_v34  ;;  %v7838_v9 = vand.u32 4294901760, %v5921_v60 }
  0x3a   :  { %646 = vmatpush1.bf16.msra.mxu0 %v5402_v10  ;;  %v5420_v46 = vld [vmem:[%s7818_s8 + $0x148] ss:$16 sps:$4 sm:$0xff]   ;;  %v5421_v48 = vld [vmem:[%s7818_s8 + $0x12c] ss:$16 sps:$4 sm:$0xff]   ;;  %v7842_v61 = vand.u32 4294901760, %v5898_v51  ;;  %v5946_v10 = vsub.f32 %v808_v32, %v5852_v37 }
  0x3b   :  { %615 = vmatpush2.bf16.msra.mxu1 %v5367_v52  ;;  %647 = vmatprep.subr.bf16.mxu0 %v5403_v13  ;;  %v5902_v52 = vsub.f32 %v5774_v12, %v5798_v18  ;;  %v5426_v1 = vld [vmem:[%s7818_s8 + $0x108] ss:$16 sps:$4 sm:$0xff]   ;;  %v7835_v13 = vand.u32 4294901760, %v5925_v62 }
  0x3c   :  { %616 = vmatprep.subr.bf16.mxu1 %v5372_v53  ;;  %v5423_v53 = vld [vmem:[%s7818_s8 + $0x128] ss:$16 sps:$4 sm:$0xff]   ;;  %v952_v12 = vsub.f32 %v5898_v51, %v7842_v61  ;;  %v7831_v32 = vand.u32 4294901760, %v5946_v10 }
  0x3d   :  { %v7841_v63 = vand.u32 4294901760, %v5902_v52  ;;  %v966_v35 = vsub.f32 %v5925_v62, %v7835_v13 }
  0x3e   :  { %648 = vmatpush2.bf16.msra.mxu0 %v5405_v19  ;;  %v7834_v19 = vand.u32 4294901760, %v5929_v0 }
  0x3f   :  { %617 = vmatpush2.bf16.msra.mxu1 %v5370_v54  ;;  %649 = vmatprep.subr.bf16.mxu0 %v5406_v23  ;;  %v7846_v54 = vand.u32 4294901760, %v5886_v47  ;;  %v1071_v17 = vsub.f32 %v5902_v52, %v7841_v63 }
  0x40   :  { %618 = vmatprep.subr.bf16.mxu1 %v5375_v55  ;;  %v5910_v55 = vsub.f32 %v5785_v15, %v5805_v20  ;;  %v5953_v15 = vsub.f32 %v792_v33, %v5857_v39  ;;  %v953_v33 = vand.u32 4294901760, %v952_v12  ;;  %v790_v12 = vld [vmem:[%s7819_s9 + $0x40] sm:$0xff] }
  0x41   :  { %v945_v2 = vsub.f32 %v5886_v47, %v7846_v54 }
  0x42   :  { %650 = vmatpush2.bf16.msra.mxu0 %v5408_v27  ;;  %v7839_v3 = vand.u32 4294901760, %v5910_v55  ;;  %v7832_v27 = vand.u32 4294901760, %v5939_v5 }
  0x43   :  { %619 = vmatpush2.bf16.msra.mxu1 %v5373_v56  ;;  %651 = vmatprep.subr.bf16.mxu0 %v5409_v30  ;;  %v5424_v56 = vld [vmem:[%s7818_s8 + $0x10c] ss:$16 sps:$4 sm:$0xff]   ;;  %v946_v23 = vand.u32 4294901760, %v945_v2  ;;  %v1078_v30 = vsub.f32 %v5921_v60, %v7838_v9 }
  0x44   :  { %620 = vmatprep.subr.bf16.mxu1 %v5378_v57  ;;  %v1057_v57 = vsub.f32 %v5879_v45, %v7847_v49  ;;  %v959_v26 = vsub.f32 %v5910_v55, %v7839_v3  ;;  %v801_v9 = vld [vmem:[%s7819_s9 + $0x98] sm:$0xff] }
  0x46   :  { %652 = vmatpush2.bf16.msra.mxu0 %v5411_v36  ;;  %v1058_v6 = vand.u32 4294901760, %v1057_v57  ;;  %v7830_v36 = vand.u32 4294901760, %v5953_v15 }
  0x47   :  { %621 = vmatpush2.bf16.msra.mxu1 %v5376_v58  ;;  %653 = vmatprep.subr.bf16.mxu0 %v5412_v38  ;;  %v7843_v58 = vand.u32 4294901760, %v5894_v50  ;;  %v1072_v38 = vand.u32 4294901760, %v1071_v17 }
  0x48   :  { %4595 = vmatprep.subr.mxu1 %v5753_v7 }
  0x49   :  { %v1064_v8 = vsub.f32 %v5894_v50, %v7843_v58 }
  0x4a   :  { %623 = vmatmul.mubr.bf16.vlgmr.msra.gmra.mxu1 %v5715_v59  ;;  %654 = vmatpush2.bf16.msra.mxu0 %v5414_v41  ;;  %v1085_v41 = vsub.f32 %v5929_v0, %v7834_v19 }
  0x4b   :  { %4596 = vmatpush3.msra.mxu1 %v5769_v11  ;;  %655 = vmatprep.subr.bf16.mxu0 %v5415_v42  ;;  %v1065_v29 = vand.u32 4294901760, %v1064_v8  ;;  %v7828_v42 = vand.u32 4294901760, %v5960_v21 }
  0x4c   :  { %4597 = vmatprep.subr.mxu1 %v5780_v14  ;;  %v1086_v2 = vand.u32 4294901760, %v1085_v41 }
  0x4d   :  { %4598 = vmatpush3.msra.mxu1 %v5789_v16 }
  0x4e   :  { %4599 = vmatprep.subr.mxu1 %v5798_v18  ;;  %656 = vmatpush2.bf16.msra.mxu0 %v5417_v43  ;;  %v960_v43 = vand.u32 4294901760, %v959_v26  ;;  %v6007_v26 = vand.u32 4294901760, %v790_v12 }
  0x4f   :  { %4600 = vmatpush3.msra.mxu1 %v5805_v20  ;;  %657 = vmatprep.subr.bf16.mxu0 %v5418_v44  ;;  %v973_v44 = vsub.f32 %v5939_v5, %v7832_v27 }
  0x50   :  { %4601 = vmatprep.subr.mxu1 %v5815_v24 }
  0x51   :  { %4602 = vmatpush3.msra.mxu1 %v5818_v25  ;;  %v974_v17 = vand.u32 4294901760, %v973_v44  ;;  %v6024_v44 = vsub.f32 %v790_v12, %v6007_v26  ;;  %v788_v12 = vld [vmem:[%s7819_s9 + $0x30] sm:$0xff] }
  0x52   :  { %4603 = vmatprep.subr.mxu1 %v5835_v31  ;;  %658 = vmatpush2.bf16.msra.mxu0 %v5420_v46  ;;  %v1079_v46 = vand.u32 4294901760, %v1078_v30 }
  0x53   :  { %4604 = vmatpush3.msra.mxu1 %v5843_v34  ;;  %659 = vmatprep.subr.bf16.mxu0 %v5421_v48  ;;  %v1092_v48 = vsub.f32 %v5946_v10, %v7831_v32  ;;  %8105 = vst [vmem:[#allocation10_spill] sm:$0xff] %v6024_v44  ;;  %v787_v32 = vld [vmem:[%s7819_s9 + $0x28] sm:$0xff] }
  0x54   :  { %4605 = vmatprep.subr.mxu1 %v5852_v37 }
  0x55   :  { %4606 = vmatpush3.msra.mxu1 %v5857_v39  ;;  %v1093_v30 = vand.u32 4294901760, %v1092_v48  ;;  %v804_v48 = vld [vmem:[%s7819_s9 + $0xb0] sm:$0xff] }
  0x56   :  { %4607 = vmatprep.subr.mxu1 %v5860_v40  ;;  %660 = vmatpush2.bf16.msra.mxu0 %v5423_v53  ;;  %v967_v53 = vand.u32 4294901760, %v966_v35 }
  0x57   :  { %661 = vmatprep.subr.bf16.mxu0 %v5424_v56  ;;  %v980_v56 = vsub.f32 %v5953_v15, %v7830_v36 }
  0x59   :  { %v981_v41 = vand.u32 4294901760, %v980_v56  ;;  %v6036_v56 = vand.u32 4294901760, %v804_v48 }
  0x5a   :  { %662 = vmatpush2.bf16.msra.mxu0 %v5426_v1  ;;  %v806_v1 = vld [vmem:[%s7819_s9 + $0xc0] sm:$0xff] }
  0x5b   :  { %4633 = vmatprep.subr.mxu0 %v1058_v6  ;;  %v1099_v6 = vsub.f32 %v5960_v21, %v7828_v42  ;;  %v5999_v8 = vand.u32 4294901760, %v806_v1  ;;  %v803_v42 = vld [vmem:[%s7819_s9 + $0xa8] sm:$0xff]  ;;  %v6060_v36 = vsub.f32 %v804_v48, %v6036_v56 }
  0x5d   :  { %664 = vmatmul.mubr.bf16.vlgmr.msra.gmra.mxu0 %v5715_v59  ;;  %v791_v59 = vld [vmem:[%s7819_s9 + $0x48] sm:$0xff]  ;;  %8108 = vst [vmem:[#allocation13_spill] sm:$0xff] %v6060_v36 }
  0x5e   :  { %4634 = vmatpush3.msra.mxu0 %v946_v23  ;;  %v5991_v57 = vand.u32 4294901760, %v791_v59 }
  0x5f   :  { %4635 = vmatprep.subr.mxu0 %v1065_v29  ;;  %v805_v29 = vld [vmem:[%s7819_s9 + $0xb8] sm:$0xff] }
  0x60   :  { %4636 = vmatpush3.msra.mxu0 %v953_v33  ;;  %v6005_v23 = vsub.f32 %v791_v59, %v5991_v57  ;;  %4608 = vmatpush3.msra.mxu1 %v5991_v57  ;;  %v6014_v33 = vsub.f32 %v806_v1, %v5999_v8  ;;  %v6016_v35 = vand.u32 4294901760, %v805_v29  ;;  %v1100_v59 = vand.u32 4294901760, %v1099_v6 }
  0x61   :  { %4637 = vmatprep.subr.mxu0 %v1072_v38  ;;  %v789_v38 = vld [vmem:[%s7819_s9 + $0x38] sm:$0xff]  ;;  %4609 = vmatprep.subr.mxu1 %v5999_v8 }
  0x62   :  { %4638 = vmatpush3.msra.mxu0 %v960_v43  ;;  %8104 = vst [vmem:[#allocation9_spill] sm:$0xff] %v6014_v33  ;;  %v7829_v43 = vand.u32 4294901760, %v6005_v23  ;;  %4610 = vmatpush3.msra.mxu1 %v6007_v26  ;;  %v7833_v1 = vand.u32 4294901760, %v6014_v33 }
  0x63   :  { %4639 = vmatprep.subr.mxu0 %v1079_v46  ;;  %v6026_v46 = vand.u32 4294901760, %v789_v38  ;;  %4611 = vmatprep.subr.mxu1 %v6016_v35 }
  0x64   :  { %4640 = vmatpush3.msra.mxu0 %v967_v53  ;;  %v6034_v53 = vsub.f32 %v805_v29, %v6016_v35  ;;  %v987_v4 = vsub.f32 %v6005_v23, %v7829_v43  ;;  %v6049_v29 = vand.u32 4294901760, %v788_v12 }
  0x65   :  { %4641 = vmatprep.subr.mxu0 %v1086_v2  ;;  %v7836_v2 = vand.u32 4294901760, %v6024_v44  ;;  %v6047_v6 = vsub.f32 %v789_v38, %v6026_v46  ;;  %4612 = vmatpush3.msra.mxu1 %v6026_v46  ;;  %v6062_v38 = vand.u32 4294901760, %v803_v42 }
  0x66   :  { %8106 = vst [vmem:[#allocation11_spill] sm:$0xff] %v6034_v53  ;;  %4642 = vmatpush3.msra.mxu0 %v974_v17  ;;  %v1106_v17 = vsub.f32 %v6014_v33, %v7833_v1  ;;  %v7837_v43 = vand.u32 4294901760, %v6034_v53  ;;  %4613 = vmatprep.subr.mxu1 %v6036_v56  ;;  %v988_v27 = vand.u32 4294901760, %v987_v4  ;;  %v6073_v19 = vsub.f32 %v788_v12, %v6049_v29 }
  0x67   :  { %8107 = vst [vmem:[#allocation12_spill] sm:$0xff] %v6047_v6  ;;  %4643 = vmatprep.subr.mxu0 %v1093_v30  ;;  %v994_v30 = vsub.f32 %v6024_v44, %v7836_v2  ;;  %v7840_v1 = vand.u32 4294901760, %v6047_v6  ;;  %4614 = vmatpush3.msra.mxu1 %v6049_v29  ;;  %v6081_v4 = vsub.f32 %v803_v42, %v6062_v38  ;;  %v802_v2 = vld [vmem:[%s7819_s9 + $0xa0] sm:$0xff] }
  0x68   :  { %4644 = vmatpush3.msra.mxu0 %v981_v41  ;;  %8109 = vst [vmem:[#allocation14_spill] sm:$0xff] %v6073_v19  ;;  %v1107_v48 = vand.u32 4294901760, %v1106_v17  ;;  %v1113_v13 = vsub.f32 %v6034_v53, %v7837_v43  ;;  %v7844_v41 = vand.u32 4294901760, %v6060_v36  ;;  %4615 = vmatprep.subr.mxu1 %v6062_v38  ;;  %v7845_v17 = vand.u32 4294901760, %v6073_v19  ;;  %v786_v42 = vld [vmem:[%s7819_s9 + $0x20] sm:$0xff] }
  0x69   :  { %4645 = vmatprep.subr.mxu0 %v1100_v59  ;;  %8110 = vst [vmem:[#allocation15_spill] sm:$0xff] %v6081_v4  ;;  %v995_v12 = vand.u32 4294901760, %v994_v30  ;;  %v1001_v59 = vsub.f32 %v6047_v6, %v7840_v1  ;;  %v6091_v43 = vand.u32 4294901760, %v787_v32  ;;  %v7850_v30 = vand.u32 4294901760, %v6081_v4  ;;  %v785_v1 = vld [vmem:[%s7819_s9 + $0x18] sm:$0xff] }
  0x6a   :  { %4646 = vmatpush3.msra.mxu0 %v988_v27  ;;  %v1114_v3 = vand.u32 4294901760, %v1113_v13  ;;  %v1120_v27 = vsub.f32 %v6060_v36, %v7844_v41  ;;  %v1008_v61 = vsub.f32 %v6073_v19, %v7845_v17  ;;  %v6112_v13 = vand.u32 4294901760, %v802_v2 }
  0x6b   :  { %4647 = vmatprep.subr.mxu0 %v1107_v48  ;;  %v1002_v63 = vand.u32 4294901760, %v1001_v59  ;;  %v6110_v58 = vsub.f32 %v787_v32, %v6091_v43  ;;  %v800_v48 = vld [vmem:[%s7819_s9 + $0x90] sm:$0xff]  ;;  %4616 = vmatpush3.msra.mxu1 %v6091_v43  ;;  %v6121_v59 = vand.u32 4294901760, %v786_v42  ;;  %v6123_v17 = vand.u32 4294901760, %v801_v9 }
  0x6c   :  { %4648 = vmatpush3.msra.mxu0 %v995_v12  ;;  %8112 = vst [vmem:[#allocation17_spill] sm:$0xff] %v6112_v13  ;;  %v1121_v41 = vand.u32 4294901760, %v1120_v27  ;;  %v1127_v12 = vsub.f32 %v6081_v4, %v7850_v30  ;;  %v784_v32 = vld [vmem:[%s7819_s9 + $0x10] sm:$0xff]  ;;  %v1009_v54 = vand.u32 4294901760, %v1008_v61  ;;  %v6130_v19 = vsub.f32 %v802_v2, %v6112_v13  ;;  %v799_v27 = vld [vmem:[%s7819_s9 + $0x88] sm:$0xff]  ;;  %4617 = vmatprep.subr.mxu1 %v6112_v13 }
  0x6d   :  { %8111 = vst [vmem:[#allocation16_spill] sm:$0xff] %v6110_v58  ;;  %4649 = vmatprep.subr.mxu0 %v1114_v3  ;;  %8113 = vst [vmem:[#allocation18_spill] sm:$0xff] %v6121_v59  ;;  %v7857_v49 = vand.u32 4294901760, %v6110_v58  ;;  %v6132_v3 = vand.u32 4294901760, %v785_v1  ;;  %v6139_v4 = vsub.f32 %v786_v42, %v6121_v59  ;;  %v6142_v61 = vsub.f32 %v801_v9, %v6123_v17 }
  0x6e   :  { %8114 = vst [vmem:[#allocation19_spill] sm:$0xff] %v6123_v17  ;;  %4650 = vmatpush3.msra.mxu0 %v1002_v63  ;;  %8115 = vst [vmem:[#allocation20_spill] sm:$0xff] %v6130_v19  ;;  %v1128_v30 = vand.u32 4294901760, %v1127_v12  ;;  %v6144_v63 = vand.u32 4294901760, %v800_v48  ;;  %4618 = vmatpush3.msra.mxu1 %v6121_v59  ;;  %v7866_v36 = vand.u32 4294901760, %v6130_v19  ;;  %v6154_v12 = vand.u32 4294901760, %v784_v32 }
  0x6f   :  { %8116 = vst [vmem:[#allocation21_spill] sm:$0xff] %v6132_v3  ;;  %4651 = vmatprep.subr.mxu0 %v1121_v41  ;;  %8117 = vst [vmem:[#allocation22_spill] sm:$0xff] %v6139_v4  ;;  %v1015_v2 = vsub.f32 %v6110_v58, %v7857_v49  ;;  %v6152_v41 = vsub.f32 %v785_v1, %v6132_v3  ;;  %4619 = vmatprep.subr.mxu1 %v6123_v17  ;;  %v6162_v6 = vand.u32 4294901760, %v799_v27  ;;  %v783_v49 = vld [vmem:[%s7819_s9 + $0x8] sm:$0xff] }
  0x70   :  { %8118 = vst [vmem:[#allocation23_spill] sm:$0xff] %v6142_v61  ;;  %8119 = vst [vmem:[#allocation24_spill] sm:$0xff] %v6144_v63  ;;  %4652 = vmatpush3.msra.mxu0 %v1009_v54  ;;  %v6160_v54 = vsub.f32 %v800_v48, %v6144_v63  ;;  %4620 = vmatpush3.msra.mxu1 %v6132_v3  ;;  %v6173_v42 = vsub.f32 %v784_v32, %v6154_v12  ;;  %v8125_v48 = vand.u32 4294901760, %v6139_v4  ;;  %v798_v32 = vld [vmem:[%s7819_s9 + $0x80] sm:$0xff] }
  0x71   :  { %8120 = vst [vmem:[#allocation25_spill] sm:$0xff] %v6152_v41  ;;  %8121 = vst [vmem:[#allocation26_spill] sm:$0xff] %v6154_v12  ;;  %4653 = vmatprep.subr.mxu0 %v1128_v30  ;;  %v1016_v1 = vand.u32 4294901760, %v1015_v2  ;;  %v1134_v30 = vsub.f32 %v6130_v19, %v7866_v36  ;;  %v7873_v9 = vand.u32 4294901760, %v6152_v41  ;;  %4621 = vmatprep.subr.mxu1 %v6144_v63  ;;  %v8126_v17 = vand.u32 4294901760, %v6142_v61 }
  0x72   :  { %8122 = vst [vmem:[#allocation27_spill] sm:$0xff] %v6160_v54  ;;  %8123 = vst [vmem:[#allocation28_spill] sm:$0xff] %v6162_v6  ;;  %v1022_v58 = vsub.f32 %v6139_v4, %v8125_v48  ;;  %v6184_v53 = vsub.f32 %v799_v27, %v6162_v6  ;;  %4622 = vmatpush3.msra.mxu1 %v6154_v12  ;;  %v7880_v4 = vand.u32 4294901760, %v6173_v42  ;;  %v782_v27 = vld [vmem:[%s7819_s9] sm:$0xff]  ;;  %v8129_v19 = vand.u32 4294901760, %v6160_v54 }
  0x73   :  { %8124 = vst [vmem:[#allocation29_spill] sm:$0xff] %v6173_v42  ;;  %v1141_v3 = vsub.f32 %v6142_v61, %v8126_v17  ;;  %4654 = vmatpush3.msra.mxu0 %v1016_v1  ;;  %v1135_v36 = vand.u32 4294901760, %v1134_v30  ;;  %v1029_v48 = vsub.f32 %v6152_v41, %v7873_v9  ;;  %v6194_v17 = vand.u32 4294901760, %v783_v49  ;;  %4623 = vmatprep.subr.mxu1 %v6162_v6 }
  0x74   :  { %8127 = vst [vmem:[#allocation30_spill] sm:$0xff] %v6184_v53  ;;  %v1023_v2 = vand.u32 4294901760, %v1022_v58  ;;  %v1148_v1 = vsub.f32 %v6160_v54, %v8129_v19  ;;  %v7882_v30 = vand.u32 4294901760, %v6184_v53  ;;  %v1036_v41 = vsub.f32 %v6173_v42, %v7880_v4 }
  0x75   :  { %8128 = vst [vmem:[#allocation31_spill] sm:$0xff] %v6194_v17  ;;  %v1142_v61 = vand.u32 4294901760, %v1141_v3  ;;  %4655 = vmatprep.subr.mxu0 %v1135_v36  ;;  %v1030_v9 = vand.u32 4294901760, %v1029_v48  ;;  %v6208_v12 = vsub.f32 %v783_v49, %v6194_v17  ;;  %v6210_v63 = vand.u32 4294901760, %v798_v32  ;;  %4624 = vmatpush3.msra.mxu1 %v6194_v17 }
  0x76   :  { %4656 = vmatpush3.msra.mxu0 %v1023_v2  ;;  %v1149_v58 = vand.u32 4294901760, %v1148_v1  ;;  %v1155_v19 = vsub.f32 %v6184_v53, %v7882_v30  ;;  %v6216_v3 = vand.u32 4294901760, %v782_v27  ;;  %v1037_v36 = vand.u32 4294901760, %v1036_v41 }
  0x77   :  { %8130 = vst [vmem:[#allocation32_spill] sm:$0xff] %v6208_v12  ;;  %8131 = vst [vmem:[#allocation33_spill] sm:$0xff] %v6210_v63  ;;  %4657 = vmatprep.subr.mxu0 %v1142_v61  ;;  %v7881_v48 = vand.u32 4294901760, %v6208_v12  ;;  %v6220_v4 = vsub.f32 %v798_v32, %v6210_v63  ;;  %4625 = vmatprep.subr.mxu1 %v6210_v63 }
  0x78   :  { %8132 = vst [vmem:[#allocation34_spill] sm:$0xff] %v6216_v3  ;;  %4658 = vmatpush3.msra.mxu0 %v1030_v9  ;;  %v1156_v49 = vand.u32 4294901760, %v1155_v19  ;;  %v6224_v2 = vsub.f32 %v782_v27, %v6216_v3  ;;  %4626 = vmatpush3.msra.mxu1 %v6216_v3 }
  0x79   :  { %8133 = vst [vmem:[#allocation35_spill] sm:$0xff] %v6220_v4  ;;  %4659 = vmatprep.subr.mxu0 %v1149_v58  ;;  %v1043_v61 = vsub.f32 %v6208_v12, %v7881_v48  ;;  %v7884_v41 = vand.u32 4294901760, %v6220_v4  ;;  %4671 = vmatprep.subr.mxu1 %v5879_v45  ;;  %v61_v12 = vld [vmem:[%s7812_s2] sm:$0x3] }
  0x7a   :  { %8134 = vst [vmem:[#allocation36_spill] sm:$0xff] %v6224_v2  ;;  %4660 = vmatpush3.msra.mxu0 %v1037_v36  ;;  %v7885_v32 = vand.u32 4294901760, %v6224_v2  ;;  %v5470_v36 = vmov 1983009808  }
  0x7b   :  { %4661 = vmatprep.subr.mxu0 %v1156_v49  ;;  %v1044_v9 = vand.u32 4294901760, %v1043_v61  ;;  %v1162_v27 = vsub.f32 %v6220_v4, %v7884_v41  ;;  %v571_v48 = vunpack.c.l.s4 %v5470_v36  ;;  %v6246_v41 = vld [vmem:[%s7813_s3] sm:$0xff] }
  0x7c   :  { %v1050_v1 = vsub.f32 %v6224_v2, %v7885_v32  ;;  %v6251_v2 = vsub.s32 0, %v5611_v22 }
  0x7d   :  { %4662 = vmatpush3.msra.mxu0 %v1044_v9  ;;  %v1163_v58 = vand.u32 4294901760, %v1162_v27  ;;  %v572_v30 = vunpack.c.0.s8 %v571_v48 }
  0x7e   :  { %v1051_v19 = vand.u32 4294901760, %v1050_v1  ;;  %8136 = vst [vmem:[#allocation38_spill] sm:$0xff] %v6251_v2 }
  0x7f   :  { %4663 = vmatprep.subr.mxu0 %v1163_v58  ;;  %v6241_v61 = vsub.s32 %v572_v30, %v5611_v22  ;;  %v6254_v30 = vsub.s32 1, %v5611_v22 }
  0x80   :  { %4664 = vmatpush3.msra.mxu0 %v1051_v19 }
  0x81   :  { %4709 = vmatprep.subr.mxu0 %v5753_v7  ;;  %8135 = vst [vmem:[#allocation37_spill] sm:$0xff] %v6241_v61  ;;  %v576_v27 = vrot.slane %v6246_v41, %v6241_v61  ;;  %8137 = vst [vmem:[#allocation39_spill] sm:$0xff] %v6254_v30  ;;  %v66_v7 = vrot.slane %v61_v12, %v6251_v2 }
  0x83   :  { %v584_v58 = vcombine.high %v576_v27, %v576_v27 }
  0xca   :  { %v146_v49 = vpop.f32.mrf.mxu1 }
  0xcc   :  { %v148_v45 = vpop.f32.mrf.mxu1 }
  0xce   :  { %v152_v9 = vpop.f32.mrf.mxu1 }
  0xd0   :  { %v154_v1 = vpop.f32.mrf.mxu1 }
 0x10a   :  { %v624_v19 = vpop.f32.mrf.mxu1 }
 0x10b   :  { %v625_v36 = vadd.f32 %v624_v19, %v576_v27  ;;  %v70_v27 = vrot.slane %v61_v12, %v6254_v30  ;;  %v762_v19 = vld [vmem:[%s7814_s4] sm:$0xff]  ;;  %v765_v12 = vld [vmem:[%s7814_s4 + $0x18] sm:$0xff] }
 0x10c   :  { %v626_v32 = vpop.f32.mrf.mxu1 }
 0x10d   :  { %v627_v48 = vadd.f32 %v626_v32, %v584_v58  ;;  %v149_v22 = vadd.f32 %v148_v45, %v70_v27  ;;  %v155_v6 = vadd.f32 %v154_v1, %v70_v27 }
 0x10e   :  { %v628_v4 = vpop.f32.mrf.mxu1 }
 0x10f   :  { %v674_v53 = vcombine.low %v625_v36, %v627_v48  ;;  %v763_v4 = vld [vmem:[%s7814_s4 + $0x8] sm:$0xff]  ;;  %v147_v48 = vadd.f32 %v146_v49, %v66_v7 }
 0x110   :  { %v629_v42 = vpop.f32.mrf.mxu1 }
 0x111   :  { %v681_v54 = vrot.slane %v674_v53, %v5627_v28 }
 0x113   :  { %v682_v32 = vcombine.high %v681_v54, %v681_v54  ;;  %v689_v58 = vrot.slane %v681_v54, %v5627_v28  ;;  %v764_v54 = vld [vmem:[%s7814_s4 + $0x10] sm:$0xff] }
 0x115   :  { %v696_v36 = vrot.slane %v682_v32, %v5627_v28  ;;  %v700_v42 = vrot.slane %v689_v58, %v6251_v2  ;;  %v704_v53 = vrot.slane %v689_v58, %v6254_v30  ;;  %v153_v28 = vadd.f32 %v152_v9, %v66_v7 }
 0x117   :  { %v708_v3 = vrot.slane %v696_v36, %v6251_v2  ;;  %v712_v63 = vrot.slane %v696_v36, %v6254_v30  ;;  %v766_v17 = vadd.f32 %v762_v19, %v700_v42  ;;  %v767_v32 = vadd.f32 %v763_v4, %v704_v53 }
 0x118   :  { %v569_v53 = vcombine.high %v6246_v41, %v6246_v41  ;;  %v8150_v41 = vld [vmem:[#allocation13_spill] sm:$0xff] }
 0x119   :  { %v779_v61 = vmul.f32 %v767_v32, %v149_v22  ;;  %v778_v58 = vmul.f32 %v766_v17, %v147_v48  ;;  %v769_v49 = vadd.f32 %v765_v12, %v712_v63  ;;  %v768_v45 = vadd.f32 %v764_v54, %v708_v3  ;;  %v8141_v48 = vld [vmem:[#allocation9_spill] sm:$0xff]  ;;  %v8143_v54 = vld [vmem:[#allocation10_spill] sm:$0xff] }
 0x11a   :  { %v8142_v12 = vld [vmem:[#allocation17_spill] sm:$0xff]  ;;  %v8144_v32 = vld [vmem:[#allocation18_spill] sm:$0xff] }
 0x11b   :  { %v6280_v59 = vand.u32 4294901760, %v779_v61  ;;  %v6282_v44 = vand.u32 4294901760, %v778_v58  ;;  %v781_v13 = vmul.f32 %v769_v49, %v155_v6  ;;  %v780_v33 = vmul.f32 %v768_v45, %v153_v28  ;;  %v8146_v49 = vld [vmem:[#allocation19_spill] sm:$0xff]  ;;  %v8147_v45 = vld [vmem:[#allocation12_spill] sm:$0xff] }
 0x11d   :  { %8138 = vst [vmem:[#allocation40_spill] sm:$0xff] %v6282_v44  ;;  %1166 = vmatprep.mubr.f32.mxu0 %v6280_v59  ;;  %v6286_v2 = vsub.f32 %v778_v58, %v6282_v44  ;;  %v6288_v36 = vand.u32 4294901760, %v781_v13  ;;  %v6290_v19 = vand.u32 4294901760, %v780_v33  ;;  %v911_v22 = vsub.f32 %v779_v61, %v6280_v59  ;;  %v8145_v58 = vld [vmem:[#allocation11_spill] sm:$0xff] }
 0x11e   :  { %1168 = vmatmul.mubr.f32.vlgmr.msra.gmra.mxu0 %v6282_v44 }
 0x11f   :  { %8139 = vst [vmem:[#allocation41_spill] sm:$0xff] %v6288_v36  ;;  %8140 = vst [vmem:[#allocation42_spill] sm:$0xff] %v6290_v19  ;;  %4710 = vmatpush3.msra.mxu0 %v5769_v11  ;;  %1173 = vmatprep.mubr.f32.mxu0 %v6288_v36  ;;  %v912_v7 = vand.u32 4294901760, %v911_v22  ;;  %v7924_v28 = vand.u32 4294901760, %v6286_v2  ;;  %v6298_v6 = vsub.f32 %v781_v13, %v6288_v36  ;;  %v8162_v36 = vld [vmem:[#allocation23_spill] sm:$0xff] }
 0x120   :  { %v6301_v63 = vsub.f32 %v780_v33, %v6290_v19  ;;  %4711 = vmatprep.subr.mxu0 %v5780_v14 }
 0x121   :  { %4712 = vmatpush3.msra.mxu0 %v5789_v16  ;;  %v913_v17 = vsub.f32 %v911_v22, %v912_v7  ;;  %v919_v3 = vsub.f32 %v6286_v2, %v7924_v28  ;;  %v7923_v61 = vand.u32 4294901760, %v6298_v6  ;;  %v8160_v28 = vld [vmem:[#allocation22_spill] sm:$0xff] }
 0x122   :  { %v7922_v9 = vand.u32 4294901760, %v6301_v63  ;;  %4713 = vmatprep.subr.mxu0 %v5798_v18  ;;  %1175 = vmatmul.mubr.f32.gmra.mxu0 %v6290_v19  ;;  %v8161_v19 = vld [vmem:[#allocation34_spill] sm:$0xff] }
 0x123   :  { %4714 = vmatpush3.msra.mxu0 %v5805_v20  ;;  %1426 = vmatprep.mubr.f32.mxu0 %v912_v7  ;;  %v914_v33 = vand.u32 4294901760, %v913_v17  ;;  %v920_v13 = vand.u32 4294901760, %v919_v3  ;;  %v928_v1 = vsub.f32 %v6298_v6, %v7923_v61  ;;  %v8149_v17 = vld [vmem:[#allocation21_spill] sm:$0xff]  ;;  %v8151_v3 = vld [vmem:[#allocation24_spill] sm:$0xff] }
 0x124   :  { %4715 = vmatprep.subr.mxu0 %v5815_v24  ;;  %v934_v4 = vsub.f32 %v6301_v63, %v7922_v9  ;;  %v8157_v9 = vld [vmem:[#allocation31_spill] sm:$0xff]  ;;  %v8159_v61 = vld [vmem:[#allocation33_spill] sm:$0xff] }
 0x125   :  { %4716 = vmatpush3.msra.mxu0 %v5818_v25  ;;  %915 = vmatprep.mubr.f32.mxu1 %v914_v33  ;;  %v929_v27 = vand.u32 4294901760, %v928_v1  ;;  %v8152_v33 = vld [vmem:[#allocation14_spill] sm:$0xff]  ;;  %v8154_v1 = vld [vmem:[#allocation15_spill] sm:$0xff] }
 0x126   :  { %4717 = vmatprep.subr.mxu0 %v5835_v31  ;;  %921 = vmatmul.mubr.f32.vlgmr.msra.gmra.mxu1 %v920_v13  ;;  %v935_v42 = vand.u32 4294901760, %v934_v4  ;;  %v8153_v13 = vld [vmem:[#allocation26_spill] sm:$0xff]  ;;  %v8156_v4 = vld [vmem:[#allocation16_spill] sm:$0xff] }
 0x127   :  { %4672 = vmatpush3.msra.mxu1 %v5886_v47  ;;  %4718 = vmatpush3.msra.mxu0 %v5843_v34 }
 0x128   :  { %930 = vmatprep.mubr.f32.mxu1 %v929_v27  ;;  %4673 = vmatprep.subr.mxu1 %v5894_v50  ;;  %v8155_v27 = vld [vmem:[#allocation28_spill] sm:$0xff] }
 0x129   :  { %4719 = vmatprep.subr.mxu0 %v5852_v37  ;;  %4674 = vmatpush3.msra.mxu1 %v5898_v51 }
 0x12a   :  { %4720 = vmatpush3.msra.mxu0 %v5857_v39  ;;  %4675 = vmatprep.subr.mxu1 %v5902_v52 }
 0x12b   :  { %4721 = vmatprep.subr.mxu0 %v5860_v40  ;;  %936 = vmatmul.mubr.f32.gmra.mxu1 %v935_v42 }
 0x12c   :  { %4676 = vmatpush3.msra.mxu1 %v5910_v55  ;;  %4722 = vmatpush3.msra.mxu0 %v5991_v57 }
 0x12d   :  { %4677 = vmatprep.subr.mxu1 %v5921_v60  ;;  %1310 = vmatprep.mubr.f32.mxu1 %v911_v22  ;;  %v8148_v22 = vld [vmem:[#allocation37_spill] sm:$0xff] }
 0x12e   :  { %4723 = vmatprep.subr.mxu0 %v5999_v8  ;;  %4678 = vmatpush3.msra.mxu1 %v5925_v62  ;;  %v583_v7 = vrot.slane %v569_v53, %v8148_v22  ;;  %v8158_v53 = vld [vmem:[#allocation20_spill] sm:$0xff]  ;;  %v665_v22 = vpop.f32.mrf.mxu0 }
 0x12f   :  { %4724 = vmatpush3.msra.mxu0 %v6007_v26  ;;  %4679 = vmatprep.subr.mxu1 %v5929_v0 }
 0x130   :  { %4725 = vmatprep.subr.mxu0 %v6016_v35  ;;  %4680 = vmatpush3.msra.mxu1 %v5939_v5  ;;  %v585_v42 = vcombine.high %v583_v7, %v583_v7  ;;  %v6370_v30 = vadd.f32 %v665_v22, %v583_v7  ;;  %v667_v44 = vpop.f32.mrf.mxu0  ;;  %v8167_v7 = vld [vmem:[#allocation27_spill] sm:$0xff] }
 0x131   :  { %4726 = vmatpush3.msra.mxu0 %v6026_v46  ;;  %4681 = vmatprep.subr.mxu1 %v5946_v10 }
 0x132   :  { %4727 = vmatprep.subr.mxu0 %v6036_v56  ;;  %4682 = vmatpush3.msra.mxu1 %v5953_v15 }
 0x133   :  { %4728 = vmatpush3.msra.mxu0 %v6049_v29  ;;  %4683 = vmatprep.subr.mxu1 %v5960_v21 }
 0x134   :  { %4729 = vmatprep.subr.mxu0 %v6062_v38  ;;  %4684 = vmatpush3.msra.mxu1 %v6005_v23 }
 0x135   :  { %4730 = vmatpush3.msra.mxu0 %v6091_v43  ;;  %4685 = vmatprep.subr.mxu1 %v8141_v48 }
 0x136   :  { %4731 = vmatprep.subr.mxu0 %v8142_v12  ;;  %4686 = vmatpush3.msra.mxu1 %v8143_v54 }
 0x137   :  { %4732 = vmatpush3.msra.mxu0 %v8144_v32  ;;  %4687 = vmatprep.subr.mxu1 %v8145_v58 }
 0x138   :  { %4733 = vmatprep.subr.mxu0 %v8146_v49  ;;  %4688 = vmatpush3.msra.mxu1 %v8147_v45 }
 0x139   :  { %4734 = vmatpush3.msra.mxu0 %v8149_v17  ;;  %4689 = vmatprep.subr.mxu1 %v8150_v41 }
 0x13a   :  { %4735 = vmatprep.subr.mxu0 %v8151_v3  ;;  %4690 = vmatpush3.msra.mxu1 %v8152_v33 }
 0x13b   :  { %4736 = vmatpush3.msra.mxu0 %v8153_v13  ;;  %4691 = vmatprep.subr.mxu1 %v8154_v1 }
 0x13c   :  { %4737 = vmatprep.subr.mxu0 %v8155_v27  ;;  %4692 = vmatpush3.msra.mxu1 %v8156_v4  ;;  %v8163_v27 = vand.u32 4294901760, %v6286_v2  ;;  %v8164_v4 = vld [vmem:[#allocation7_spill] sm:$0xff] }
 0x13d   :  { %4738 = vmatpush3.msra.mxu0 %v8157_v9  ;;  %4693 = vmatprep.subr.mxu1 %v8158_v53  ;;  %v6377_v9 = vadd.f32 %v667_v44, %v585_v42  ;;  %v8165_v53 = vld [vmem:[#allocation25_spill] sm:$0xff]  ;;  %v8169_v44 = vld [vmem:[#allocation30_spill] sm:$0xff]  ;;  %v8170_v42 = vand.u32 4294901760, %v6301_v63 }
 0x13e   :  { %4739 = vmatprep.subr.mxu0 %v8159_v61  ;;  %4694 = vmatpush3.msra.mxu1 %v8160_v28  ;;  %v8166_v61 = vand.u32 4294901760, %v6298_v6  ;;  %v669_v28 = vpop.f32.mrf.mxu0 }
 0x13f   :  { %4740 = vmatpush3.msra.mxu0 %v8161_v19  ;;  %4695 = vmatprep.subr.mxu1 %v8162_v36  ;;  %v8172_v28 = vld [vmem:[#allocation35_spill] sm:$0xff] }
 0x140   :  { %1430 = vmatmul.mubr.f32.vlgmr.msra.gmra.mxu0 %v8163_v27  ;;  %4785 = vmatprep.subr.mxu0 %v8164_v4  ;;  %v8168_v27 = vld [vmem:[#allocation29_spill] sm:$0xff]  ;;  %v670_v4 = vpop.f32.mrf.mxu0 }
 0x141   :  { %4696 = vmatpush3.msra.mxu1 %v8165_v53  ;;  %1437 = vmatprep.mubr.f32.mxu0 %v8166_v61 }
 0x142   :  { %4786 = vmatpush3.msra.mxu0 %v5769_v11  ;;  %4697 = vmatprep.subr.mxu1 %v8167_v7  ;;  %v8171_v11 = vld [vmem:[#allocation32_spill] sm:$0xff] }
 0x143   :  { %4787 = vmatprep.subr.mxu0 %v5780_v14  ;;  %4698 = vmatpush3.msra.mxu1 %v8168_v27  ;;  %v8173_v14 = vld [vmem:[#allocation36_spill] sm:$0xff] }
 0x144   :  { %4788 = vmatpush3.msra.mxu0 %v5789_v16  ;;  %4699 = vmatprep.subr.mxu1 %v8169_v44  ;;  %v8174_v16 = vld [vmem:[#allocation8_spill] sm:$0xff] }
 0x145   :  { %1441 = vmatmul.mubr.f32.gmra.mxu0 %v8170_v42  ;;  %4789 = vmatprep.subr.mxu0 %v5798_v18  ;;  %v8175_v61 = vand.u32 4294901760, %v8174_v16  ;;  %v8176_v18 = vand.u32 4294901760, %v5886_v47  ;;  %v8185_v47 = vand.u32 4294901760, %v5946_v10  ;;  %v8194_v10 = vand.u32 4294901760, %v8152_v33 }
 0x146   :  { %4700 = vmatpush3.msra.mxu1 %v8171_v11  ;;  %4790 = vmatpush3.msra.mxu0 %v5805_v20  ;;  %v8177_v20 = vand.u32 4294901760, %v5894_v50  ;;  %v8186_v50 = vand.u32 4294901760, %v5953_v15  ;;  %v8195_v15 = vand.u32 4294901760, %v8154_v1 }
 0x147   :  { %1718 = vmatprep.mubr.f32.mxu0 %v6280_v59  ;;  %4701 = vmatprep.subr.mxu1 %v8172_v28 }
 0x148   :  { %4791 = vmatprep.subr.mxu0 %v5815_v24  ;;  %4702 = vmatpush3.msra.mxu1 %v8173_v14  ;;  %v8178_v24 = vand.u32 4294901760, %v5898_v51  ;;  %v8187_v51 = vand.u32 4294901760, %v5960_v21  ;;  %v8196_v21 = vld [vmem:[#allocation28_spill] sm:$0xff] }
 0x149   :  { %4792 = vmatpush3.msra.mxu0 %v5818_v25  ;;  %1313 = vmatmul.mubr.f32.vlgmr.msra.gmra.mxu1 %v6286_v2  ;;  %v8179_v25 = vand.u32 4294901760, %v5902_v52  ;;  %v8188_v52 = vand.u32 4294901760, %v6005_v23  ;;  %v8199_v23 = vld [vmem:[#allocation31_spill] sm:$0xff]  ;;  %v8208_v2 = vld [vmem:[#allocation41_spill] sm:$0xff] }
 0x14a   :  { %4747 = vmatprep.subr.mxu1 %v8175_v61  ;;  %4793 = vmatprep.subr.mxu0 %v5835_v31  ;;  %v8180_v31 = vand.u32 4294901760, %v5910_v55  ;;  %v8189_v55 = vand.u32 4294901760, %v8141_v48  ;;  %v8211_v48 = vand.u32 4294901760, %v8169_v44 }
 0x14b   :  { %1319 = vmatprep.mubr.f32.mxu1 %v6298_v6  ;;  %4748 = vmatpush3.msra.mxu1 %v8176_v18  ;;  %v8209_v6 = vand.u32 4294901760, %v8167_v7 }
 0x14c   :  { %4794 = vmatpush3.msra.mxu0 %v5843_v34  ;;  %4749 = vmatprep.subr.mxu1 %v8177_v20  ;;  %v8181_v34 = vand.u32 4294901760, %v5921_v60  ;;  %v8190_v60 = vand.u32 4294901760, %v8143_v54  ;;  %v8215_v54 = vmov 0.0  }
 0x14d   :  { %4795 = vmatprep.subr.mxu0 %v5852_v37  ;;  %4750 = vmatpush3.msra.mxu1 %v8178_v24  ;;  %v8182_v37 = vand.u32 4294901760, %v5925_v62  ;;  %v8191_v62 = vand.u32 4294901760, %v8145_v58 }
 0x14e   :  { %4796 = vmatpush3.msra.mxu0 %v5857_v39  ;;  %1322 = vmatmul.mubr.f32.gmra.mxu1 %v6301_v63  ;;  %v8183_v39 = vand.u32 4294901760, %v5929_v0  ;;  %v8192_v0 = vand.u32 4294901760, %v8147_v45  ;;  %v8210_v63 = vand.u32 4294901760, %v8168_v27 }
 0x14f   :  { %4751 = vmatprep.subr.mxu1 %v8179_v25  ;;  %4797 = vmatprep.subr.mxu0 %v5860_v40  ;;  %v8184_v40 = vand.u32 4294901760, %v5939_v5  ;;  %v8193_v5 = vand.u32 4294901760, %v8150_v41 }
 0x150   :  { %4752 = vmatpush3.msra.mxu1 %v8180_v31  ;;  %1607 = vmatprep.mubr.f32.mxu1 %v6280_v59  ;;  %v8207_v59 = vand.u32 4294901760, %v8165_v53 }
 0x151   :  { %4798 = vmatpush3.msra.mxu0 %v5991_v57  ;;  %4753 = vmatprep.subr.mxu1 %v8181_v34  ;;  %v8197_v57 = vld [vmem:[#allocation16_spill] sm:$0xff] }
 0x152   :  { %4799 = vmatprep.subr.mxu0 %v5999_v8  ;;  %4754 = vmatpush3.msra.mxu1 %v8182_v37  ;;  %v8198_v8 = vand.u32 4294901760, %v8197_v57 }
 0x153   :  { %4800 = vmatpush3.msra.mxu0 %v6007_v26  ;;  %4755 = vmatprep.subr.mxu1 %v8183_v39  ;;  %v8200_v26 = vld [vmem:[#allocation20_spill] sm:$0xff] }
 0x154   :  { %4801 = vmatprep.subr.mxu0 %v6016_v35  ;;  %4756 = vmatpush3.msra.mxu1 %v8184_v40  ;;  %v8201_v35 = vand.u32 4294901760, %v8200_v26 }
 0x155   :  { %4802 = vmatpush3.msra.mxu0 %v6026_v46  ;;  %4757 = vmatprep.subr.mxu1 %v8185_v47  ;;  %v8203_v46 = vld [vmem:[#allocation22_spill] sm:$0xff] }
 0x156   :  { %4803 = vmatprep.subr.mxu0 %v6036_v56  ;;  %4758 = vmatpush3.msra.mxu1 %v8186_v50  ;;  %v8204_v56 = vand.u32 4294901760, %v8203_v46 }
 0x157   :  { %4804 = vmatpush3.msra.mxu0 %v6049_v29  ;;  %4759 = vmatprep.subr.mxu1 %v8187_v51  ;;  %v8205_v29 = vand.u32 4294901760, %v8162_v36  ;;  %v8213_v36 = vand.u32 4294901760, %v8171_v11 }
 0x158   :  { %4805 = vmatprep.subr.mxu0 %v6062_v38  ;;  %4760 = vmatpush3.msra.mxu1 %v8188_v52  ;;  %v8206_v38 = vld [vmem:[#allocation40_spill] sm:$0xff] }
 0x159   :  { %4806 = vmatpush3.msra.mxu0 %v6091_v43  ;;  %4761 = vmatprep.subr.mxu1 %v8189_v55  ;;  %v8202_v43 = vld [vmem:[#allocation33_spill] sm:$0xff] }
 0x15a   :  { %4807 = vmatprep.subr.mxu0 %v8142_v12  ;;  %4762 = vmatpush3.msra.mxu1 %v8190_v60  ;;  %v8214_v12 = vand.u32 4294901760, %v8172_v28 }
 0x15b   :  { %4808 = vmatpush3.msra.mxu0 %v8144_v32  ;;  %4763 = vmatprep.subr.mxu1 %v8191_v62  ;;  %v8216_v32 = vand.u32 4294901760, %v8173_v14 }
 0x15c   :  { %4809 = vmatprep.subr.mxu0 %v8146_v49  ;;  %4764 = vmatpush3.msra.mxu1 %v8192_v0 }
 0x15d   :  { %4810 = vmatpush3.msra.mxu0 %v8149_v17  ;;  %4765 = vmatprep.subr.mxu1 %v8193_v5 }
 0x15e   :  { %4811 = vmatprep.subr.mxu0 %v8151_v3  ;;  %4766 = vmatpush3.msra.mxu1 %v8194_v10 }
 0x15f   :  { %4812 = vmatpush3.msra.mxu0 %v8153_v13  ;;  %4767 = vmatprep.subr.mxu1 %v8195_v15 }
 0x160   :  { %4813 = vmatprep.subr.mxu0 %v8196_v21  ;;  %4768 = vmatpush3.msra.mxu1 %v8198_v8 }
 0x161   :  { %4814 = vmatpush3.msra.mxu0 %v8199_v23  ;;  %4769 = vmatprep.subr.mxu1 %v8201_v35  ;;  %v1734_v23 = vld [vmem:[%s7816_s6] sm:$0xff] }
 0x162   :  { %4815 = vmatprep.subr.mxu0 %v8202_v43  ;;  %4770 = vmatpush3.msra.mxu1 %v8204_v56 }
 0x163   :  { %4816 = vmatpush3.msra.mxu0 %v8161_v19  ;;  %4771 = vmatprep.subr.mxu1 %v8205_v29  ;;  %v8212_v19 = vld [vmem:[#allocation42_spill] sm:$0xff]  ;;  %v1735_v29 = vld [vmem:[%s7816_s6 + $0x8] sm:$0xff] }
 0x164   :  { %1720 = vmatmul.mubr.f32.vlgmr.msra.gmra.mxu0 %v8206_v38  ;;  %4772 = vmatpush3.msra.mxu1 %v8207_v59 }
 0x165   :  { %1725 = vmatprep.mubr.f32.mxu0 %v8208_v2  ;;  %4773 = vmatprep.subr.mxu1 %v8209_v6 }
 0x166   :  { %4774 = vmatpush3.msra.mxu1 %v8210_v63  ;;  %v1764_v63 = vld [vmem:[%s7820_s10 + $0x38] sm:$0xff] }
 0x167   :  { %4775 = vmatprep.subr.mxu1 %v8211_v48  ;;  %v6517_v48 = vand.u32 4294901760, %v1764_v63 }
 0x168   :  { %1727 = vmatmul.mubr.f32.gmra.mxu0 %v8212_v19  ;;  %4776 = vmatpush3.msra.mxu1 %v8213_v36 }
 0x169   :  { %4777 = vmatprep.subr.mxu1 %v8214_v12  ;;  %1970 = vmatprep.mubr.f32.mxu0 %v8215_v54  ;;  %v1762_v12 = vld [vmem:[%s7820_s10 + $0x28] sm:$0xff] }
 0x16a   :  { %4778 = vmatpush3.msra.mxu1 %v8216_v32  ;;  %v1761_v32 = vld [vmem:[%s7820_s10 + $0x20] sm:$0xff] }
 0x16b   :  { %1609 = vmatmul.mubr.f32.vlgmr.msra.gmra.mxu1 %v8206_v38  ;;  %1796 = vmatprep.subr.mxu1 %v6517_v48 }
 0x16c   :  { %1614 = vmatprep.mubr.f32.mxu1 %v8208_v2 }
 0x16f   :  { %1616 = vmatmul.mubr.f32.gmra.mxu1 %v8212_v19  ;;  %v1763_v19 = vld [vmem:[%s7820_s10 + $0x30] sm:$0xff] }
 0x170   :  { %1843 = vmatprep.mubr.f32.mxu1 %v8215_v54  ;;  %v6522_v36 = vand.u32 4294901760, %v1763_v19 }
 0x172   :  { %1798 = vmatpush1.msra.mxu1 %v6522_v36 }
 0x1de   :  { %v4665_v58 = vpop.f32.mrf.mxu0 }
 0x1e0   :  { %v4666_v49 = vpop.f32.mrf.mxu0 }
 0x1e1   :  { %v4667_v14 = vadd.f32 %v4666_v49, %v4665_v58  ;;  %v1760_v58 = vld [vmem:[%s7820_s10 + $0x18] sm:$0xff]  ;;  %v6534_v49 = vsub.f32 %v1764_v63, %v6517_v48 }
 0x1e2   :  { %v4668_v17 = vpop.f32.mrf.mxu0 }
 0x1e4   :  { %v4669_v3 = vpop.f32.mrf.mxu0 }
 0x1e5   :  { %v4670_v25 = vadd.f32 %v4669_v3, %v4668_v17  ;;  %v6538_v17 = vand.u32 4294901760, %v1761_v32  ;;  %v1759_v3 = vld [vmem:[%s7820_s10 + $0x10] sm:$0xff] }
 0x1e6   :  { %v4627_v45 = vpop.f32.mrf.mxu1 }
 0x1e8   :  { %v4628_v41 = vpop.f32.mrf.mxu1 }
 0x1e9   :  { %v4629_v11 = vadd.f32 %v4628_v41, %v4627_v45  ;;  %v6536_v45 = vand.u32 4294901760, %v1762_v12  ;;  %v6540_v41 = vand.u32 4294901760, %v1760_v58 }
 0x1eb   :  { %v4630_v33 = vpop.f32.mrf.mxu1  ;;  %v1170_v18 = vadd.f32 %v4667_v14, %v4629_v11  ;;  %v6570_v11 = vsub.f32 %v1760_v58, %v6540_v41  ;;  %1800 = vmatprep.subr.mxu1 %v6536_v45 }
 0x1ec   :  { %1802 = vmatpush1.msra.mxu1 %v6538_v17 }
 0x1ed   :  { %v4631_v1 = vpop.f32.mrf.mxu1  ;;  %1804 = vmatprep.subr.mxu1 %v6540_v41 }
 0x1ee   :  { %v4632_v20 = vadd.f32 %v4631_v1, %v4630_v33  ;;  %v1758_v33 = vld [vmem:[%s7820_s10 + $0x8] sm:$0xff]  ;;  %v6553_v1 = vsub.f32 %v1763_v19, %v6522_v36 }
 0x1f0   :  { %v1177_v39 = vadd.f32 %v4670_v25, %v4632_v20  ;;  %v1916_v25 = vand.u32 4294901760, %v6570_v11 }
 0x200   :  { %v4741_v13 = vpop.f32.mrf.mxu0 }
 0x202   :  { %v4742_v53 = vpop.f32.mrf.mxu0 }
 0x203   :  { %v4743_v40 = vadd.f32 %v4742_v53, %v4741_v13  ;;  %v1757_v13 = vld [vmem:[%s7820_s10] sm:$0xff]  ;;  %v6555_v53 = vand.u32 4294901760, %v1759_v3 }
 0x205   :  { %v4744_v27 = vpop.f32.mrf.mxu0  ;;  %v6575_v14 = vsub.f32 %v1759_v3, %v6555_v53  ;;  %1806 = vmatpush1.msra.mxu1 %v6555_v53 }
 0x207   :  { %v4745_v44 = vpop.f32.mrf.mxu0 }
 0x208   :  { %v4746_v62 = vadd.f32 %v4745_v44, %v4744_v27  ;;  %v6559_v27 = vand.u32 4294901760, %v1757_v13  ;;  %v6564_v44 = vsub.f32 %v1762_v12, %v6536_v45 }
 0x209   :  { %v4703_v7 = vpop.f32.mrf.mxu1 }
 0x20a   :  { %v1904_v20 = vand.u32 4294901760, %v6564_v44 }
 0x20b   :  { %v4704_v4 = vpop.f32.mrf.mxu1 }
 0x20c   :  { %v4705_v16 = vadd.f32 %v4704_v4, %v4703_v7  ;;  %v6557_v7 = vand.u32 4294901760, %v1758_v33  ;;  %v1892_v4 = vand.u32 4294901760, %v6534_v49 }
 0x20e   :  { %v4706_v42 = vpop.f32.mrf.mxu1  ;;  %v1315_v31 = vadd.f32 %v4705_v16, %v1170_v18  ;;  %v6578_v16 = vsub.f32 %v1758_v33, %v6557_v7  ;;  %v1893_v18 = vsub.f32 %v6534_v49, %v1892_v4  ;;  %1808 = vmatprep.subr.mxu1 %v6557_v7 }
 0x20f   :  { %1810 = vmatpush1.msra.mxu1 %v6559_v27 }
 0x210   :  { %v4707_v61 = vpop.f32.mrf.mxu1  ;;  %v1432_v52 = vadd.f32 %v4743_v40, %v1315_v31  ;;  %v1894_v40 = vand.u32 4294901760, %v1893_v18  ;;  %2011 = vmatprep.subr.mxu1 %v6534_v49  ;;  %v2382_v49 = vld [vmem:[%s7821_s11 + $0x78] sm:$0xff] }
 0x211   :  { %v4708_v34 = vadd.f32 %v4707_v61, %v4706_v42  ;;  %v6567_v42 = vsub.f32 %v1761_v32, %v6538_v17  ;;  %v6581_v61 = vsub.f32 %v1757_v13, %v6559_v27 }
 0x212   :  { %1895 = vmatprep.subr.mxu0 %v1894_v40 }
 0x213   :  { %v1324_v51 = vadd.f32 %v4708_v34, %v1177_v39  ;;  %v1922_v34 = vand.u32 4294901760, %v6575_v14  ;;  %v1934_v39 = vand.u32 4294901760, %v6581_v61 }
 0x215   :  { %v1443_v21 = vadd.f32 %v4746_v62, %v1324_v51  ;;  %v1917_v51 = vsub.f32 %v6570_v11, %v1916_v25  ;;  %v1935_v62 = vsub.f32 %v6581_v61, %v1934_v39 }
 0x224   :  { %v4817_v28 = vpop.f32.mrf.mxu0 }
 0x226   :  { %v4818_v24 = vpop.f32.mrf.mxu0 }
 0x227   :  { %v4819_v0 = vadd.f32 %v4818_v24, %v4817_v28  ;;  %v1898_v28 = vand.u32 4294901760, %v6553_v1  ;;  %v1910_v24 = vand.u32 4294901760, %v6567_v42 }
 0x228   :  { %v4820_v47 = vpop.f32.mrf.mxu0 }
 0x229   :  { %v1899_v31 = vsub.f32 %v6553_v1, %v1898_v28 }
 0x22a   :  { %v4821_v10 = vpop.f32.mrf.mxu0 }
 0x22b   :  { %v4779_v37 = vpop.f32.mrf.mxu1  ;;  %v4822_v26 = vadd.f32 %v4821_v10, %v4820_v47  ;;  %v1905_v47 = vsub.f32 %v6564_v44, %v1904_v20  ;;  %v1918_v10 = vand.u32 4294901760, %v1917_v51 }
 0x22d   :  { %v4780_v50 = vpop.f32.mrf.mxu1 }
 0x22e   :  { %v4781_v55 = vadd.f32 %v4780_v50, %v4779_v37  ;;  %v1928_v37 = vand.u32 4294901760, %v6578_v16  ;;  %v1911_v50 = vsub.f32 %v6567_v42, %v1910_v24 }
 0x22f   :  { %v4782_v60 = vpop.f32.mrf.mxu1 }
 0x230   :  { %v1611_v5 = vadd.f32 %v4781_v55, %v1432_v52  ;;  %v1900_v52 = vand.u32 4294901760, %v1899_v31  ;;  %v1923_v55 = vsub.f32 %v6575_v14, %v1922_v34 }
 0x231   :  { %v4783_v15 = vpop.f32.mrf.mxu1 }
 0x232   :  { %v4784_v57 = vadd.f32 %v4783_v15, %v4782_v60  ;;  %v1722_v8 = vadd.f32 %v4819_v0, %v1611_v5  ;;  %v1929_v60 = vsub.f32 %v6578_v16, %v1928_v37  ;;  %v1906_v0 = vand.u32 4294901760, %v1905_v47  ;;  %1901 = vmatpush1.msra.mxu0 %v1900_v52 }
 0x233   :  { %v1912_v5 = vand.u32 4294901760, %v1911_v50  ;;  %v1924_v15 = vand.u32 4294901760, %v1923_v55 }
 0x234   :  { %v1618_v35 = vadd.f32 %v4784_v57, %v1443_v21  ;;  %v1732_v43 = vmul.f32 0.35355338, %v1722_v8  ;;  %1907 = vmatprep.subr.mxu0 %v1906_v0  ;;  %v1930_v21 = vand.u32 4294901760, %v1929_v60  ;;  %v1936_v57 = vand.u32 4294901760, %v1935_v62  ;;  %v2394_v0 = vld [vmem:[%s7821_s11 + $0xd8] sm:$0xff] }
 0x235   :  { %1913 = vmatpush1.msra.mxu0 %v1912_v5 }
 0x236   :  { %v1729_v46 = vadd.f32 %v4822_v26, %v1618_v35  ;;  %v6503_v56 = vadd.f32 %v1734_v23, %v1732_v43  ;;  %1919 = vmatprep.subr.mxu0 %v1918_v10 }
 0x237   :  { %1925 = vmatpush1.msra.mxu0 %v1924_v15 }
 0x238   :  { %v1738_v38 = vsel %vm73_vm0, %v6503_v56, -inf  ;;  %v1733_v59 = vmul.f32 0.35355338, %v1729_v46  ;;  %1931 = vmatprep.subr.mxu0 %v1930_v21 }
 0x239   :  { %1739 = vmax.xlane.f32.xlu0 %v1738_v38  ;;  %1937 = vmatpush1.msra.mxu0 %v1936_v57  ;;  %v2378_v57 = vld [vmem:[%s7821_s11 + $0x58] sm:$0xff] }
 0x23a   :  { %v6510_v2 = vadd.f32 %v1735_v29, %v1733_v59  ;;  %2107 = vmatprep.subr.mxu0 %v6517_v48 }
 0x23c   :  { %v1741_v6 = vsel %vm73_vm0, %v6510_v2, -inf }
 0x23d   :  { %1742 = vmax.xlane.f32.xlu0 %v1741_v6 }
 0x2c2   :  { %v1740_v8 = vpop.xlane.xlu0 %1739 }
 0x2c6   :  { %v1743_v23 = vpop.xlane.xlu0 %1742 }
 0x2c7   :  { %v1744_v26 = vmax.f32 %v1740_v8, %v1743_v23 }
 0x2c9   :  { %v1745_v35 = vrot.slane %v1744_v26, 4 }
 0x2cb   :  { %v1746_v43 = vmax.f32 %v1744_v26, %v1745_v35 }
 0x2cd   :  { %v1747_v46 = vrot.slane %v1746_v43, 2 }
 0x2cf   :  { %v1748_v29 = vmax.f32 %v1746_v43, %v1747_v46  ;;  %v2393_v43 = vld [vmem:[%s7821_s11 + $0xd0] sm:$0xff] }
 0x2d1   :  { %v1749_v38 = vrot.slane %v1748_v29, 1 }
 0x2d3   :  { %v1750_v59 = vmax.f32 %v1748_v29, %v1749_v38 }
 0x2d5   :  { %v1751_v6 = vsub.f32 %v6503_v56, %v1750_v59  ;;  %v1752_v63 = vsub.f32 %v6510_v2, %v1750_v59  ;;  %v6791_v59 = vand.u32 4294901760, %v2394_v0 }
 0x2d7   :  { %v1753_v19 = vmul.f32 1.442695, %v1751_v6  ;;  %v1755_v12 = vmul.f32 1.442695, %v1752_v63  ;;  %v2377_v6 = vld [vmem:[%s7821_s11 + $0x50] sm:$0xff] }
 0x2d9   :  { %5428 = vpow2.f32 %v1753_v19 }
 0x2da   :  { %5430 = vpow2.f32 %v1755_v12 }
 0x2e6   :  { %v5429_v32 = vpop.eup %5428 }
 0x2e7   :  { %v5431_v58 = vpop.eup %5430  ;;  %v1766_v3 = vsel %vm73_vm0, %v5429_v32, 0  ;;  %v6804_v32 = vand.u32 4294901760, %v2378_v57 }
 0x2e8   :  { %v1844_v33 = vand.u32 4294901760, %v1766_v3  ;;  %v1769_v13 = vsel %vm73_vm0, %v5431_v58, 0  ;;  %v2392_v58 = vld [vmem:[%s7821_s11 + $0xc8] sm:$0xff] }
 0x2e9   :  { %v1855_v18 = vand.u32 4294901760, %v1769_v13 }
 0x2ea   :  { %v1845_v31 = vsub.f32 %v1766_v3, %v1844_v33  ;;  %1972 = vmatmul.mubr.f32.vlgmr.msra.gmra.mxu0 %v1844_v33 }
 0x2eb   :  { %2109 = vmatpush1.msra.mxu0 %v6522_v36  ;;  %1977 = vmatprep.mubr.f32.mxu0 %v8215_v54  ;;  %v1856_v56 = vsub.f32 %v1769_v13, %v1855_v18  ;;  %v6815_v13 = vsub.f32 %v2394_v0, %v6791_v59 }
 0x2ec   :  { %2111 = vmatprep.subr.mxu0 %v6536_v45  ;;  %v1846_v2 = vand.u32 4294901760, %v1845_v31 }
 0x2ed   :  { %2113 = vmatpush1.msra.mxu0 %v6538_v17  ;;  %v1857_v47 = vand.u32 4294901760, %v1856_v56 }
 0x2ee   :  { %1979 = vmatmul.mubr.f32.gmra.mxu0 %v1855_v18  ;;  %2115 = vmatprep.subr.mxu0 %v6540_v41  ;;  %v1847_v40 = vsub.f32 %v1845_v31, %v1846_v2 }
 0x2ef   :  { %2117 = vmatpush1.msra.mxu0 %v6555_v53  ;;  %2154 = vmatprep.mubr.f32.mxu0 %v8215_v54  ;;  %v1858_v51 = vsub.f32 %v1856_v56, %v1857_v47 }
 0x2f0   :  { %2119 = vmatprep.subr.mxu0 %v6557_v7  ;;  %v1848_v50 = vand.u32 4294901760, %v1847_v40  ;;  %v6829_v40 = vsub.f32 %v2378_v57, %v6804_v32 }
 0x2f1   :  { %2121 = vmatpush1.msra.mxu0 %v6559_v27  ;;  %v1859_v52 = vand.u32 4294901760, %v1858_v51 }
 0x2f2   :  { %1849 = vmatmul.mubr.f32.vlgmr.msra.gmra.mxu1 %v1848_v50  ;;  %2158 = vmatmul.mubr.f32.vlgmr.msra.gmra.mxu0 %v1846_v2  ;;  %v2391_v50 = vld [vmem:[%s7821_s11 + $0xc0] sm:$0xff] }
 0x2f3   :  { %2014 = vmatpush1.msra.mxu1 %v6553_v1  ;;  %2301 = vmatprep.subr.mxu0 %v6517_v48  ;;  %v2398_v48 = vld [vmem:[%s7821_s11 + $0xf8] sm:$0xff]  ;;  %v2381_v1 = vld [vmem:[%s7821_s11 + $0x70] sm:$0xff]  ;;  %v6873_v0 = vand.u32 4294901760, %v2391_v50 }
 0x2f4   :  { %2017 = vmatprep.subr.mxu1 %v6564_v44  ;;  %2303 = vmatpush1.msra.mxu0 %v6522_v36  ;;  %v6675_v36 = vand.u32 4294901760, %v2398_v48 }
 0x2f5   :  { %2020 = vmatpush1.msra.mxu1 %v6567_v42  ;;  %2305 = vmatprep.subr.mxu0 %v6536_v45  ;;  %v6680_v45 = vand.u32 4294901760, %v2382_v49 }
 0x2f6   :  { %1854 = vmatprep.mubr.f32.mxu1 %v8215_v54  ;;  %2023 = vmatprep.subr.mxu1 %v6570_v11  ;;  %8217 = vst [vmem:[#allocation9_spill] sm:$0xff] %v6675_v36  ;;  %v2380_v11 = vld [vmem:[%s7821_s11 + $0x68] sm:$0xff] }
 0x2f7   :  { %2163 = vmatprep.mubr.f32.mxu0 %v8215_v54  ;;  %2307 = vmatpush1.msra.mxu0 %v6538_v17  ;;  %v2397_v17 = vld [vmem:[%s7821_s11 + $0xf0] sm:$0xff] }
 0x2f8   :  { %1860 = vmatmul.mubr.f32.gmra.mxu1 %v1859_v52  ;;  %2167 = vmatmul.mubr.f32.gmra.mxu0 %v1857_v47  ;;  %v6831_v47 = vand.u32 4294901760, %v2377_v6  ;;  %v6841_v52 = vand.u32 4294901760, %v6815_v13 }
 0x2f9   :  { %2026 = vmatpush1.msra.mxu1 %v6575_v14  ;;  %2309 = vmatprep.subr.mxu0 %v6540_v41  ;;  %v6686_v41 = vsub.f32 %v2398_v48, %v6675_v36 }
 0x2fa   :  { %2029 = vmatprep.subr.mxu1 %v6578_v16  ;;  %2311 = vmatpush1.msra.mxu0 %v6555_v53  ;;  %v6695_v53 = vsub.f32 %v2382_v49, %v6680_v45  ;;  %v6721_v16 = vand.u32 4294901760, %v2380_v11  ;;  %8234 = vst [vmem:[#allocation25_spill] sm:$0xff] %v6841_v52  ;;  %v6846_v49 = vand.u32 4294901760, %v2392_v58 }
 0x2fb   :  { %2032 = vmatpush1.msra.mxu1 %v6581_v61  ;;  %2313 = vmatprep.subr.mxu0 %v6557_v7  ;;  %8218 = vst [vmem:[#allocation17_spill] sm:$0xff] %v6686_v41  ;;  %v6697_v7 = vand.u32 4294901760, %v2381_v1  ;;  %v2395_v61 = vld [vmem:[%s7821_s11 + $0xe0] sm:$0xff] }
 0x2fc   :  { %2065 = vmatprep.mubr.f32.mxu1 %v8215_v54  ;;  %2200 = vmatprep.subr.mxu1 %v1892_v4  ;;  %v6704_v4 = vand.u32 4294901760, %v6686_v41  ;;  %v6747_v60 = vsub.f32 %v2380_v11, %v6721_v16  ;;  %v6859_v11 = vsub.f32 %v2377_v6, %v6831_v47 }
 0x2fd   :  { %2315 = vmatpush1.msra.mxu0 %v6559_v27  ;;  %2348 = vmatprep.mubr.f32.mxu0 %v8215_v54  ;;  %v2396_v27 = vld [vmem:[%s7821_s11 + $0xe8] sm:$0xff]  ;;  %v6719_v14 = vsub.f32 %v2381_v1, %v6697_v7 }
 0x2fe   :  { %2068 = vmatmul.mubr.f32.vlgmr.msra.gmra.mxu1 %v1845_v31  ;;  %2350 = vmatmul.mubr.f32.vlgmr.msra.gmra.mxu0 %v1844_v33  ;;  %8219 = vst [vmem:[#allocation10_spill] sm:$0xff] %v6704_v4  ;;  %v6709_v42 = vand.u32 4294901760, %v2396_v27  ;;  %v6774_v26 = vand.u32 4294901760, %v6747_v60  ;;  %v2376_v31 = vld [vmem:[%s7821_s11 + $0x48] sm:$0xff]  ;;  %v6880_v57 = vand.u32 4294901760, %v6859_v11 }
 0x2ff   :  { %2204 = vmatpush1.msra.mxu1 %v1898_v28  ;;  %2073 = vmatprep.mubr.f32.mxu1 %v8215_v54  ;;  %v6716_v28 = vand.u32 4294901760, %v6695_v53  ;;  %v6744_v55 = vand.u32 4294901760, %v6719_v14 }
 0x300   :  { %2208 = vmatprep.subr.mxu1 %v1904_v20  ;;  %2355 = vmatprep.mubr.f32.mxu0 %v8215_v54  ;;  %v2642_v20 = vsub.f32 %v6686_v41, %v6704_v4  ;;  %8226 = vst [vmem:[#allocation13_spill] sm:$0xff] %v6774_v26  ;;  %v2544_v19 = vsub.f32 %v6747_v60, %v6774_v26  ;;  %8238 = vst [vmem:[#allocation32_spill] sm:$0xff] %v6880_v57 }
 0x301   :  { %2212 = vmatpush1.msra.mxu1 %v1910_v24  ;;  %8220 = vst [vmem:[#allocation18_spill] sm:$0xff] %v6716_v28  ;;  %8222 = vst [vmem:[#allocation19_spill] sm:$0xff] %v6744_v55  ;;  %v2537_v23 = vsub.f32 %v6719_v14, %v6744_v55 }
 0x302   :  { %2216 = vmatprep.subr.mxu1 %v1916_v25  ;;  %2076 = vmatmul.mubr.f32.gmra.mxu1 %v1856_v56  ;;  %v6733_v25 = vsub.f32 %v2396_v27, %v6709_v42  ;;  %v6755_v5 = vand.u32 4294901760, %v2642_v20  ;;  %v6824_v56 = vand.u32 4294901760, %v2544_v19  ;;  %v6856_v27 = vand.u32 4294901760, %v6829_v40 }
 0x303   :  { %2220 = vmatpush1.msra.mxu1 %v1922_v34  ;;  %2357 = vmatmul.mubr.f32.gmra.mxu0 %v1855_v18  ;;  %v6735_v34 = vand.u32 4294901760, %v2395_v61  ;;  %v6797_v63 = vand.u32 4294901760, %v2537_v23  ;;  %v2670_v20 = vsub.f32 %v6815_v13, %v6841_v52 }
 0x304   :  { %2224 = vmatprep.subr.mxu1 %v1928_v37  ;;  %2261 = vmatprep.mubr.f32.mxu1 %v8215_v54  ;;  %v2379_v37 = vld [vmem:[%s7821_s11 + $0x60] sm:$0xff]  ;;  %8223 = vst [vmem:[#allocation12_spill] sm:$0xff] %v6755_v5  ;;  %v6760_v15 = vand.u32 4294901760, %v6733_v25  ;;  %8232 = vst [vmem:[#allocation23_spill] sm:$0xff] %v6824_v56 }
 0x305   :  { %2228 = vmatpush1.msra.mxu1 %v1934_v39  ;;  %v2530_v39 = vsub.f32 %v6695_v53, %v6716_v28  ;;  %v6749_v62 = vand.u32 4294901760, %v2379_v37  ;;  %v6763_v21 = vsub.f32 %v2395_v61, %v6735_v34  ;;  %4861 = vmatprep.subr.mxu0 %v6755_v5  ;;  %8229 = vst [vmem:[#allocation26_spill] sm:$0xff] %v6797_v63  ;;  %8236 = vst [vmem:[#allocation29_spill] sm:$0xff] %v6856_v27 }
 0x306   :  { %2263 = vmatmul.mubr.f32.vlgmr.msra.gmra.mxu1 %v1844_v33  ;;  %4823 = vmatprep.subr.mxu1 %v6675_v36  ;;  %8224 = vst [vmem:[#allocation37_spill] sm:$0xff] %v6760_v15  ;;  %v2656_v29 = vsub.f32 %v6733_v25, %v6760_v15  ;;  %v6861_v61 = vand.u32 4294901760, %v2376_v31  ;;  %v6891_v6 = vand.u32 4294901760, %v2670_v20  ;;  %v2565_v20 = vsub.f32 %v6859_v11, %v6880_v57 }
 0x307   :  { %2268 = vmatprep.mubr.f32.mxu1 %v8215_v54  ;;  %v6688_v54 = vand.u32 4294901760, %v2397_v17  ;;  %4824 = vmatpush3.msra.mxu1 %v6680_v45  ;;  %v6769_v8 = vand.u32 4294901760, %v2530_v39  ;;  %v6777_v35 = vsub.f32 %v2379_v37, %v6749_v62  ;;  %v6789_v38 = vand.u32 4294901760, %v6763_v21 }
 0x308   :  { %v6810_v3 = vand.u32 4294901760, %v2656_v29  ;;  %v6871_v39 = vsub.f32 %v2392_v58, %v6846_v49  ;;  %v6883_v23 = vsub.f32 %v2376_v31, %v6861_v61  ;;  %v2390_v29 = vld [vmem:[%s7821_s11 + $0xb8] sm:$0xff]  ;;  %8240 = vst [vmem:[#allocation36_spill] sm:$0xff] %v6891_v6 }
 0x309   :  { %v6707_v44 = vsub.f32 %v2397_v17, %v6688_v54  ;;  %4825 = vmatprep.subr.mxu1 %v6688_v54  ;;  %8225 = vst [vmem:[#allocation21_spill] sm:$0xff] %v6769_v8  ;;  %8228 = vst [vmem:[#allocation14_spill] sm:$0xff] %v6789_v38  ;;  %4862 = vmatpush3.msra.mxu0 %v6769_v8  ;;  %v6802_v12 = vand.u32 4294901760, %v6777_v35  ;;  %v2663_v33 = vsub.f32 %v6763_v21, %v6789_v38  ;;  %v2375_v17 = vld [vmem:[%s7821_s11 + $0x40] sm:$0xff]  ;;  %v2374_v31 = vld [vmem:[%s7821_s11 + $0x38] sm:$0xff] }
 0x30a   :  { %2270 = vmatmul.mubr.f32.gmra.mxu1 %v1855_v18  ;;  %8231 = vst [vmem:[#allocation34_spill] sm:$0xff] %v6810_v3  ;;  %v6817_v18 = vand.u32 4294901760, %v2393_v43  ;;  %8239 = vst [vmem:[#allocation35_spill] sm:$0xff] %v6883_v23  ;;  %v6896_v58 = vand.u32 4294901760, %v6871_v39  ;;  %v6910_v22 = vand.u32 4294901760, %v6883_v23  ;;  %v2388_v8 = vld [vmem:[%s7821_s11 + $0xa8] sm:$0xff] }
 0x30b   :  { %4826 = vmatpush3.msra.mxu1 %v6697_v7  ;;  %v6730_v24 = vand.u32 4294901760, %v6707_v44  ;;  %8230 = vst [vmem:[#allocation15_spill] sm:$0xff] %v6802_v12  ;;  %v2551_v2 = vsub.f32 %v6777_v35, %v6802_v12  ;;  %v6838_v51 = vand.u32 4294901760, %v2663_v33  ;;  %v6899_v33 = vsub.f32 %v2391_v50, %v6873_v0  ;;  %v2389_v50 = vld [vmem:[%s7821_s11 + $0xb0] sm:$0xff] }
 0x30c   :  { %4827 = vmatprep.subr.mxu1 %v6709_v42  ;;  %v6844_v48 = vsub.f32 %v2393_v43, %v6817_v18  ;;  %v6885_v43 = vand.u32 4294901760, %v2375_v17  ;;  %8241 = vst [vmem:[#allocation8_spill] sm:$0xff] %v6896_v58  ;;  %8244 = vst [vmem:[#allocation31_spill] sm:$0xff] %v6910_v22 }
 0x30d   :  { %8221 = vst [vmem:[#allocation11_spill] sm:$0xff] %v6730_v24  ;;  %4828 = vmatpush3.msra.mxu1 %v6721_v16  ;;  %v2649_v10 = vsub.f32 %v6707_v44, %v6730_v24  ;;  %8233 = vst [vmem:[#allocation7_spill] sm:$0xff] %v6838_v51  ;;  %v6853_v1 = vand.u32 4294901760, %v2551_v2 }
 0x30e   :  { %4829 = vmatprep.subr.mxu1 %v6735_v34  ;;  %v6868_v37 = vand.u32 4294901760, %v6844_v48  ;;  %8242 = vst [vmem:[#allocation28_spill] sm:$0xff] %v6899_v33 }
 0x30f   :  { %4830 = vmatpush3.msra.mxu1 %v6749_v62  ;;  %v6784_v46 = vand.u32 4294901760, %v2649_v10  ;;  %8235 = vst [vmem:[#allocation27_spill] sm:$0xff] %v6853_v1  ;;  %v2558_v10 = vsub.f32 %v6829_v40, %v6856_v27 }
 0x310   :  { %4831 = vmatprep.subr.mxu1 %v6791_v59  ;;  %8237 = vst [vmem:[#allocation30_spill] sm:$0xff] %v6868_v37  ;;  %v2677_v19 = vsub.f32 %v6844_v48, %v6868_v37 }
 0x311   :  { %8227 = vst [vmem:[#allocation24_spill] sm:$0xff] %v6784_v46  ;;  %4863 = vmatprep.subr.mxu0 %v6784_v46  ;;  %4832 = vmatpush3.msra.mxu1 %v6804_v32  ;;  %v6905_v2 = vand.u32 4294901760, %v2558_v10  ;;  %v2684_v10 = vsub.f32 %v6871_v39, %v6896_v58  ;;  %v6940_v46 = vand.u32 4294901760, %v2374_v31  ;;  %v2372_v58 = vld [vmem:[%s7821_s11 + $0x28] sm:$0xff] }
 0x312   :  { %4864 = vmatpush3.msra.mxu0 %v6797_v63  ;;  %4833 = vmatprep.subr.mxu1 %v6817_v18  ;;  %v6933_v63 = vand.u32 4294901760, %v2565_v20 }
 0x313   :  { %4865 = vmatprep.subr.mxu0 %v6810_v3  ;;  %4834 = vmatpush3.msra.mxu1 %v6831_v47  ;;  %8243 = vst [vmem:[#allocation16_spill] sm:$0xff] %v6905_v2  ;;  %v6927_v3 = vand.u32 4294901760, %v2390_v29  ;;  %v6946_v5 = vand.u32 4294901760, %v2684_v10 }
 0x314   :  { %4866 = vmatpush3.msra.mxu0 %v6824_v56  ;;  %4835 = vmatprep.subr.mxu1 %v6846_v49  ;;  %v6925_v56 = vand.u32 4294901760, %v6899_v33  ;;  %8248 = vst [vmem:[#allocation40_spill] sm:$0xff] %v6933_v63 }
 0x315   :  { %4867 = vmatprep.subr.mxu0 %v6838_v51  ;;  %4836 = vmatpush3.msra.mxu1 %v6861_v61  ;;  %v6920_v51 = vand.u32 4294901760, %v2677_v19  ;;  %v2572_v19 = vsub.f32 %v6883_v23, %v6910_v22  ;;  %8250 = vst [vmem:[#allocation42_spill] sm:$0xff] %v6946_v5  ;;  %v6953_v22 = vand.u32 4294901760, %v2389_v50 }
 0x316   :  { %4868 = vmatpush3.msra.mxu0 %v6853_v1  ;;  %4837 = vmatprep.subr.mxu1 %v6873_v0  ;;  %v6913_v1 = vsub.f32 %v2375_v17, %v6885_v43  ;;  %8247 = vst [vmem:[#allocation22_spill] sm:$0xff] %v6925_v56  ;;  %v2373_v17 = vld [vmem:[%s7821_s11 + $0x30] sm:$0xff]  ;;  %v2691_v20 = vsub.f32 %v6899_v33, %v6925_v56  ;;  %v2387_v56 = vld [vmem:[%s7821_s11 + $0xa0] sm:$0xff]  ;;  %v8316_v33 = vld [vmem:[#allocation38_spill] sm:$0xff] }
 0x317   :  { %4838 = vmatpush3.msra.mxu1 %v6885_v43  ;;  %4869 = vmatprep.subr.mxu0 %v6891_v6  ;;  %8246 = vst [vmem:[#allocation33_spill] sm:$0xff] %v6920_v51  ;;  %v6960_v57 = vand.u32 4294901760, %v2572_v19 }
 0x318   :  { %8245 = vst [vmem:[#allocation20_spill] sm:$0xff] %v6913_v1  ;;  %4870 = vmatpush3.msra.mxu0 %v6905_v2  ;;  %v6938_v6 = vand.u32 4294901760, %v6913_v1  ;;  %v6951_v2 = vsub.f32 %v2390_v29, %v6927_v3  ;;  %4839 = vmatprep.subr.mxu1 %v6927_v3  ;;  %v6967_v29 = vand.u32 4294901760, %v2373_v17  ;;  %v6974_v37 = vand.u32 4294901760, %v2691_v20 }
 0x319   :  { %4871 = vmatprep.subr.mxu0 %v6920_v51  ;;  %8252 = vst [vmem:[#allocation44_spill] sm:$0xff] %v6960_v57  ;;  %v6965_v51 = vsub.f32 %v2374_v31, %v6940_v46  ;;  %4840 = vmatpush3.msra.mxu1 %v6940_v46  ;;  %v6982_v31 = vand.u32 4294901760, %v2388_v8 }
 0x31a   :  { %8249 = vst [vmem:[#allocation41_spill] sm:$0xff] %v6938_v6  ;;  %8251 = vst [vmem:[#allocation43_spill] sm:$0xff] %v6951_v2  ;;  %4872 = vmatpush3.msra.mxu0 %v6933_v63  ;;  %v2579_v10 = vsub.f32 %v6913_v1, %v6938_v6  ;;  %v6977_v19 = vand.u32 4294901760, %v6951_v2  ;;  %v6980_v63 = vsub.f32 %v2389_v50, %v6953_v22  ;;  %v2371_v6 = vld [vmem:[%s7821_s11 + $0x20] sm:$0xff]  ;;  %4841 = vmatprep.subr.mxu1 %v6953_v22 }
 0x31b   :  { %8253 = vst [vmem:[#allocation45_spill] sm:$0xff] %v6965_v51  ;;  %4873 = vmatprep.subr.mxu0 %v6946_v5  ;;  %8254 = vst [vmem:[#allocation46_spill] sm:$0xff] %v6974_v37  ;;  %v6992_v20 = vand.u32 4294901760, %v6965_v51  ;;  %v6995_v5 = vsub.f32 %v2373_v17, %v6967_v29  ;;  %v6997_v50 = vand.u32 4294901760, %v2372_v58  ;;  %4842 = vmatpush3.msra.mxu1 %v6967_v29  ;;  %v7021_v38 = vand.u32 4294901760, %v2371_v6 }
 0x31c   :  { %8255 = vst [vmem:[#allocation47_spill] sm:$0xff] %v6977_v19  ;;  %8256 = vst [vmem:[#allocation48_spill] sm:$0xff] %v6980_v63  ;;  %4874 = vmatpush3.msra.mxu0 %v6960_v57  ;;  %v6989_v27 = vand.u32 4294901760, %v2579_v10  ;;  %v2698_v52 = vsub.f32 %v6951_v2, %v6977_v19  ;;  %v7004_v12 = vand.u32 4294901760, %v6980_v63  ;;  %v7007_v10 = vsub.f32 %v2388_v8, %v6982_v31  ;;  %v2386_v8 = vld [vmem:[%s7821_s11 + $0x98] sm:$0xff] }
 0x31d   :  { %8257 = vst [vmem:[#allocation49_spill] sm:$0xff] %v6982_v31  ;;  %8259 = vst [vmem:[#allocation51_spill] sm:$0xff] %v6992_v20  ;;  %4875 = vmatprep.subr.mxu0 %v6974_v37  ;;  %v7009_v57 = vand.u32 4294901760, %v2387_v56  ;;  %4843 = vmatprep.subr.mxu1 %v6982_v31  ;;  %v2586_v17 = vsub.f32 %v6965_v51, %v6992_v20  ;;  %v7016_v37 = vand.u32 4294901760, %v6995_v5  ;;  %v7063_v4 = vand.u32 4294901760, %v2386_v8 }
 0x31e   :  { %8258 = vst [vmem:[#allocation50_spill] sm:$0xff] %v6989_v27  ;;  %8260 = vst [vmem:[#allocation52_spill] sm:$0xff] %v6995_v5  ;;  %4876 = vmatpush3.msra.mxu0 %v6989_v27  ;;  %v7019_v19 = vsub.f32 %v2372_v58, %v6997_v50  ;;  %4844 = vmatpush3.msra.mxu1 %v6997_v50  ;;  %v7027_v26 = vand.u32 4294901760, %v2698_v52  ;;  %v2705_v27 = vsub.f32 %v6980_v63, %v7004_v12  ;;  %v2370_v58 = vld [vmem:[%s7821_s11 + $0x18] sm:$0xff] }
 0x31f   :  { %8261 = vst [vmem:[#allocation53_spill] sm:$0xff] %v6997_v50  ;;  %8262 = vst [vmem:[#allocation54_spill] sm:$0xff] %v7004_v12  ;;  %v7032_v20 = vand.u32 4294901760, %v7007_v10  ;;  %v7035_v15 = vsub.f32 %v2387_v56, %v7009_v57  ;;  %4845 = vmatprep.subr.mxu1 %v7009_v57  ;;  %v7041_v55 = vand.u32 4294901760, %v2586_v17  ;;  %v2593_v52 = vsub.f32 %v6995_v5, %v7016_v37  ;;  %v2385_v56 = vld [vmem:[%s7821_s11 + $0x90] sm:$0xff] }
 0x320   :  { %8263 = vst [vmem:[#allocation55_spill] sm:$0xff] %v7007_v10  ;;  %8264 = vst [vmem:[#allocation56_spill] sm:$0xff] %v7009_v57  ;;  %v7046_v24 = vand.u32 4294901760, %v7019_v19  ;;  %v7049_v12 = vsub.f32 %v2371_v6, %v7021_v38  ;;  %4846 = vmatpush3.msra.mxu1 %v7021_v38  ;;  %4877 = vmatprep.subr.mxu0 %v7027_v26  ;;  %v7056_v28 = vand.u32 4294901760, %v2705_v27  ;;  %v2369_v6 = vld [vmem:[%s7821_s11 + $0x10] sm:$0xff] }
 0x321   :  { %8265 = vst [vmem:[#allocation57_spill] sm:$0xff] %v7016_v37  ;;  %8266 = vst [vmem:[#allocation58_spill] sm:$0xff] %v7019_v19  ;;  %v2712_v17 = vsub.f32 %v7007_v10, %v7032_v20  ;;  %v7061_v37 = vand.u32 4294901760, %v7035_v15  ;;  %4878 = vmatpush3.msra.mxu0 %v7041_v55  ;;  %v7069_v5 = vand.u32 4294901760, %v2593_v52  ;;  %v2384_v10 = vld [vmem:[%s7821_s11 + $0x88] sm:$0xff]  ;;  %4847 = vmatprep.subr.mxu1 %v7063_v4 }
 0x322   :  { %8267 = vst [vmem:[#allocation59_spill] sm:$0xff] %v7021_v38  ;;  %8268 = vst [vmem:[#allocation60_spill] sm:$0xff] %v7027_v26  ;;  %v2600_v27 = vsub.f32 %v7019_v19, %v7046_v24  ;;  %v7074_v26 = vand.u32 4294901760, %v7049_v12  ;;  %4879 = vmatprep.subr.mxu0 %v7056_v28  ;;  %v2368_v19 = vld [vmem:[%s7821_s11 + $0x8] sm:$0xff] }
 0x323   :  { %8269 = vst [vmem:[#allocation61_spill] sm:$0xff] %v7032_v20  ;;  %8270 = vst [vmem:[#allocation62_spill] sm:$0xff] %v7035_v15  ;;  %v7076_v20 = vand.u32 4294901760, %v2370_v58  ;;  %v7082_v63 = vand.u32 4294901760, %v2712_v17  ;;  %v2719_v52 = vsub.f32 %v7035_v15, %v7061_v37  ;;  %4880 = vmatpush3.msra.mxu0 %v7069_v5 }
 0x324   :  { %8271 = vst [vmem:[#allocation63_spill] sm:$0xff] %v7041_v55  ;;  %8272 = vst [vmem:[#allocation64_spill] sm:$0xff] %v7046_v24  ;;  %v7087_v55 = vsub.f32 %v2386_v8, %v7063_v4  ;;  %v7089_v24 = vand.u32 4294901760, %v2385_v56  ;;  %v7096_v51 = vand.u32 4294901760, %v2600_v27  ;;  %v2607_v17 = vsub.f32 %v7049_v12, %v7074_v26 }
 0x325   :  { %8273 = vst [vmem:[#allocation65_spill] sm:$0xff] %v7049_v12  ;;  %8274 = vst [vmem:[#allocation66_spill] sm:$0xff] %v7056_v28  ;;  %v7101_v28 = vsub.f32 %v2370_v58, %v7076_v20  ;;  %v7103_v8 = vand.u32 4294901760, %v2369_v6  ;;  %4848 = vmatpush3.msra.mxu1 %v7076_v20  ;;  %4881 = vmatprep.subr.mxu0 %v7082_v63  ;;  %v7110_v15 = vand.u32 4294901760, %v2719_v52  ;;  %v7118_v58 = vand.u32 4294901760, %v2384_v10 }
 0x326   :  { %8275 = vst [vmem:[#allocation67_spill] sm:$0xff] %v7061_v37  ;;  %8276 = vst [vmem:[#allocation68_spill] sm:$0xff] %v7063_v4  ;;  %v2383_v37 = vld [vmem:[%s7821_s11 + $0x80] sm:$0xff]  ;;  %v7113_v27 = vand.u32 4294901760, %v7087_v55  ;;  %4849 = vmatprep.subr.mxu1 %v7089_v24  ;;  %4882 = vmatpush3.msra.mxu0 %v7096_v51  ;;  %v7125_v12 = vand.u32 4294901760, %v2607_v17 }
 0x327   :  { %8277 = vst [vmem:[#allocation69_spill] sm:$0xff] %v7069_v5  ;;  %8278 = vst [vmem:[#allocation70_spill] sm:$0xff] %v7074_v26  ;;  %v7116_v5 = vsub.f32 %v2385_v56, %v7089_v24  ;;  %v2367_v26 = vld [vmem:[%s7821_s11] sm:$0xff]  ;;  %v7128_v52 = vand.u32 4294901760, %v7101_v28  ;;  %v7133_v56 = vand.u32 4294901760, %v2368_v19  ;;  %4850 = vmatpush3.msra.mxu1 %v7103_v8  ;;  %4883 = vmatprep.subr.mxu0 %v7110_v15 }
 0x328   :  { %8279 = vst [vmem:[#allocation71_spill] sm:$0xff] %v7076_v20  ;;  %8280 = vst [vmem:[#allocation72_spill] sm:$0xff] %v7082_v63  ;;  %v7131_v63 = vsub.f32 %v2369_v6, %v7103_v8  ;;  %v2726_v20 = vsub.f32 %v7087_v55, %v7113_v27  ;;  %v7143_v17 = vsub.f32 %v2384_v10, %v7118_v58  ;;  %4851 = vmatprep.subr.mxu1 %v7118_v58 }
 0x329   :  { %8281 = vst [vmem:[#allocation73_spill] sm:$0xff] %v7087_v55  ;;  %8282 = vst [vmem:[#allocation74_spill] sm:$0xff] %v7089_v24  ;;  %v7140_v24 = vand.u32 4294901760, %v7116_v5  ;;  %4884 = vmatpush3.msra.mxu0 %v7125_v12  ;;  %v2614_v6 = vsub.f32 %v7101_v28, %v7128_v52  ;;  %v7157_v55 = vand.u32 4294901760, %v2367_v26  ;;  %4852 = vmatpush3.msra.mxu1 %v7133_v56 }
 0x32a   :  { %8283 = vst [vmem:[#allocation75_spill] sm:$0xff] %v7096_v51  ;;  %8284 = vst [vmem:[#allocation76_spill] sm:$0xff] %v7101_v28  ;;  %v7145_v51 = vand.u32 4294901760, %v2383_v37  ;;  %v7160_v10 = vand.u32 4294901760, %v2726_v20 }
 0x32b   :  { %8285 = vst [vmem:[#allocation77_spill] sm:$0xff] %v7103_v8  ;;  %8286 = vst [vmem:[#allocation78_spill] sm:$0xff] %v7110_v15  ;;  %v7152_v15 = vand.u32 4294901760, %v7131_v63  ;;  %v7171_v28 = vand.u32 4294901760, %v2614_v6  ;;  %v7179_v20 = vsub.f32 %v2367_v26, %v7157_v55 }
 0x32c   :  { %8287 = vst [vmem:[#allocation79_spill] sm:$0xff] %v7113_v27  ;;  %8288 = vst [vmem:[#allocation80_spill] sm:$0xff] %v7116_v5  ;;  %v7155_v27 = vsub.f32 %v2368_v19, %v7133_v56  ;;  %4853 = vmatprep.subr.mxu1 %v7145_v51  ;;  %4885 = vmatprep.subr.mxu0 %v7160_v10 }
 0x32d   :  { %8289 = vst [vmem:[#allocation81_spill] sm:$0xff] %v7118_v58  ;;  %8290 = vst [vmem:[#allocation82_spill] sm:$0xff] %v7125_v12  ;;  %v2733_v58 = vsub.f32 %v7116_v5, %v7140_v24  ;;  %v7165_v12 = vand.u32 4294901760, %v7143_v17  ;;  %v2621_v19 = vsub.f32 %v7131_v63, %v7152_v15  ;;  %4854 = vmatpush3.msra.mxu1 %v7157_v55  ;;  %4886 = vmatpush3.msra.mxu0 %v7171_v28 }
 0x32e   :  { %8291 = vst [vmem:[#allocation83_spill] sm:$0xff] %v7128_v52  ;;  %8292 = vst [vmem:[#allocation84_spill] sm:$0xff] %v7131_v63  ;;  %v7168_v52 = vsub.f32 %v2383_v37, %v7145_v51  ;;  %4899 = vmatprep.subr.mxu1 %v6686_v41  ;;  %v7197_v63 = vand.u32 4294901760, %v7179_v20 }
 0x32f   :  { %8293 = vst [vmem:[#allocation85_spill] sm:$0xff] %v7133_v56  ;;  %8294 = vst [vmem:[#allocation86_spill] sm:$0xff] %v7140_v24  ;;  %v7176_v56 = vand.u32 4294901760, %v7155_v27  ;;  %v7183_v24 = vand.u32 4294901760, %v2733_v58  ;;  %v2740_v37 = vsub.f32 %v7143_v17, %v7165_v12 }
 0x330   :  { %8295 = vst [vmem:[#allocation87_spill] sm:$0xff] %v7143_v17  ;;  %8296 = vst [vmem:[#allocation88_spill] sm:$0xff] %v7145_v51  ;;  %v7188_v6 = vand.u32 4294901760, %v7168_v52 }
 0x331   :  { %8297 = vst [vmem:[#allocation89_spill] sm:$0xff] %v7152_v15  ;;  %8298 = vst [vmem:[#allocation90_spill] sm:$0xff] %v7155_v27  ;;  %v7192_v15 = vand.u32 4294901760, %v2621_v19  ;;  %v2628_v26 = vsub.f32 %v7155_v27, %v7176_v56  ;;  %4887 = vmatprep.subr.mxu0 %v7183_v24  ;;  %v7200_v58 = vand.u32 4294901760, %v2740_v37  ;;  %v2635_v19 = vsub.f32 %v7179_v20, %v7197_v63 }
 0x332   :  { %8299 = vst [vmem:[#allocation91_spill] sm:$0xff] %v7157_v55  ;;  %8300 = vst [vmem:[#allocation92_spill] sm:$0xff] %v7160_v10  ;;  %v2747_v10 = vsub.f32 %v7168_v52, %v7188_v6 }
 0x333   :  { %8301 = vst [vmem:[#allocation93_spill] sm:$0xff] %v7165_v12  ;;  %8302 = vst [vmem:[#allocation94_spill] sm:$0xff] %v7168_v52  ;;  %4888 = vmatpush3.msra.mxu0 %v7192_v15  ;;  %v7205_v41 = vand.u32 4294901760, %v2628_v26 }
 0x334   :  { %8303 = vst [vmem:[#allocation95_spill] sm:$0xff] %v7171_v28  ;;  %8304 = vst [vmem:[#allocation96_spill] sm:$0xff] %v7176_v56  ;;  %4889 = vmatprep.subr.mxu0 %v7200_v58  ;;  %v7210_v28 = vand.u32 4294901760, %v2747_v10  ;;  %v7213_v56 = vand.u32 4294901760, %v2635_v19  ;;  %v8315_v19 = vcombine.low %v6370_v30, %v6377_v9 }
 0x335   :  { %8305 = vst [vmem:[#allocation97_spill] sm:$0xff] %v7179_v20  ;;  %8306 = vst [vmem:[#allocation98_spill] sm:$0xff] %v7183_v24  ;;  %4890 = vmatpush3.msra.mxu0 %v7205_v41 }
 0x336   :  { %8307 = vst [vmem:[#allocation99_spill] sm:$0xff] %v7188_v6  ;;  %8308 = vst [vmem:[#allocation100_spill] sm:$0xff] %v7192_v15  ;;  %4891 = vmatprep.subr.mxu0 %v7210_v28 }
 0x337   :  { %8309 = vst [vmem:[#allocation101_spill] sm:$0xff] %v7197_v63  ;;  %8310 = vst [vmem:[#allocation102_spill] sm:$0xff] %v7200_v58  ;;  %4892 = vmatpush3.msra.mxu0 %v7213_v56 }
 0x338   :  { %8311 = vst [vmem:[#allocation103_spill] sm:$0xff] %v7205_v41  ;;  %8312 = vst [vmem:[#allocation104_spill] sm:$0xff] %v7210_v28  ;;  %4937 = vmatprep.subr.mxu0 %v6675_v36  ;;  %v8314_v41 = vld [vmem:[#allocation6_spill] sm:$0xff] }
 0x339   :  { %8313 = vst [vmem:[#allocation105_spill] sm:$0xff] %v7213_v56  ;;  %v726_v28 = vrot.slane %v8315_v19, %v8314_v41 }
 0x33b   :  { %v734_v36 = vrot.slane %v726_v28, %v8314_v41  ;;  %v727_v8 = vcombine.high %v726_v28, %v726_v28 }
 0x33d   :  { %v745_v50 = vrot.slane %v734_v36, %v8316_v33  ;;  %v741_v30 = vrot.slane %v727_v8, %v8314_v41 }
 0x3aa   :  { %v1973_v37 = vpop.f32.mrf.mxu0 }
 0x3ac   :  { %v1975_v26 = vpop.f32.mrf.mxu0 }
 0x3ae   :  { %v1980_v15 = vpop.f32.mrf.mxu0 }
 0x3b0   :  { %v1982_v24 = vpop.f32.mrf.mxu0 }
 0x3b2   :  { %v1850_v6 = vpop.f32.mrf.mxu1  ;;  %v2159_v63 = vpop.f32.mrf.mxu0 }
 0x3b3   :  { %v1974_v56 = vadd.f32 %v1973_v37, %v1850_v6  ;;  %v770_v6 = vld [vmem:[%s7815_s5] sm:$0xff] }
 0x3b4   :  { %v1852_v12 = vpop.f32.mrf.mxu1  ;;  %v2161_v58 = vpop.f32.mrf.mxu0 }
 0x3b5   :  { %v1976_v55 = vadd.f32 %v1975_v26, %v1852_v12  ;;  %v8317_v12 = vld [vmem:[#allocation39_spill] sm:$0xff] }
 0x3b8   :  { %v1861_v10 = vpop.f32.mrf.mxu1  ;;  %v2168_v52 = vpop.f32.mrf.mxu0 }
 0x3b9   :  { %v1981_v2 = vadd.f32 %v1980_v15, %v1861_v10 }
 0x3ba   :  { %v1863_v20 = vpop.f32.mrf.mxu1  ;;  %v2170_v17 = vpop.f32.mrf.mxu0 }
 0x3bb   :  { %v1983_v9 = vadd.f32 %v1982_v24, %v1863_v20 }
 0x3be   :  { %v2069_v27 = vpop.f32.mrf.mxu1  ;;  %v2351_v38 = vpop.f32.mrf.mxu0 }
 0x3bf   :  { %v2070_v51 = vadd.f32 %v2069_v27, %v1974_v56  ;;  %v749_v27 = vrot.slane %v734_v36, %v8317_v12 }
 0x3c0   :  { %v2071_v5 = vpop.f32.mrf.mxu1  ;;  %v2353_v28 = vpop.f32.mrf.mxu0 }
 0x3c1   :  { %v2072_v1 = vadd.f32 %v2071_v5, %v1976_v55  ;;  %v2160_v31 = vadd.f32 %v2159_v63, %v2070_v51  ;;  %v771_v55 = vld [vmem:[%s7815_s5 + $0x8] sm:$0xff]  ;;  %v774_v5 = vadd.f32 %v770_v6, %v745_v50  ;;  %v753_v51 = vrot.slane %v741_v30, %v8316_v33 }
 0x3c2   :  { %v2077_v4 = vpop.f32.mrf.mxu1  ;;  %v775_v20 = vadd.f32 %v771_v55, %v749_v27  ;;  %v757_v50 = vrot.slane %v741_v30, %v8317_v12  ;;  %v8337_v12 = vld [vmem:[#allocation62_spill] sm:$0xff]  ;;  %v8338_v33 = vld [vmem:[#allocation88_spill] sm:$0xff] }
 0x3c3   :  { %v2078_v23 = vadd.f32 %v2077_v4, %v1981_v2  ;;  %v2162_v15 = vadd.f32 %v2161_v58, %v2072_v1  ;;  %v2358_v8 = vpop.f32.mrf.mxu0  ;;  %v772_v1 = vld [vmem:[%s7815_s5 + $0x10] sm:$0xff] }
 0x3c4   :  { %v2079_v57 = vpop.f32.mrf.mxu1  ;;  %v776_v19 = vadd.f32 %v772_v1, %v753_v51 }
 0x3c5   :  { %v2080_v26 = vadd.f32 %v2079_v57, %v1983_v9  ;;  %v2169_v24 = vadd.f32 %v2168_v52, %v2078_v23  ;;  %v773_v52 = vld [vmem:[%s7815_s5 + $0x18] sm:$0xff] }
 0x3c6   :  { %v2264_v37 = vpop.f32.mrf.mxu1  ;;  %v777_v30 = vadd.f32 %v773_v52, %v757_v50  ;;  %v8318_v52 = vld [vmem:[#allocation49_spill] sm:$0xff] }
 0x3c7   :  { %v2265_v56 = vadd.f32 %v2264_v37, %v2160_v31  ;;  %v2360_v37 = vpop.f32.mrf.mxu0 }
 0x3c8   :  { %v2266_v4 = vpop.f32.mrf.mxu1 }
 0x3c9   :  { %v7232_v63 = vadd.f32 %v2351_v38, %v2265_v56  ;;  %v2267_v41 = vadd.f32 %v2266_v4, %v2162_v15  ;;  %v2171_v38 = vadd.f32 %v2170_v17, %v2080_v26 }
 0x3ca   :  { %v2271_v2 = vpop.f32.mrf.mxu1 }
 0x3cb   :  { %v2363_v36 = vmul.f32 %v7232_v63, %v774_v5  ;;  %v7236_v31 = vadd.f32 %v2353_v28, %v2267_v41  ;;  %v2272_v57 = vadd.f32 %v2271_v2, %v2169_v24 }
 0x3cc   :  { %v2273_v58 = vpop.f32.mrf.mxu1 }
 0x3cd   :  { %v7242_v10 = vand.u32 4294901760, %v2363_v36  ;;  %v2364_v23 = vmul.f32 %v7236_v31, %v775_v20  ;;  %v7248_v9 = vadd.f32 %v2358_v8, %v2272_v57  ;;  %v2274_v6 = vadd.f32 %v2273_v58, %v2171_v38 }
 0x3cf   :  { %v7251_v27 = vsub.f32 %v2363_v36, %v7242_v10  ;;  %v7253_v28 = vand.u32 4294901760, %v2364_v23  ;;  %v2365_v17 = vmul.f32 %v7248_v9, %v776_v19  ;;  %v7256_v56 = vadd.f32 %v2360_v37, %v2274_v6  ;;  %v8319_v19 = vld [vmem:[#allocation35_spill] sm:$0xff]  ;;  %v8320_v6 = vld [vmem:[#allocation53_spill] sm:$0xff]  ;;  %v8321_v37 = vld [vmem:[#allocation28_spill] sm:$0xff] }
 0x3d1   :  { %v8095_v15 = vand.u32 4294901760, %v7251_v27  ;;  %2751 = vmatprep.mubr.f32.mxu0 %v7253_v28  ;;  %v2496_v26 = vsub.f32 %v2364_v23, %v7253_v28  ;;  %v2366_v55 = vmul.f32 %v7256_v56, %v777_v30  ;;  %v7263_v4 = vand.u32 4294901760, %v2365_v17  ;;  %v8323_v30 = vld [vmem:[#allocation20_spill] sm:$0xff] }
 0x3d2   :  { %2753 = vmatmul.mubr.f32.vlgmr.msra.gmra.mxu0 %v7242_v10 }
 0x3d3   :  { %4938 = vmatpush3.msra.mxu0 %v6680_v45  ;;  %v2497_v5 = vand.u32 4294901760, %v2496_v26  ;;  %v7267_v41 = vand.u32 4294901760, %v2366_v55  ;;  %v2504_v24 = vsub.f32 %v7251_v27, %v8095_v15  ;;  %v7273_v51 = vsub.f32 %v2365_v17, %v7263_v4  ;;  %v8322_v17 = vld [vmem:[#allocation56_spill] sm:$0xff]  ;;  %v8336_v15 = vld [vmem:[#allocation85_spill] sm:$0xff] }
 0x3d4   :  { %4939 = vmatprep.subr.mxu0 %v6688_v54 }
 0x3d5   :  { %4940 = vmatpush3.msra.mxu0 %v6697_v7  ;;  %v2498_v2 = vsub.f32 %v2496_v26, %v2497_v5  ;;  %2758 = vmatprep.mubr.f32.mxu0 %v7267_v41  ;;  %v7279_v8 = vsub.f32 %v2366_v55, %v7267_v41  ;;  %v8094_v36 = vand.u32 4294901760, %v7273_v51  ;;  %v2505_v1 = vand.u32 4294901760, %v2504_v24  ;;  %v8325_v55 = vld [vmem:[#allocation43_spill] sm:$0xff]  ;;  %v8327_v24 = vld [vmem:[#allocation45_spill] sm:$0xff] }
 0x3d6   :  { %4941 = vmatprep.subr.mxu0 %v6709_v42  ;;  %2760 = vmatmul.mubr.f32.gmra.mxu0 %v7263_v4 }
 0x3d7   :  { %v2499_v20 = vand.u32 4294901760, %v2498_v2  ;;  %4942 = vmatpush3.msra.mxu0 %v6721_v16  ;;  %3011 = vmatprep.mubr.f32.mxu0 %v2497_v5  ;;  %v2512_v57 = vand.u32 4294901760, %v7279_v8  ;;  %v2519_v38 = vsub.f32 %v7273_v51, %v8094_v36  ;;  %v8326_v5 = vld [vmem:[#allocation68_spill] sm:$0xff]  ;;  %v8328_v2 = vld [vmem:[#allocation71_spill] sm:$0xff]  ;;  %v8335_v36 = vld [vmem:[#allocation58_spill] sm:$0xff] }
 0x3d8   :  { %4943 = vmatprep.subr.mxu0 %v6735_v34 }
 0x3d9   :  { %2500 = vmatprep.mubr.f32.mxu1 %v2499_v20  ;;  %4944 = vmatpush3.msra.mxu0 %v6749_v62  ;;  %v2513_v50 = vsub.f32 %v7279_v8, %v2512_v57  ;;  %v2520_v23 = vand.u32 4294901760, %v2519_v38  ;;  %v8329_v20 = vld [vmem:[#allocation48_spill] sm:$0xff]  ;;  %v8332_v38 = vld [vmem:[#allocation77_spill] sm:$0xff] }
 0x3da   :  { %2506 = vmatmul.mubr.f32.vlgmr.msra.gmra.mxu1 %v2505_v1  ;;  %4945 = vmatprep.subr.mxu0 %v6791_v59  ;;  %v8330_v1 = vld [vmem:[#allocation74_spill] sm:$0xff] }
 0x3db   :  { %4900 = vmatpush3.msra.mxu1 %v6695_v53  ;;  %4946 = vmatpush3.msra.mxu0 %v6804_v32  ;;  %v2514_v58 = vand.u32 4294901760, %v2513_v50  ;;  %v8331_v50 = vld [vmem:[#allocation52_spill] sm:$0xff] }
 0x3dc   :  { %4901 = vmatprep.subr.mxu1 %v6707_v44  ;;  %4947 = vmatprep.subr.mxu0 %v6817_v18 }
 0x3dd   :  { %4902 = vmatpush3.msra.mxu1 %v6719_v14  ;;  %4948 = vmatpush3.msra.mxu0 %v6831_v47 }
 0x3de   :  { %2515 = vmatprep.mubr.f32.mxu1 %v2514_v58  ;;  %4903 = vmatprep.subr.mxu1 %v6733_v25  ;;  %v8333_v58 = vld [vmem:[#allocation55_spill] sm:$0xff] }
 0x3df   :  { %4949 = vmatprep.subr.mxu0 %v6846_v49  ;;  %2521 = vmatmul.mubr.f32.gmra.mxu1 %v2520_v23  ;;  %v8334_v23 = vld [vmem:[#allocation81_spill] sm:$0xff] }
 0x3e0   :  { %4950 = vmatpush3.msra.mxu0 %v6861_v61  ;;  %4904 = vmatpush3.msra.mxu1 %v6747_v60 }
 0x3e1   :  { %2895 = vmatprep.mubr.f32.mxu1 %v2496_v26  ;;  %4905 = vmatprep.subr.mxu1 %v6763_v21  ;;  %v8324_v26 = vld [vmem:[#allocation59_spill] sm:$0xff] }
 0x3e2   :  { %4951 = vmatprep.subr.mxu0 %v6873_v0  ;;  %4906 = vmatpush3.msra.mxu1 %v6777_v35 }
 0x3e3   :  { %4952 = vmatpush3.msra.mxu0 %v6885_v43  ;;  %4907 = vmatprep.subr.mxu1 %v6815_v13 }
 0x3e4   :  { %4953 = vmatprep.subr.mxu0 %v6927_v3  ;;  %4908 = vmatpush3.msra.mxu1 %v6829_v40 }
 0x3e5   :  { %4954 = vmatpush3.msra.mxu0 %v6940_v46  ;;  %4909 = vmatprep.subr.mxu1 %v6844_v48 }
 0x3e6   :  { %4955 = vmatprep.subr.mxu0 %v6953_v22  ;;  %4910 = vmatpush3.msra.mxu1 %v6859_v11 }
 0x3e7   :  { %4956 = vmatpush3.msra.mxu0 %v6967_v29  ;;  %4911 = vmatprep.subr.mxu1 %v6871_v39 }
 0x3e8   :  { %4957 = vmatprep.subr.mxu0 %v8318_v52  ;;  %4912 = vmatpush3.msra.mxu1 %v8319_v19 }
 0x3e9   :  { %4958 = vmatpush3.msra.mxu0 %v8320_v6  ;;  %4913 = vmatprep.subr.mxu1 %v8321_v37 }
 0x3ea   :  { %4959 = vmatprep.subr.mxu0 %v8322_v17  ;;  %4914 = vmatpush3.msra.mxu1 %v8323_v30  ;;  %v8344_v30 = vld [vmem:[#allocation76_spill] sm:$0xff] }
 0x3eb   :  { %4960 = vmatpush3.msra.mxu0 %v8324_v26  ;;  %4915 = vmatprep.subr.mxu1 %v8325_v55  ;;  %v8341_v55 = vld [vmem:[#allocation73_spill] sm:$0xff] }
 0x3ec   :  { %4961 = vmatprep.subr.mxu0 %v8326_v5  ;;  %4916 = vmatpush3.msra.mxu1 %v8327_v24  ;;  %v8339_v24 = vld [vmem:[#allocation65_spill] sm:$0xff] }
 0x3ed   :  { %4962 = vmatpush3.msra.mxu0 %v8328_v2  ;;  %4917 = vmatprep.subr.mxu1 %v8329_v20  ;;  %v8340_v20 = vld [vmem:[#allocation91_spill] sm:$0xff] }
 0x3ee   :  { %4963 = vmatprep.subr.mxu0 %v8330_v1  ;;  %4918 = vmatpush3.msra.mxu1 %v8331_v50  ;;  %v8342_v50 = vand.u32 4294901760, %v7251_v27 }
 0x3ef   :  { %4964 = vmatpush3.msra.mxu0 %v8332_v38  ;;  %4919 = vmatprep.subr.mxu1 %v8333_v58  ;;  %v8343_v58 = vld [vmem:[#allocation9_spill] sm:$0xff] }
 0x3f0   :  { %4965 = vmatprep.subr.mxu0 %v8334_v23  ;;  %4920 = vmatpush3.msra.mxu1 %v8335_v36  ;;  %v8345_v36 = vld [vmem:[#allocation80_spill] sm:$0xff] }
 0x3f1   :  { %4966 = vmatpush3.msra.mxu0 %v8336_v15  ;;  %4921 = vmatprep.subr.mxu1 %v8337_v12  ;;  %v8346_v12 = vld [vmem:[#allocation84_spill] sm:$0xff] }
 0x3f2   :  { %4967 = vmatprep.subr.mxu0 %v8338_v33  ;;  %4922 = vmatpush3.msra.mxu1 %v8339_v24  ;;  %v8347_v24 = vld [vmem:[#allocation87_spill] sm:$0xff] }
 0x3f3   :  { %4968 = vmatpush3.msra.mxu0 %v8340_v20  ;;  %4923 = vmatprep.subr.mxu1 %v8341_v55  ;;  %v8348_v55 = vand.u32 4294901760, %v7273_v51 }
 0x3f4   :  { %3015 = vmatmul.mubr.f32.vlgmr.msra.gmra.mxu0 %v8342_v50  ;;  %5013 = vmatprep.subr.mxu0 %v8343_v58  ;;  %v8349_v50 = vld [vmem:[#allocation90_spill] sm:$0xff] }
 0x3f5   :  { %4924 = vmatpush3.msra.mxu1 %v8344_v30  ;;  %3022 = vmatprep.mubr.f32.mxu0 %v2512_v57  ;;  %v8350_v57 = vld [vmem:[#allocation94_spill] sm:$0xff] }
 0x3f6   :  { %5014 = vmatpush3.msra.mxu0 %v6680_v45  ;;  %4925 = vmatprep.subr.mxu1 %v8345_v36  ;;  %v8384_v36 = vld [vmem:[#allocation93_spill] sm:$0xff] }
 0x3f7   :  { %5015 = vmatprep.subr.mxu0 %v6688_v54  ;;  %4926 = vmatpush3.msra.mxu1 %v8346_v12  ;;  %v8351_v12 = vld [vmem:[#allocation97_spill] sm:$0xff] }
 0x3f8   :  { %5016 = vmatpush3.msra.mxu0 %v6697_v7  ;;  %4927 = vmatprep.subr.mxu1 %v8347_v24  ;;  %v8352_v24 = vld [vmem:[#allocation10_spill] sm:$0xff] }
 0x3f9   :  { %3026 = vmatmul.mubr.f32.gmra.mxu0 %v8348_v55  ;;  %5017 = vmatprep.subr.mxu0 %v6709_v42  ;;  %v8353_v55 = vld [vmem:[#allocation18_spill] sm:$0xff] }
 0x3fa   :  { %4928 = vmatpush3.msra.mxu1 %v8349_v50  ;;  %5018 = vmatpush3.msra.mxu0 %v6721_v16  ;;  %v8354_v50 = vld [vmem:[#allocation11_spill] sm:$0xff] }
 0x3fb   :  { %3303 = vmatprep.mubr.f32.mxu0 %v7253_v28  ;;  %4929 = vmatprep.subr.mxu1 %v8350_v57  ;;  %v8355_v57 = vld [vmem:[#allocation19_spill] sm:$0xff] }
 0x3fc   :  { %5019 = vmatprep.subr.mxu0 %v6735_v34  ;;  %4930 = vmatpush3.msra.mxu1 %v8351_v12  ;;  %v8382_v12 = vld [vmem:[#allocation89_spill] sm:$0xff] }
 0x3fd   :  { %5020 = vmatpush3.msra.mxu0 %v6749_v62  ;;  %2898 = vmatmul.mubr.f32.vlgmr.msra.gmra.mxu1 %v7251_v27  ;;  %v8356_v27 = vld [vmem:[#allocation37_spill] sm:$0xff] }
 0x3fe   :  { %4975 = vmatprep.subr.mxu1 %v8352_v24  ;;  %5021 = vmatprep.subr.mxu0 %v6791_v59  ;;  %v8357_v24 = vld [vmem:[#allocation13_spill] sm:$0xff] }
 0x3ff   :  { %2904 = vmatprep.mubr.f32.mxu1 %v7279_v8  ;;  %4976 = vmatpush3.msra.mxu1 %v8353_v55  ;;  %v8358_v8 = vld [vmem:[#allocation14_spill] sm:$0xff] }
 0x400   :  { %5022 = vmatpush3.msra.mxu0 %v6804_v32  ;;  %4977 = vmatprep.subr.mxu1 %v8354_v50  ;;  %v8359_v50 = vld [vmem:[#allocation15_spill] sm:$0xff]  ;;  %v8380_v55 = vld [vmem:[#allocation86_spill] sm:$0xff] }
 0x401   :  { %5023 = vmatprep.subr.mxu0 %v6817_v18  ;;  %4978 = vmatpush3.msra.mxu1 %v8355_v57  ;;  %v8360_v57 = vld [vmem:[#allocation25_spill] sm:$0xff] }
 0x402   :  { %5024 = vmatpush3.msra.mxu0 %v6831_v47  ;;  %2907 = vmatmul.mubr.f32.gmra.mxu1 %v7273_v51  ;;  %v8361_v51 = vld [vmem:[#allocation29_spill] sm:$0xff] }
 0x403   :  { %4979 = vmatprep.subr.mxu1 %v8356_v27  ;;  %5025 = vmatprep.subr.mxu0 %v6846_v49 }
 0x404   :  { %4980 = vmatpush3.msra.mxu1 %v8357_v24  ;;  %3192 = vmatprep.mubr.f32.mxu1 %v7253_v28  ;;  %v8362_v24 = vld [vmem:[#allocation30_spill] sm:$0xff]  ;;  %v8363_v28 = vld [vmem:[#allocation32_spill] sm:$0xff] }
 0x405   :  { %5026 = vmatpush3.msra.mxu0 %v6861_v61  ;;  %4981 = vmatprep.subr.mxu1 %v8358_v8  ;;  %v8364_v8 = vld [vmem:[#allocation8_spill] sm:$0xff] }
 0x406   :  { %5027 = vmatprep.subr.mxu0 %v6873_v0  ;;  %4982 = vmatpush3.msra.mxu1 %v8359_v50  ;;  %v8365_v50 = vld [vmem:[#allocation31_spill] sm:$0xff] }
 0x407   :  { %5028 = vmatpush3.msra.mxu0 %v6885_v43  ;;  %4983 = vmatprep.subr.mxu1 %v8360_v57  ;;  %v8366_v57 = vld [vmem:[#allocation22_spill] sm:$0xff] }
 0x408   :  { %5029 = vmatprep.subr.mxu0 %v6927_v3  ;;  %4984 = vmatpush3.msra.mxu1 %v8361_v51  ;;  %v8367_v51 = vld [vmem:[#allocation41_spill] sm:$0xff] }
 0x409   :  { %5030 = vmatpush3.msra.mxu0 %v6940_v46  ;;  %4985 = vmatprep.subr.mxu1 %v8362_v24  ;;  %v8368_v24 = vld [vmem:[#allocation47_spill] sm:$0xff] }
 0x40a   :  { %5031 = vmatprep.subr.mxu0 %v6953_v22  ;;  %4986 = vmatpush3.msra.mxu1 %v8363_v28  ;;  %v8369_v28 = vld [vmem:[#allocation51_spill] sm:$0xff] }
 0x40b   :  { %5032 = vmatpush3.msra.mxu0 %v6967_v29  ;;  %4987 = vmatprep.subr.mxu1 %v8364_v8  ;;  %v8370_v8 = vld [vmem:[#allocation54_spill] sm:$0xff] }
 0x40c   :  { %5033 = vmatprep.subr.mxu0 %v8318_v52  ;;  %4988 = vmatpush3.msra.mxu1 %v8365_v50  ;;  %v8371_v50 = vld [vmem:[#allocation57_spill] sm:$0xff] }
 0x40d   :  { %5034 = vmatpush3.msra.mxu0 %v8320_v6  ;;  %4989 = vmatprep.subr.mxu1 %v8366_v57  ;;  %v8372_v57 = vld [vmem:[#allocation61_spill] sm:$0xff] }
 0x40e   :  { %5035 = vmatprep.subr.mxu0 %v8322_v17  ;;  %4990 = vmatpush3.msra.mxu1 %v8367_v51  ;;  %v8373_v51 = vld [vmem:[#allocation64_spill] sm:$0xff] }
 0x40f   :  { %5036 = vmatpush3.msra.mxu0 %v8324_v26  ;;  %4991 = vmatprep.subr.mxu1 %v8368_v24  ;;  %v8374_v24 = vld [vmem:[#allocation67_spill] sm:$0xff] }
 0x410   :  { %5037 = vmatprep.subr.mxu0 %v8326_v5  ;;  %4992 = vmatpush3.msra.mxu1 %v8369_v28  ;;  %v8375_v28 = vld [vmem:[#allocation70_spill] sm:$0xff] }
 0x411   :  { %5038 = vmatpush3.msra.mxu0 %v8328_v2  ;;  %4993 = vmatprep.subr.mxu1 %v8370_v8  ;;  %v7410_v8 = vand.u32 4294901760, %v7236_v31 }
 0x412   :  { %5039 = vmatprep.subr.mxu0 %v8330_v1  ;;  %4994 = vmatpush3.msra.mxu1 %v8371_v50  ;;  %v8376_v50 = vld [vmem:[#allocation79_spill] sm:$0xff] }
 0x413   :  { %5040 = vmatpush3.msra.mxu0 %v8332_v38  ;;  %4995 = vmatprep.subr.mxu1 %v8372_v57  ;;  %v8377_v57 = vld [vmem:[#allocation12_spill] sm:$0xff]  ;;  %v7422_v27 = vsub.f32 %v7236_v31, %v7410_v8 }
 0x414   :  { %5041 = vmatprep.subr.mxu0 %v8334_v23  ;;  %4996 = vmatpush3.msra.mxu1 %v8373_v51  ;;  %v8378_v51 = vld [vmem:[#allocation83_spill] sm:$0xff] }
 0x415   :  { %5042 = vmatpush3.msra.mxu0 %v8336_v15  ;;  %4997 = vmatprep.subr.mxu1 %v8374_v24  ;;  %v8379_v24 = vld [vmem:[#allocation21_spill] sm:$0xff]  ;;  %v3415_v31 = vand.u32 4294901760, %v7422_v27 }
 0x416   :  { %5043 = vmatprep.subr.mxu0 %v8338_v33  ;;  %4998 = vmatpush3.msra.mxu1 %v8375_v28  ;;  %v8381_v28 = vld [vmem:[#allocation24_spill] sm:$0xff] }
 0x417   :  { %5044 = vmatpush3.msra.mxu0 %v8340_v20  ;;  %4999 = vmatprep.subr.mxu1 %v8376_v50  ;;  %v8383_v50 = vld [vmem:[#allocation26_spill] sm:$0xff] }
 0x418   :  { %3305 = vmatmul.mubr.f32.vlgmr.msra.gmra.mxu0 %v7242_v10  ;;  %5089 = vmatprep.subr.mxu0 %v8377_v57  ;;  %v8385_v57 = vld [vmem:[#allocation34_spill] sm:$0xff] }
 0x419   :  { %5000 = vmatpush3.msra.mxu1 %v8378_v51  ;;  %3310 = vmatprep.mubr.f32.mxu0 %v7267_v41  ;;  %v8386_v51 = vld [vmem:[#allocation96_spill] sm:$0xff] }
 0x41a   :  { %5090 = vmatpush3.msra.mxu0 %v8379_v24  ;;  %5001 = vmatprep.subr.mxu1 %v8380_v55  ;;  %v8387_v24 = vld [vmem:[#allocation23_spill] sm:$0xff] }
 0x41b   :  { %5091 = vmatprep.subr.mxu0 %v8381_v28  ;;  %5002 = vmatpush3.msra.mxu1 %v8382_v12  ;;  %v8388_v55 = vld [vmem:[#allocation99_spill] sm:$0xff]  ;;  %v8390_v12 = vld [vmem:[#allocation101_spill] sm:$0xff] }
 0x41c   :  { %5092 = vmatpush3.msra.mxu0 %v8383_v50  ;;  %5003 = vmatprep.subr.mxu1 %v8384_v36  ;;  %v8389_v28 = vld [vmem:[#allocation7_spill] sm:$0xff] }
 0x41d   :  { %3312 = vmatmul.mubr.f32.gmra.mxu0 %v7263_v4  ;;  %5093 = vmatprep.subr.mxu0 %v8385_v57  ;;  %v8391_v50 = vld [vmem:[#allocation27_spill] sm:$0xff]  ;;  %v8392_v57 = vld [vmem:[#allocation36_spill] sm:$0xff] }
 0x41e   :  { %5004 = vmatpush3.msra.mxu1 %v8386_v51  ;;  %5094 = vmatpush3.msra.mxu0 %v8387_v24  ;;  %v3416_v24 = vsub.f32 %v7422_v27, %v3415_v31  ;;  %v8416_v51 = vld [vmem:[#allocation17_spill] sm:$0xff] }
 0x41f   :  { %3669 = vmatprep.mubr.f32.mxu0 %v7410_v8  ;;  %5005 = vmatprep.subr.mxu1 %v8388_v55  ;;  %v8393_v55 = vld [vmem:[#allocation16_spill] sm:$0xff] }
 0x420   :  { %5095 = vmatprep.subr.mxu0 %v8389_v28  ;;  %5006 = vmatpush3.msra.mxu1 %v8390_v12  ;;  %v8394_v28 = vld [vmem:[#allocation33_spill] sm:$0xff] }
 0x421   :  { %5096 = vmatpush3.msra.mxu0 %v8391_v50  ;;  %3194 = vmatmul.mubr.f32.vlgmr.msra.gmra.mxu1 %v7242_v10  ;;  %v8395_v10 = vld [vmem:[#allocation40_spill] sm:$0xff]  ;;  %v8396_v50 = vld [vmem:[#allocation42_spill] sm:$0xff] }
 0x422   :  { %5051 = vmatprep.subr.mxu1 %v8343_v58  ;;  %5097 = vmatprep.subr.mxu0 %v8392_v57  ;;  %v8397_v57 = vld [vmem:[#allocation44_spill] sm:$0xff] }
 0x423   :  { %3199 = vmatprep.mubr.f32.mxu1 %v7267_v41  ;;  %5052 = vmatpush3.msra.mxu1 %v6680_v45  ;;  %v3417_v41 = vand.u32 4294901760, %v3416_v24  ;;  %v8401_v24 = vld [vmem:[#allocation63_spill] sm:$0xff] }
 0x424   :  { %5098 = vmatpush3.msra.mxu0 %v8393_v55  ;;  %5053 = vmatprep.subr.mxu1 %v6688_v54  ;;  %v8398_v55 = vld [vmem:[#allocation46_spill] sm:$0xff] }
 0x425   :  { %5099 = vmatprep.subr.mxu0 %v8394_v28  ;;  %5054 = vmatpush3.msra.mxu1 %v6697_v7  ;;  %v8399_v28 = vld [vmem:[#allocation50_spill] sm:$0xff] }
 0x426   :  { %5100 = vmatpush3.msra.mxu0 %v8395_v10  ;;  %3201 = vmatmul.mubr.f32.gmra.mxu1 %v7263_v4  ;;  %v8400_v4 = vld [vmem:[#allocation60_spill] sm:$0xff]  ;;  %v8402_v10 = vld [vmem:[#allocation66_spill] sm:$0xff] }
 0x427   :  { %5055 = vmatprep.subr.mxu1 %v6709_v42  ;;  %5101 = vmatprep.subr.mxu0 %v8396_v50  ;;  %v8404_v50 = vld [vmem:[#allocation72_spill] sm:$0xff] }
 0x428   :  { %5056 = vmatpush3.msra.mxu1 %v6721_v16  ;;  %3418 = vmatprep.mubr.f32.mxu1 %v3417_v41  ;;  %v8403_v41 = vld [vmem:[#allocation69_spill] sm:$0xff] }
 0x429   :  { %5102 = vmatpush3.msra.mxu0 %v8397_v57  ;;  %5057 = vmatprep.subr.mxu1 %v6735_v34  ;;  %v8405_v57 = vld [vmem:[#allocation75_spill] sm:$0xff] }
 0x42a   :  { %5103 = vmatprep.subr.mxu0 %v8398_v55  ;;  %5058 = vmatpush3.msra.mxu1 %v6749_v62  ;;  %v8406_v55 = vld [vmem:[#allocation78_spill] sm:$0xff] }
 0x42b   :  { %5104 = vmatpush3.msra.mxu0 %v8399_v28  ;;  %5059 = vmatprep.subr.mxu1 %v6791_v59  ;;  %v8407_v28 = vld [vmem:[#allocation82_spill] sm:$0xff] }
 0x42c   :  { %5105 = vmatprep.subr.mxu0 %v8400_v4  ;;  %5060 = vmatpush3.msra.mxu1 %v6804_v32  ;;  %v7478_v4 = vand.u32 4294901760, %v7232_v63 }
 0x42d   :  { %5106 = vmatpush3.msra.mxu0 %v8401_v24  ;;  %5061 = vmatprep.subr.mxu1 %v6817_v18  ;;  %v8408_v24 = vld [vmem:[#allocation92_spill] sm:$0xff] }
 0x42e   :  { %5107 = vmatprep.subr.mxu0 %v8402_v10  ;;  %5062 = vmatpush3.msra.mxu1 %v6831_v47  ;;  %v7483_v10 = vand.u32 4294901760, %v7256_v56 }
 0x42f   :  { %5108 = vmatpush3.msra.mxu0 %v8403_v41  ;;  %5063 = vmatprep.subr.mxu1 %v6846_v49  ;;  %v8409_v41 = vld [vmem:[#allocation95_spill] sm:$0xff] }
 0x430   :  { %5109 = vmatprep.subr.mxu0 %v8404_v50  ;;  %5064 = vmatpush3.msra.mxu1 %v6861_v61  ;;  %v8410_v50 = vld [vmem:[#allocation98_spill] sm:$0xff] }
 0x431   :  { %5110 = vmatpush3.msra.mxu0 %v8405_v57  ;;  %5065 = vmatprep.subr.mxu1 %v6873_v0  ;;  %v8411_v57 = vld [vmem:[#allocation100_spill] sm:$0xff] }
 0x432   :  { %5111 = vmatprep.subr.mxu0 %v8406_v55  ;;  %5066 = vmatpush3.msra.mxu1 %v6885_v43  ;;  %v7493_v55 = vsub.f32 %v7232_v63, %v7478_v4  ;;  %v8415_v63 = vld [vmem:[#allocation105_spill] sm:$0xff] }
 0x433   :  { %5112 = vmatpush3.msra.mxu0 %v8407_v28  ;;  %5067 = vmatprep.subr.mxu1 %v6927_v3  ;;  %v8412_v28 = vld [vmem:[#allocation102_spill] sm:$0xff] }
 0x434   :  { %5113 = vmatprep.subr.mxu0 %v8408_v24  ;;  %5068 = vmatpush3.msra.mxu1 %v6940_v46  ;;  %v7498_v24 = vand.u32 4294901760, %v7248_v9 }
 0x435   :  { %5114 = vmatpush3.msra.mxu0 %v8409_v41  ;;  %5069 = vmatprep.subr.mxu1 %v6953_v22  ;;  %v7502_v41 = vsub.f32 %v7256_v56, %v7483_v10 }
 0x436   :  { %5115 = vmatprep.subr.mxu0 %v8410_v50  ;;  %5070 = vmatpush3.msra.mxu1 %v6967_v29  ;;  %v8413_v50 = vld [vmem:[#allocation103_spill] sm:$0xff]  ;;  %v7515_v56 = vsub.f32 %v7248_v9, %v7498_v24 }
 0x437   :  { %5116 = vmatpush3.msra.mxu0 %v8411_v57  ;;  %5071 = vmatprep.subr.mxu1 %v8318_v52  ;;  %v8414_v57 = vld [vmem:[#allocation104_spill] sm:$0xff] }
 0x438   :  { %5117 = vmatprep.subr.mxu0 %v8412_v28  ;;  %5072 = vmatpush3.msra.mxu1 %v8320_v6  ;;  %v8098_v28 = vand.u32 4294901760, %v7493_v55 }
 0x439   :  { %5118 = vmatpush3.msra.mxu0 %v8413_v50  ;;  %5073 = vmatprep.subr.mxu1 %v8322_v17  ;;  %v8099_v50 = vand.u32 4294901760, %v7502_v41 }
 0x43a   :  { %5119 = vmatprep.subr.mxu0 %v8414_v57  ;;  %5074 = vmatpush3.msra.mxu1 %v8324_v26  ;;  %v3422_v57 = vsub.f32 %v7493_v55, %v8098_v28 }
 0x43b   :  { %5120 = vmatpush3.msra.mxu0 %v8415_v63  ;;  %5075 = vmatprep.subr.mxu1 %v8326_v5  ;;  %v3431_v9 = vsub.f32 %v7502_v41, %v8099_v50  ;;  %v3436_v63 = vand.u32 4294901760, %v7515_v56 }
 0x43c   :  { %3671 = vmatmul.mubr.f32.vlgmr.msra.gmra.mxu0 %v7478_v4  ;;  %5165 = vmatprep.subr.mxu0 %v8343_v58  ;;  %v3423_v28 = vand.u32 4294901760, %v3422_v57 }
 0x43d   :  { %5076 = vmatpush3.msra.mxu1 %v8328_v2  ;;  %3676 = vmatprep.mubr.f32.mxu0 %v7483_v10  ;;  %v3432_v50 = vand.u32 4294901760, %v3431_v9  ;;  %v3437_v12 = vsub.f32 %v7515_v56, %v3436_v63 }
 0x43e   :  { %5166 = vmatpush3.msra.mxu0 %v6680_v45  ;;  %5077 = vmatprep.subr.mxu1 %v8330_v1 }
 0x43f   :  { %5167 = vmatprep.subr.mxu0 %v6688_v54  ;;  %5078 = vmatpush3.msra.mxu1 %v8332_v38 }
 0x440   :  { %5168 = vmatpush3.msra.mxu0 %v6697_v7  ;;  %5079 = vmatprep.subr.mxu1 %v8334_v23 }
 0x441   :  { %3678 = vmatmul.mubr.f32.gmra.mxu0 %v7498_v24  ;;  %5169 = vmatprep.subr.mxu0 %v6709_v42 }
 0x442   :  { %5080 = vmatpush3.msra.mxu1 %v8336_v15  ;;  %5170 = vmatpush3.msra.mxu0 %v6721_v16 }
 0x443   :  { %3929 = vmatprep.mubr.f32.mxu0 %v3415_v31  ;;  %5081 = vmatprep.subr.mxu1 %v8338_v33  ;;  %v3438_v31 = vand.u32 4294901760, %v3437_v12  ;;  %v8429_v12 = vld [vmem:[#allocation80_spill] sm:$0xff] }
 0x444   :  { %5171 = vmatprep.subr.mxu0 %v6735_v34  ;;  %5082 = vmatpush3.msra.mxu1 %v8340_v20 }
 0x445   :  { %5172 = vmatpush3.msra.mxu0 %v6749_v62  ;;  %3424 = vmatmul.mubr.f32.vlgmr.msra.gmra.mxu1 %v3423_v28 }
 0x446   :  { %5127 = vmatprep.subr.mxu1 %v8416_v51  ;;  %5173 = vmatprep.subr.mxu0 %v6791_v59 }
 0x447   :  { %3433 = vmatprep.mubr.f32.mxu1 %v3432_v50  ;;  %5128 = vmatpush3.msra.mxu1 %v6695_v53  ;;  %v8417_v53 = vld [vmem:[#allocation20_spill] sm:$0xff] }
 0x448   :  { %5174 = vmatpush3.msra.mxu0 %v6804_v32  ;;  %5129 = vmatprep.subr.mxu1 %v6707_v44  ;;  %v8418_v44 = vld [vmem:[#allocation43_spill] sm:$0xff] }
 0x449   :  { %5175 = vmatprep.subr.mxu0 %v6817_v18  ;;  %5130 = vmatpush3.msra.mxu1 %v6719_v14  ;;  %v8419_v14 = vld [vmem:[#allocation45_spill] sm:$0xff] }
 0x44a   :  { %5176 = vmatpush3.msra.mxu0 %v6831_v47  ;;  %3439 = vmatmul.mubr.f32.gmra.mxu1 %v3438_v31 }
 0x44b   :  { %5131 = vmatprep.subr.mxu1 %v6733_v25  ;;  %5177 = vmatprep.subr.mxu0 %v6846_v49  ;;  %v8420_v25 = vld [vmem:[#allocation48_spill] sm:$0xff] }
 0x44c   :  { %5132 = vmatpush3.msra.mxu1 %v6747_v60  ;;  %3813 = vmatprep.mubr.f32.mxu1 %v7422_v27  ;;  %v8421_v60 = vld [vmem:[#allocation52_spill] sm:$0xff]  ;;  %v8462_v27 = vld [vmem:[#allocation89_spill] sm:$0xff] }
 0x44d   :  { %5178 = vmatpush3.msra.mxu0 %v6861_v61  ;;  %5133 = vmatprep.subr.mxu1 %v6763_v21  ;;  %v8422_v21 = vld [vmem:[#allocation55_spill] sm:$0xff] }
 0x44e   :  { %5179 = vmatprep.subr.mxu0 %v6873_v0  ;;  %5134 = vmatpush3.msra.mxu1 %v6777_v35  ;;  %v8423_v35 = vld [vmem:[#allocation58_spill] sm:$0xff] }
 0x44f   :  { %5180 = vmatpush3.msra.mxu0 %v6885_v43  ;;  %5135 = vmatprep.subr.mxu1 %v6815_v13  ;;  %v8424_v13 = vld [vmem:[#allocation62_spill] sm:$0xff] }
 0x450   :  { %5181 = vmatprep.subr.mxu0 %v6927_v3  ;;  %5136 = vmatpush3.msra.mxu1 %v6829_v40  ;;  %v8425_v40 = vld [vmem:[#allocation65_spill] sm:$0xff] }
 0x451   :  { %5182 = vmatpush3.msra.mxu0 %v6940_v46  ;;  %5137 = vmatprep.subr.mxu1 %v6844_v48  ;;  %v8426_v48 = vld [vmem:[#allocation73_spill] sm:$0xff] }
 0x452   :  { %5183 = vmatprep.subr.mxu0 %v6953_v22  ;;  %5138 = vmatpush3.msra.mxu1 %v6859_v11  ;;  %v8427_v11 = vand.u32 4294901760, %v7493_v55 }
 0x453   :  { %5184 = vmatpush3.msra.mxu0 %v6967_v29  ;;  %5139 = vmatprep.subr.mxu1 %v6871_v39  ;;  %v8428_v39 = vand.u32 4294901760, %v7502_v41 }
 0x454   :  { %5185 = vmatprep.subr.mxu0 %v8318_v52  ;;  %5140 = vmatpush3.msra.mxu1 %v8319_v19  ;;  %v8430_v19 = vld [vmem:[#allocation84_spill] sm:$0xff] }
 0x455   :  { %5186 = vmatpush3.msra.mxu0 %v8320_v6  ;;  %5141 = vmatprep.subr.mxu1 %v8321_v37  ;;  %v8431_v37 = vld [vmem:[#allocation87_spill] sm:$0xff] }
 0x456   :  { %5187 = vmatprep.subr.mxu0 %v8322_v17  ;;  %5142 = vmatpush3.msra.mxu1 %v8417_v53 }
 0x457   :  { %5188 = vmatpush3.msra.mxu0 %v8324_v26  ;;  %5143 = vmatprep.subr.mxu1 %v8418_v44 }
 0x458   :  { %5189 = vmatprep.subr.mxu0 %v8326_v5  ;;  %5144 = vmatpush3.msra.mxu1 %v8419_v14 }
 0x459   :  { %5190 = vmatpush3.msra.mxu0 %v8328_v2  ;;  %5145 = vmatprep.subr.mxu1 %v8420_v25 }
 0x45a   :  { %5191 = vmatprep.subr.mxu0 %v8330_v1  ;;  %5146 = vmatpush3.msra.mxu1 %v8421_v60 }
 0x45b   :  { %5192 = vmatpush3.msra.mxu0 %v8332_v38  ;;  %5147 = vmatprep.subr.mxu1 %v8422_v21 }
 0x45c   :  { %5193 = vmatprep.subr.mxu0 %v8334_v23  ;;  %5148 = vmatpush3.msra.mxu1 %v8423_v35 }
 0x45d   :  { %5194 = vmatpush3.msra.mxu0 %v8336_v15  ;;  %5149 = vmatprep.subr.mxu1 %v8424_v13 }
 0x45e   :  { %5195 = vmatprep.subr.mxu0 %v8338_v33  ;;  %5150 = vmatpush3.msra.mxu1 %v8425_v40 }
 0x45f   :  { %5196 = vmatpush3.msra.mxu0 %v8340_v20  ;;  %5151 = vmatprep.subr.mxu1 %v8426_v48 }
 0x460   :  { %3933 = vmatmul.mubr.f32.vlgmr.msra.gmra.mxu0 %v8427_v11  ;;  %5241 = vmatprep.subr.mxu0 %v8343_v58  ;;  %v8444_v58 = vld [vmem:[#allocation29_spill] sm:$0xff] }
 0x461   :  { %5152 = vmatpush3.msra.mxu1 %v8344_v30  ;;  %3940 = vmatprep.mubr.f32.mxu0 %v8428_v39  ;;  %v8432_v30 = vld [vmem:[#allocation90_spill] sm:$0xff] }
 0x462   :  { %5242 = vmatpush3.msra.mxu0 %v6680_v45  ;;  %5153 = vmatprep.subr.mxu1 %v8429_v12  ;;  %v8433_v45 = vld [vmem:[#allocation94_spill] sm:$0xff] }
 0x463   :  { %5243 = vmatprep.subr.mxu0 %v6688_v54  ;;  %5154 = vmatpush3.msra.mxu1 %v8430_v19  ;;  %v8434_v54 = vld [vmem:[#allocation97_spill] sm:$0xff] }
 0x464   :  { %5244 = vmatpush3.msra.mxu0 %v6697_v7  ;;  %5155 = vmatprep.subr.mxu1 %v8431_v37  ;;  %v8435_v7 = vld [vmem:[#allocation10_spill] sm:$0xff] }
 0x465   :  { %3944 = vmatmul.mubr.f32.gmra.mxu0 %v3436_v63  ;;  %5245 = vmatprep.subr.mxu0 %v6709_v42  ;;  %v8436_v42 = vld [vmem:[#allocation18_spill] sm:$0xff] }
 0x466   :  { %5156 = vmatpush3.msra.mxu1 %v8432_v30  ;;  %5246 = vmatpush3.msra.mxu0 %v6721_v16  ;;  %v8437_v16 = vld [vmem:[#allocation11_spill] sm:$0xff] }
 0x467   :  { %4221 = vmatprep.mubr.f32.mxu0 %v7410_v8  ;;  %5157 = vmatprep.subr.mxu1 %v8433_v45 }
 0x468   :  { %5247 = vmatprep.subr.mxu0 %v6735_v34  ;;  %5158 = vmatpush3.msra.mxu1 %v8434_v54  ;;  %v8438_v34 = vld [vmem:[#allocation19_spill] sm:$0xff] }
 0x469   :  { %5248 = vmatpush3.msra.mxu0 %v6749_v62  ;;  %3816 = vmatmul.mubr.f32.vlgmr.msra.gmra.mxu1 %v7493_v55  ;;  %v8439_v62 = vld [vmem:[#allocation37_spill] sm:$0xff] }
 0x46a   :  { %5203 = vmatprep.subr.mxu1 %v8435_v7  ;;  %5249 = vmatprep.subr.mxu0 %v6791_v59  ;;  %v8440_v59 = vld [vmem:[#allocation13_spill] sm:$0xff] }
 0x46b   :  { %3822 = vmatprep.mubr.f32.mxu1 %v7502_v41  ;;  %5204 = vmatpush3.msra.mxu1 %v8436_v42 }
 0x46c   :  { %5250 = vmatpush3.msra.mxu0 %v6804_v32  ;;  %5205 = vmatprep.subr.mxu1 %v8437_v16  ;;  %v8441_v32 = vld [vmem:[#allocation14_spill] sm:$0xff] }
 0x46d   :  { %5251 = vmatprep.subr.mxu0 %v6817_v18  ;;  %5206 = vmatpush3.msra.mxu1 %v8438_v34  ;;  %v8442_v18 = vld [vmem:[#allocation15_spill] sm:$0xff] }
 0x46e   :  { %5252 = vmatpush3.msra.mxu0 %v6831_v47  ;;  %3825 = vmatmul.mubr.f32.gmra.mxu1 %v7515_v56  ;;  %v8443_v47 = vld [vmem:[#allocation25_spill] sm:$0xff] }
 0x46f   :  { %5207 = vmatprep.subr.mxu1 %v8439_v62  ;;  %5253 = vmatprep.subr.mxu0 %v6846_v49  ;;  %v8445_v49 = vld [vmem:[#allocation30_spill] sm:$0xff] }
 0x470   :  { %5208 = vmatpush3.msra.mxu1 %v8440_v59  ;;  %4110 = vmatprep.mubr.f32.mxu1 %v7410_v8 }
 0x471   :  { %5254 = vmatpush3.msra.mxu0 %v6861_v61  ;;  %5209 = vmatprep.subr.mxu1 %v8441_v32  ;;  %v8446_v61 = vld [vmem:[#allocation32_spill] sm:$0xff] }
 0x472   :  { %5255 = vmatprep.subr.mxu0 %v6873_v0  ;;  %5210 = vmatpush3.msra.mxu1 %v8442_v18  ;;  %v8447_v0 = vld [vmem:[#allocation8_spill] sm:$0xff] }
 0x473   :  { %5256 = vmatpush3.msra.mxu0 %v6885_v43  ;;  %5211 = vmatprep.subr.mxu1 %v8443_v47  ;;  %v8448_v43 = vld [vmem:[#allocation31_spill] sm:$0xff] }
 0x474   :  { %5257 = vmatprep.subr.mxu0 %v6927_v3  ;;  %5212 = vmatpush3.msra.mxu1 %v8444_v58  ;;  %v8449_v3 = vld [vmem:[#allocation22_spill] sm:$0xff] }
 0x475   :  { %5258 = vmatpush3.msra.mxu0 %v6940_v46  ;;  %5213 = vmatprep.subr.mxu1 %v8445_v49  ;;  %v8450_v46 = vld [vmem:[#allocation41_spill] sm:$0xff] }
 0x476   :  { %5259 = vmatprep.subr.mxu0 %v6953_v22  ;;  %5214 = vmatpush3.msra.mxu1 %v8446_v61  ;;  %v8451_v22 = vld [vmem:[#allocation47_spill] sm:$0xff] }
 0x477   :  { %5260 = vmatpush3.msra.mxu0 %v6967_v29  ;;  %5215 = vmatprep.subr.mxu1 %v8447_v0  ;;  %v8452_v29 = vld [vmem:[#allocation51_spill] sm:$0xff] }
 0x478   :  { %5261 = vmatprep.subr.mxu0 %v8318_v52  ;;  %5216 = vmatpush3.msra.mxu1 %v8448_v43  ;;  %v8453_v52 = vld [vmem:[#allocation54_spill] sm:$0xff] }
 0x479   :  { %5262 = vmatpush3.msra.mxu0 %v8320_v6  ;;  %5217 = vmatprep.subr.mxu1 %v8449_v3  ;;  %v8454_v6 = vld [vmem:[#allocation57_spill] sm:$0xff] }
 0x47a   :  { %5263 = vmatprep.subr.mxu0 %v8322_v17  ;;  %5218 = vmatpush3.msra.mxu1 %v8450_v46  ;;  %v8455_v17 = vld [vmem:[#allocation61_spill] sm:$0xff] }
 0x47b   :  { %5264 = vmatpush3.msra.mxu0 %v8324_v26  ;;  %5219 = vmatprep.subr.mxu1 %v8451_v22  ;;  %v8456_v26 = vld [vmem:[#allocation64_spill] sm:$0xff] }
 0x47c   :  { %5265 = vmatprep.subr.mxu0 %v8326_v5  ;;  %5220 = vmatpush3.msra.mxu1 %v8452_v29  ;;  %v8457_v5 = vld [vmem:[#allocation67_spill] sm:$0xff] }
 0x47d   :  { %5266 = vmatpush3.msra.mxu0 %v8328_v2  ;;  %5221 = vmatprep.subr.mxu1 %v8453_v52  ;;  %v8458_v2 = vld [vmem:[#allocation70_spill] sm:$0xff] }
 0x47e   :  { %5267 = vmatprep.subr.mxu0 %v8330_v1  ;;  %5222 = vmatpush3.msra.mxu1 %v8454_v6  ;;  %v8459_v1 = vld [vmem:[#allocation79_spill] sm:$0xff] }
 0x47f   :  { %5268 = vmatpush3.msra.mxu0 %v8332_v38  ;;  %5223 = vmatprep.subr.mxu1 %v8455_v17  ;;  %v8460_v38 = vld [vmem:[#allocation83_spill] sm:$0xff] }
 0x480   :  { %5269 = vmatprep.subr.mxu0 %v8334_v23  ;;  %5224 = vmatpush3.msra.mxu1 %v8456_v26  ;;  %v8461_v23 = vld [vmem:[#allocation86_spill] sm:$0xff] }
 0x481   :  { %5270 = vmatpush3.msra.mxu0 %v8336_v15  ;;  %5225 = vmatprep.subr.mxu1 %v8457_v5  ;;  %v8464_v15 = vld [vmem:[#allocation99_spill] sm:$0xff] }
 0x482   :  { %5271 = vmatprep.subr.mxu0 %v8338_v33  ;;  %5226 = vmatpush3.msra.mxu1 %v8458_v2  ;;  %v8463_v33 = vld [vmem:[#allocation96_spill] sm:$0xff] }
 0x483   :  { %5272 = vmatpush3.msra.mxu0 %v8340_v20  ;;  %5227 = vmatprep.subr.mxu1 %v8459_v1  ;;  %v8465_v20 = vld [vmem:[#allocation101_spill] sm:$0xff] }
 0x484   :  { %4223 = vmatmul.mubr.f32.vlgmr.msra.gmra.mxu0 %v7478_v4  ;;  %5228 = vmatpush3.msra.mxu1 %v8460_v38 }
 0x485   :  { %4228 = vmatprep.mubr.f32.mxu0 %v7483_v10  ;;  %5229 = vmatprep.subr.mxu1 %v8461_v23 }
 0x486   :  { %5230 = vmatpush3.msra.mxu1 %v8462_v27 }
 0x487   :  { %5231 = vmatprep.subr.mxu1 %v8384_v36 }
 0x488   :  { %4230 = vmatmul.mubr.f32.gmra.mxu0 %v7498_v24  ;;  %5232 = vmatpush3.msra.mxu1 %v8463_v33 }
 0x489   :  { %5233 = vmatprep.subr.mxu1 %v8464_v15 }
 0x48a   :  { %5234 = vmatpush3.msra.mxu1 %v8465_v20 }
 0x48b   :  { %4112 = vmatmul.mubr.f32.vlgmr.msra.gmra.mxu1 %v7478_v4 }
 0x48c   :  { %4117 = vmatprep.mubr.f32.mxu1 %v7483_v10 }
 0x48f   :  { %4119 = vmatmul.mubr.f32.gmra.mxu1 %v7498_v24 }
 0x492   :  { %v7685_v8 = vpop.f32.mrf.mxu0 }
 0x494   :  { %v4894_v51 = vpop.f32.mrf.mxu0 }
 0x495   :  { %v4895_v20 = vadd.f32 %v4894_v51, %v7685_v8 }
 0x496   :  { %v7687_v41 = vpop.f32.mrf.mxu0 }
 0x498   :  { %v7689_v28 = vpop.f32.mrf.mxu0 }
 0x49a   :  { %v4855_v55 = vpop.f32.mrf.mxu1 }
 0x49c   :  { %v4856_v36 = vpop.f32.mrf.mxu1 }
 0x49d   :  { %v4857_v38 = vadd.f32 %v4856_v36, %v4855_v55  ;;  %v4898_v55 = vadd.f32 %v7689_v28, %v7687_v41 }
 0x49f   :  { %v7691_v56 = vpop.f32.mrf.mxu1 }
 0x4a1   :  { %v7695_v57 = vpop.f32.mrf.mxu1 }
 0x4b4   :  { %v7693_v50 = vpop.f32.mrf.mxu0 }
 0x4b6   :  { %v7697_v4 = vpop.f32.mrf.mxu0 }
 0x4b9   :  { %v7699_v9 = vpop.f32.mrf.mxu0 }
 0x4bb   :  { %v7701_v63 = vpop.f32.mrf.mxu0 }
 0x4bd   :  { %v4931_v10 = vpop.f32.mrf.mxu1 }
 0x4bf   :  { %v4932_v24 = vpop.f32.mrf.mxu1 }
 0x4c2   :  { %v7703_v31 = vpop.f32.mrf.mxu1 }
 0x4c4   :  { %v4935_v44 = vpop.f32.mrf.mxu1 }
 0x4d8   :  { %v7705_v53 = vpop.f32.mrf.mxu0 }
 0x4da   :  { %v7707_v14 = vpop.f32.mrf.mxu0 }
 0x4db   :  { %v5047_v28 = vadd.f32 %v7707_v14, %v7705_v53  ;;  %v5445_v53 = vld [vmem:[%s7810_s0 + $0x8] sm:$0xff] }
 0x4dd   :  { %v7711_v60 = vpop.f32.mrf.mxu0 }
 0x4df   :  { %v7713_v35 = vpop.f32.mrf.mxu0 }
 0x4e1   :  { %v7709_v25 = vpop.f32.mrf.mxu1 }
 0x4e3   :  { %v5008_v21 = vpop.f32.mrf.mxu1 }
 0x4e6   :  { %v7715_v13 = vpop.f32.mrf.mxu1 }
 0x4e8   :  { %v7717_v48 = vpop.f32.mrf.mxu1 }
 0x4e9   :  { %v5012_v41 = vadd.f32 %v7717_v48, %v7715_v13 }
 0x4fc   :  { %v5121_v40 = vpop.f32.mrf.mxu0 }
 0x4fe   :  { %v5122_v11 = vpop.f32.mrf.mxu0 }
 0x4ff   :  { %v5123_v47 = vadd.f32 %v5122_v11, %v5121_v40 }
 0x501   :  { %v5124_v12 = vpop.f32.mrf.mxu0 }
 0x503   :  { %v5125_v37 = vpop.f32.mrf.mxu0 }
 0x504   :  { %v5126_v3 = vadd.f32 %v5125_v37, %v5124_v12 }
 0x505   :  { %v5083_v39 = vpop.f32.mrf.mxu1 }
 0x507   :  { %v5084_v19 = vpop.f32.mrf.mxu1 }
 0x508   :  { %v5085_v32 = vadd.f32 %v5084_v19, %v5083_v39  ;;  %v4933_v39 = vadd.f32 %v4932_v24, %v4931_v10  ;;  %v4971_v10 = vadd.f32 %v7697_v4, %v7693_v50  ;;  %v5009_v24 = vadd.f32 %v5008_v21, %v7709_v25 }
 0x509   :  { %v5050_v50 = vadd.f32 %v7713_v35, %v7711_v60 }
 0x50a   :  { %v5086_v30 = vpop.f32.mrf.mxu1  ;;  %v3673_v61 = vadd.f32 %v5123_v47, %v5085_v32 }
 0x50c   :  { %v5087_v54 = vpop.f32.mrf.mxu1 }
 0x50d   :  { %v5088_v0 = vadd.f32 %v5087_v54, %v5086_v30  ;;  %v2755_v30 = vadd.f32 %v4895_v20, %v4857_v38 }
 0x50f   :  { %v3680_v52 = vadd.f32 %v5126_v3, %v5088_v0  ;;  %v2900_v36 = vadd.f32 %v4933_v39, %v2755_v30 }
 0x520   :  { %v5197_v45 = vpop.f32.mrf.mxu0 }
 0x522   :  { %v5198_v7 = vpop.f32.mrf.mxu0 }
 0x523   :  { %v5199_v6 = vadd.f32 %v5198_v7, %v5197_v45  ;;  %v4860_v45 = vadd.f32 %v7695_v57, %v7691_v56  ;;  %v4974_v56 = vadd.f32 %v7701_v63, %v7699_v9  ;;  %v5444_v9 = vld [vmem:[%s7810_s0] sm:$0xff] }
 0x525   :  { %v5200_v16 = vpop.f32.mrf.mxu0  ;;  %v2762_v51 = vadd.f32 %v4898_v55, %v4860_v45 }
 0x527   :  { %v5201_v62 = vpop.f32.mrf.mxu0 }
 0x528   :  { %v5202_v27 = vadd.f32 %v5201_v62, %v5200_v16 }
 0x529   :  { %v5159_v42 = vpop.f32.mrf.mxu1 }
 0x52b   :  { %v5160_v34 = vpop.f32.mrf.mxu1 }
 0x52c   :  { %v5161_v58 = vadd.f32 %v5160_v34, %v5159_v42  ;;  %v4936_v42 = vadd.f32 %v4935_v44, %v7703_v31  ;;  %v3017_v34 = vadd.f32 %v4971_v10, %v2900_v36  ;;  %v4372_v10 = vld [vmem:[%s7823_s13] sm:$0xff] }
 0x52e   :  { %v5162_v59 = vpop.f32.mrf.mxu1  ;;  %v3818_v46 = vadd.f32 %v5161_v58, %v3673_v61  ;;  %v2909_v16 = vadd.f32 %v4936_v42, %v2762_v51  ;;  %v3196_v57 = vadd.f32 %v5009_v24, %v3017_v34  ;;  %v4375_v42 = vld [vmem:[%s7823_s13 + $0x18] sm:$0xff]  ;;  %v4373_v51 = vld [vmem:[%s7823_s13 + $0x8] sm:$0xff] }
 0x52f   :  { %v8467_v24 = vld [vmem:[#allocation38_spill] sm:$0xff] }
 0x530   :  { %v5163_v49 = vpop.f32.mrf.mxu1  ;;  %v3935_v2 = vadd.f32 %v5199_v6, %v3818_v46  ;;  %v3028_v31 = vadd.f32 %v4974_v56, %v2909_v16  ;;  %v3307_v44 = vadd.f32 %v5047_v28, %v3196_v57  ;;  %v4284_v46 = vld [vmem:[%s7822_s12 + $0x18] sm:$0xff] }
 0x531   :  { %v5164_v22 = vadd.f32 %v5163_v49, %v5162_v59  ;;  %5295 = vmatprep.subr.mxu1 %v4284_v46  ;;  %v4379_v6 = vld [vmem:[%s7823_s13 + $0x38] sm:$0xff] }
 0x532   :  { %v3203_v62 = vadd.f32 %v5012_v41, %v3028_v31  ;;  %5296 = vmatpush3.msra.mxu1 %v4284_v46  ;;  %5306 = vmatprep.subr.mxu0 %v4379_v6 }
 0x533   :  { %v3827_v5 = vadd.f32 %v5164_v22, %v3680_v52  ;;  %v4283_v22 = vld [vmem:[%s7822_s12 + $0x10] sm:$0xff]  ;;  %v4281_v52 = vld [vmem:[%s7822_s12] sm:$0xff]  ;;  %5307 = vmatpush3.msra.mxu0 %v4379_v6 }
 0x534   :  { %v3314_v25 = vadd.f32 %v5050_v50, %v3203_v62  ;;  %5297 = vmatprep.subr.mxu1 %v4283_v22 }
 0x535   :  { %v3946_v19 = vadd.f32 %v5202_v27, %v3827_v5  ;;  %5298 = vmatpush3.msra.mxu1 %v4283_v22  ;;  %v4376_v5 = vld [vmem:[%s7823_s13 + $0x20] sm:$0xff] }
 0x544   :  { %v5273_v18 = vpop.f32.mrf.mxu0 }
 0x546   :  { %v5274_v43 = vpop.f32.mrf.mxu0 }
 0x547   :  { %v5275_v33 = vadd.f32 %v5274_v43, %v5273_v18 }
 0x548   :  { %v5276_v17 = vpop.f32.mrf.mxu0 }
 0x54a   :  { %v5277_v40 = vpop.f32.mrf.mxu0 }
 0x54b   :  { %v5235_v29 = vpop.f32.mrf.mxu1  ;;  %v5278_v54 = vadd.f32 %v5277_v40, %v5276_v17  ;;  %v4378_v17 = vld [vmem:[%s7823_s13 + $0x30] sm:$0xff]  ;;  %v7774_v40 = vld [vmem:[%s7824_s14] sm:$0xff] }
 0x54c   :  { %5308 = vmatprep.subr.mxu0 %v4378_v17  ;;  %v4288_v16 = vrot.slane %v7774_v40, %v8467_v24 }
 0x54d   :  { %v5236_v26 = vpop.f32.mrf.mxu1  ;;  %5309 = vmatpush3.msra.mxu0 %v4378_v17 }
 0x54e   :  { %v5237_v1 = vadd.f32 %v5236_v26, %v5235_v29  ;;  %v4282_v29 = vld [vmem:[%s7822_s12 + $0x8] sm:$0xff] }
 0x54f   :  { %v5238_v23 = vpop.f32.mrf.mxu1  ;;  %5299 = vmatprep.subr.mxu1 %v4282_v29  ;;  %v4377_v26 = vld [vmem:[%s7823_s13 + $0x28] sm:$0xff] }
 0x550   :  { %v4114_v15 = vadd.f32 %v5237_v1, %v3935_v2  ;;  %5300 = vmatpush3.msra.mxu1 %v4282_v29  ;;  %5310 = vmatprep.subr.mxu0 %v4377_v26 }
 0x551   :  { %v5239_v11 = vpop.f32.mrf.mxu1  ;;  %5301 = vmatprep.subr.mxu1 %v4281_v52  ;;  %5311 = vmatpush3.msra.mxu0 %v4377_v26 }
 0x552   :  { %v4225_v12 = vadd.f32 %v5275_v33, %v4114_v15  ;;  %v5240_v37 = vadd.f32 %v5239_v11, %v5238_v23  ;;  %5302 = vmatpush3.msra.mxu1 %v4281_v52  ;;  %5312 = vmatprep.subr.mxu0 %v4376_v5  ;;  %v8466_v15 = vld [vmem:[#allocation5_spill] sm:$0xff] }
 0x553   :  { %5313 = vmatpush3.msra.mxu0 %v4376_v5  ;;  %v4271_v20 = vsub.s32 2, %v8466_v15  ;;  %v4277_v11 = vsub.s32 3, %v8466_v15  ;;  %v4496_v29 = vsub.s32 4, %v8466_v15  ;;  %v4502_v52 = vsub.s32 5, %v8466_v15 }
 0x554   :  { %5432 = vrcp.f32 %v4225_v12  ;;  %v4121_v7 = vadd.f32 %v5240_v37, %v3946_v19  ;;  %5314 = vmatprep.subr.mxu0 %v4375_v42 }
 0x555   :  { %v4272_v39 = vrot.slane %v7774_v40, %v4271_v20  ;;  %v4278_v37 = vrot.slane %v7774_v40, %v4277_v11  ;;  %5315 = vmatpush3.msra.mxu0 %v4375_v42  ;;  %v4497_v6 = vrot.slane %v7774_v40, %v4496_v29  ;;  %v4503_v5 = vrot.slane %v7774_v40, %v4502_v52 }
 0x556   :  { %v4232_v8 = vadd.f32 %v5278_v54, %v4121_v7 }
 0x558   :  { %5434 = vrcp.f32 %v4232_v8  ;;  %v4374_v8 = vld [vmem:[%s7823_s13 + $0x10] sm:$0xff]  ;;  %s5471_s13 = smov [#allocation2]  }
 0x559   :  { %5316 = vmatprep.subr.mxu0 %v4374_v8  ;;  %s4513_s2 = sshll.u32 %s5471_s13, 4  ;;  %s4514_s2 = int_to_ptr.vmem [resolvable:$true] %s4513_s2 }
 0x55a   :  { %5317 = vmatpush3.msra.mxu0 %v4374_v8  ;;  %s5446_s10 = scalar_lea.vmem %s4514_s2, 256  ;;  %p5451_p1 = scmp.lt.s32.totalorder %s4514_s2, %s4514_s2 }
 0x55b   :  { %5318 = vmatprep.subr.mxu0 %v4373_v51  ;;  %p5447_p0 = scmp.ne.s32.totalorder %s4514_s2, %s5446_s10  ;;  %p5452_p2 = scmp.lt.s32.totalorder %s5446_s10, %s5446_s10 }
 0x55c   :  { %5319 = vmatpush3.msra.mxu0 %v4373_v51 }
 0x55d   :  { %5320 = vmatprep.subr.mxu0 %v4372_v10  ;;  %p5453_p3 = por %p5452_p2, %p5451_p1 }
 0x55e   :  { %5321 = vmatpush3.msra.mxu0 %v4372_v10 }
 0x55f   :  { %p5454_p4 = pnand %p5453_p3, %p5447_p0 }
 0x561   :  { %v5433_v59 = vpop.eup %5432 }
 0x562   :  { %v4237_v4 = vmul.f32 %v5433_v59, %v3307_v44  ;;  %v8468_v44 = vld [vmem:[#allocation39_spill] sm:$0xff] }
 0x563   :  { %v4383_v62 = vrot.slane %v7774_v40, %v8468_v44 }
 0x564   :  { %v4240_v63 = vadd.f32 %v5444_v9, %v4237_v4 }
 0x565   :  { %v5435_v21 = vpop.eup %5434 }
 0x566   :  { %v4242_v13 = vsel %vm73_vm0, %v4240_v63, 0.0  ;;  %v4238_v48 = vmul.f32 %v5435_v21, %v3314_v25 }
 0x567   :  { %4243 = vadd.xlane.f32.xlu1 %v4242_v13 }
 0x568   :  { %v4241_v14 = vadd.f32 %v5445_v53, %v4238_v48 }
 0x56a   :  { %v4245_v32 = vsel %vm73_vm0, %v4241_v14, 0.0 }
 0x56b   :  { %4246 = vadd.xlane.f32.xlu1 %v4245_v32 }
 0x5f0   :  { %v4244_v60 = vpop.xlane.xlu1 %4243 }
 0x5f1   :  { %v4249_v35 = vmul.f32 0.03125, %v4244_v60 }
 0x5f3   :  { %v4251_v18 = vsub.f32 %v4240_v63, %v4249_v35 }
 0x5f4   :  { %v4247_v47 = vpop.xlane.xlu1 %4246 }
 0x5f5   :  { %v4250_v58 = vmul.f32 0.03125, %v4247_v47  ;;  %v4253_v49 = vmul.f32 %v4251_v18, %v4251_v18 }
 0x5f7   :  { %v4252_v61 = vsub.f32 %v4241_v14, %v4250_v58  ;;  %v4255_v0 = vsel %vm73_vm0, %v4253_v49, 0.0 }
 0x5f8   :  { %4256 = vadd.xlane.f32.xlu0 %v4255_v0 }
 0x5f9   :  { %v4254_v43 = vmul.f32 %v4252_v61, %v4252_v61 }
 0x5fb   :  { %v4258_v3 = vsel %vm73_vm0, %v4254_v43, 0.0 }
 0x5fc   :  { %4259 = vadd.xlane.f32.xlu1 %v4258_v3 }
 0x681   :  { %v4257_v2 = vpop.xlane.xlu0 %4256 }
 0x682   :  { %v4261_v1 = vmul.f32 0.03125, %v4257_v2 }
 0x684   :  { %v4263_v38 = vadd.f32 1e-05, %v4261_v1 }
 0x685   :  { %v4260_v23 = vpop.xlane.xlu1 %4259 }
 0x686   :  { %5436 = vrsqrt.f32 %v4263_v38  ;;  %v4262_v27 = vmul.f32 0.03125, %v4260_v23 }
 0x688   :  { %v4264_v33 = vadd.f32 1e-05, %v4262_v27 }
 0x68a   :  { %5438 = vrsqrt.f32 %v4264_v33 }
 0x693   :  { %v5437_v12 = vpop.eup %5436 }
 0x694   :  { %v4267_v19 = vmul.f32 %v5437_v12, %v4251_v18 }
 0x696   :  { %v4273_v30 = vmul.f32 %v4272_v39, %v4267_v19 }
 0x697   :  { %v5439_v45 = vpop.eup %5438 }
 0x698   :  { %v4268_v54 = vmul.f32 %v5439_v45, %v4252_v61  ;;  %v4279_v7 = vadd.f32 %v4278_v37, %v4273_v30 }
 0x69a   :  { %v4274_v55 = vmul.f32 %v4272_v39, %v4268_v54  ;;  %5303 = vmatprep.mubr.msk.f32.mxu1 %vm73_vm0, %v4279_v7 }
 0x69c   :  { %v4280_v36 = vadd.f32 %v4278_v37, %v4274_v55 }
 0x69e   :  { %5304 = vmatmul.mubr.msk.f32.vlgmr.msra.gmra.mxu1 %vm73_vm0, %v4280_v36 }
 0x75e   :  { %v5305_v34 = vpop.f32.mrf.mxu1 }
 0x75f   :  { %v4367_v56 = vadd.f32 %v5305_v34, %v4288_v16 }
 0x760   :  { %v4361_v57 = vpop.f32.mrf.mxu1 }
 0x761   :  { %v4362_v41 = vadd.f32 %v4361_v57, %v4288_v16  ;;  %v4371_v31 = vmax.f32 %v4367_v56, 0.0 }
 0x763   :  { %v4370_v28 = vmax.f32 %v4362_v41, 0.0 }
 0x765   :  { %5322 = vmatprep.mubr.msk.f32.mxu0 %vm4384_vm1, %v4370_v28 }
 0x766   :  { %5323 = vmatmul.mubr.msk.f32.vlgmr.msra.gmra.mxu0 %vm4384_vm1, %v4371_v31 }
 0x826   :  { %v5324_v59 = vpop.f32.mrf.mxu0 }
 0x827   :  { %v4463_v50 = vadd.f32 %v5324_v59, %v4383_v62 }
 0x828   :  { %v4457_v4 = vpop.f32.mrf.mxu0 }
 0x829   :  { %v4458_v25 = vadd.f32 %v4457_v4, %v4383_v62  ;;  %v4467_v9 = vadd.f32 %v4463_v50, %v4280_v36 }
 0x82b   :  { %v4471_v63 = vsel %vm73_vm0, %v4467_v9, 0.0  ;;  %v4466_v21 = vadd.f32 %v4458_v25, %v4279_v7 }
 0x82c   :  { %4472 = vadd.xlane.f32.xlu1 %v4471_v63 }
 0x82d   :  { %v4468_v13 = vsel %vm73_vm0, %v4466_v21, 0.0 }
 0x82e   :  { %4469 = vadd.xlane.f32.xlu0 %v4468_v13 }
 0x8b5   :  { %v4473_v48 = vpop.xlane.xlu1 %4472 }
 0x8b6   :  { %v4475_v53 = vmul.f32 0.03125, %v4473_v48 }
 0x8b7   :  { %v4470_v14 = vpop.xlane.xlu0 %4469 }
 0x8b8   :  { %v4477_v32 = vsub.f32 %v4467_v9, %v4475_v53  ;;  %v4474_v60 = vmul.f32 0.03125, %v4470_v14 }
 0x8ba   :  { %v4476_v35 = vsub.f32 %v4466_v21, %v4474_v60  ;;  %v4479_v18 = vmul.f32 %v4477_v32, %v4477_v32 }
 0x8bc   :  { %v4483_v47 = vsel %vm73_vm0, %v4479_v18, 0.0  ;;  %v4478_v58 = vmul.f32 %v4476_v35, %v4476_v35 }
 0x8bd   :  { %4484 = vadd.xlane.f32.xlu1 %v4483_v47 }
 0x8be   :  { %v4480_v49 = vsel %vm73_vm0, %v4478_v58, 0.0 }
 0x8bf   :  { %4481 = vadd.xlane.f32.xlu0 %v4480_v49 }
 0x946   :  { %v4485_v61 = vpop.xlane.xlu1 %4484 }
 0x947   :  { %v4487_v0 = vmul.f32 0.03125, %v4485_v61 }
 0x948   :  { %v4482_v43 = vpop.xlane.xlu0 %4481 }
 0x949   :  { %v4489_v3 = vadd.f32 1e-05, %v4487_v0  ;;  %v4486_v46 = vmul.f32 0.03125, %v4482_v43 }
 0x94b   :  { %5440 = vrsqrt.f32 %v4489_v3  ;;  %v4488_v22 = vadd.f32 1e-05, %v4486_v46 }
 0x94d   :  { %5442 = vrsqrt.f32 %v4488_v22 }
 0x958   :  { %v5441_v17 = vpop.eup %5440 }
 0x959   :  { %v4493_v26 = vmul.f32 %v5441_v17, %v4477_v32 }
 0x95a   :  { %v5443_v2 = vpop.eup %5442 }
 0x95b   :  { %v4492_v1 = vmul.f32 %v5443_v2, %v4476_v35  ;;  %v4499_v38 = vmul.f32 %v4497_v6, %v4493_v26 }
 0x95d   :  { %v4498_v23 = vmul.f32 %v4497_v6, %v4492_v1  ;;  %v4505_v27 = vadd.f32 %v4503_v5, %v4499_v38 }
 0x95f   :  { %v4504_v33 = vadd.f32 %v4503_v5, %v4498_v23  ;;  %4507 = vst.msk [vmem:[#allocation2 + $0x8] sm:$0xff] %vm73_vm0, %v4505_v27 }
 0x961   :  { %4506 = vst.msk [vmem:[#allocation2] sm:$0xff] %vm73_vm0, %v4504_v33 }
 0x962   :  { %5457 = shalt.err (!%p5454_p4)
}
 0x963   :  { %s5472_s18 = smov 128   ;;  %s5473_s19 = smov 8  }
 0x964   :  { %4519 = dma.vmem_to_hbm [thread:$0]  %s4514_s2, 256, %s7825_s15, [#allocation3], %s5472_s18, %s5472_s18, %s5473_s19  }
 0x965   :  { %5466 = dma.done.wait [#allocation3], 256  }
 0x966   :  { %5467 = vsyncadd [#allocation3], 4294967040 }
 0x967   :  { %4523 = vsyncpa [#allocation3], 1 }

</bundles_post_ra>
